<compile_context>
chip_gen: v5e
topology: v5e:2x2
jax: 0.10.0
libtpu: 0.0.40
codegen_flags: <defaults>
</compile_context>

<pallas_src>
import functools

import jax
import jax.numpy as jnp
import numpy as np
from jax import lax
from jax.experimental import pallas as pl
from jax.experimental.pallas import tpu as pltpu

LANES = 128


def _ru(x, m):
    return (x + m - 1) // m * m


def _pad_last(a, target):
    pad = target - a.shape[-1]
    if pad == 0:
        return a
    return jnp.pad(a, [(0, 0)] * (a.ndim - 1) + [(0, pad)])


# -----------------------------------------------------------------------------
# Kernel 1: fused (patches @ W_scaled) + bias [+ ReLU]      (used for conv1)
#   grid = (M tiles, Cout tiles); bf16 operands, f32 MXU accumulation.
# -----------------------------------------------------------------------------
def _matmul_bias_act_kernel(x_ref, w_ref, b_ref, o_ref, *, apply_relu):
    acc = jnp.dot(x_ref[...], w_ref[...], preferred_element_type=jnp.float32)
    out = acc + b_ref[...]                      # BN already folded: bias only
    if apply_relu:
        out = jnp.maximum(out, 0.0)
    o_ref[...] = out.astype(o_ref.dtype)


def fused_matmul_bias_act(patches, w_mat, bias, *, apply_relu=True, tm=256, tn=LANES):
    """patches: (M, K) bf16; w_mat: (K, Cout_p) bf16 (BN scale folded); bias: (1, Cout_p) f32."""
    M, K = patches.shape
    Cout_p = w_mat.shape[1]
    tm = max(8, min(tm, _ru(M, 8)))             # big tile, clamped to the problem size
    Mp = _ru(M, tm)
    if Mp != M:
        patches = jnp.pad(patches, ((0, Mp - M), (0, 0)))   # garbage rows sliced off below

    out = pl.pallas_call(
        functools.partial(_matmul_bias_act_kernel, apply_relu=apply_relu),
        out_shape=jax.ShapeDtypeStruct((Mp, Cout_p), jnp.bfloat16),
        grid_spec=pltpu.PrefetchScalarGridSpec(
            num_scalar_prefetch=0,
            grid=(Mp // tm, Cout_p // tn),
            in_specs=[
                pl.BlockSpec((tm, K), lambda i, j: (i, 0)),
                pl.BlockSpec((K, tn), lambda i, j: (0, j)),
                pl.BlockSpec((1, tn), lambda i, j: (0, j)),
            ],
            out_specs=pl.BlockSpec((tm, tn), lambda i, j: (i, j)),
        ),
        compiler_params=pltpu.CompilerParams(
            dimension_semantics=("parallel", "parallel")),
    )(patches, w_mat, bias)
    return out[:M]


# -----------------------------------------------------------------------------
# Kernel 2: direct 3x3 stride-1 conv + BN bias + shortcut (+ fused 1x1 proj) + ReLU
#   grid = (N, Cout tiles). No im2col: per output row accumulate 9 shifted
#   (Wo, Cp) @ (Cp, tn) dots from the padded NHWC activation tile in VMEM.
# -----------------------------------------------------------------------------
def _conv3x3_res_kernel(h_ref, w_ref, b_ref, *rest, has_proj):
    if has_proj:
        xs_ref, wsc_ref, bsc_ref, o_ref = rest
    else:
        res_ref, o_ref = rest
    Ho, Wo, tn = o_ref.shape
    bias = b_ref[...]                                          # (1, tn) f32

    for ho in range(Ho):                                       # static unroll (small Ho)
        acc = jnp.zeros((Wo, tn), jnp.float32)
        for dy in range(3):
            for dx in range(3):
                win = h_ref[ho + dy, dx:dx + Wo, :]            # (Wo, Cp) bf16, static slice
                acc = acc + jnp.dot(win, w_ref[3 * dy + dx],
                                    preferred_element_type=jnp.float32)
        acc = acc + bias
        if has_proj:                                           # fused 1x1 shortcut conv + BN
            acc = acc + jnp.dot(xs_ref[ho], wsc_ref[...],
                                preferred_element_type=jnp.float32) + bsc_ref[...]
        else:                                                  # identity shortcut
            acc = acc + res_ref[ho].astype(jnp.float32)
        o_ref[ho] = jnp.maximum(acc, 0.0).astype(o_ref.dtype)


def conv3x3_bn_residual_relu(h1, w2_mat, b2, shortcut, sc_w=None, sc_b=None, *, tn=LANES):
    """h1: (N, Ho, Wo, Cp) bf16; w2_mat: (9, Cp, Cout_p) bf16 (BN scale folded);
    b2: (1, Cout_p) f32; shortcut: strided x rows (projection) or channel-padded x (identity)."""
    N, Ho, Wo, Cp = h1.shape
    Cout_p = w2_mat.shape[-1]
    h1p = jnp.pad(h1, ((0, 0), (1, 1), (1, 1), (0, 0)))        # halo for pad=1 conv
    has_proj = sc_w is not None

    in_specs = [
        pl.BlockSpec((None, Ho + 2, Wo + 2, Cp), lambda n, co: (n, 0, 0, 0)),
        pl.BlockSpec((9, Cp, tn), lambda n, co: (0, 0, co)),
        pl.BlockSpec((1, tn), lambda n, co: (0, co)),
    ]
    args = [h1p, w2_mat, b2]
    if has_proj:
        Cin = shortcut.shape[-1]
        in_specs += [
            pl.BlockSpec((None, Ho, Wo, Cin), lambda n, co: (n, 0, 0, 0)),
            pl.BlockSpec((Cin, tn), lambda n, co: (0, co)),
            pl.BlockSpec((1, tn), lambda n, co: (0, co)),
        ]
        args += [shortcut, sc_w, sc_b]
    else:
        in_specs += [pl.BlockSpec((None, Ho, Wo, tn), lambda n, co: (n, 0, 0, co))]
        args += [shortcut]

    return pl.pallas_call(
        functools.partial(_conv3x3_res_kernel, has_proj=has_proj),
        out_shape=jax.ShapeDtypeStruct((N, Ho, Wo, Cout_p), jnp.bfloat16),
        grid_spec=pltpu.PrefetchScalarGridSpec(
            num_scalar_prefetch=0,
            grid=(N, Cout_p // tn),
            in_specs=in_specs,
            out_specs=pl.BlockSpec((None, Ho, Wo, tn), lambda n, co: (n, 0, 0, co)),
        ),
        compiler_params=pltpu.CompilerParams(
            dimension_semantics=("parallel", "parallel")),
    )(*args)


# -----------------------------------------------------------------------------
# Glue: im2col (conv1 only), BN folding, block forward
# -----------------------------------------------------------------------------
def fold_bn(gamma, beta, mean, var, eps=1e-5):
    scale = gamma / jnp.sqrt(var + eps)
    return scale, beta - mean * scale


def im2col3x3(x_nhwc, stride):
    N, H, W, C = x_nhwc.shape
    xp = jnp.pad(x_nhwc, ((0, 0), (1, 1), (1, 1), (0, 0)))
    Ho = (H - 1) // stride + 1
    Wo = (W - 1) // stride + 1
    taps = []
    for dy in range(3):
        for dx in range(3):
            taps.append(xp[:, dy:dy + stride * (Ho - 1) + 1:stride,
                            dx:dx + stride * (Wo - 1) + 1:stride, :])
    patches = jnp.stack(taps, axis=3)                 # (N, Ho, Wo, 9, C)
    return patches.reshape(N * Ho * Wo, 9 * C), (Ho, Wo)


@functools.partial(jax.jit, static_argnames=("stride",))
def resnet_block_forward(x_nchw, params, stride):
    N, Cin, H, W = x_nchw.shape
    Cout = params["w1"].shape[0]
    Cout_p = _ru(Cout, LANES)                         # lane-dense padded channel count

    x = jnp.transpose(x_nchw, (0, 2, 3, 1)).astype(jnp.bfloat16)     # NHWC, cast once

    # conv1 (3x3, stride, pad 1) + bn1 + relu   -- im2col matmul kernel
    s1, b1 = fold_bn(params["g1"], params["b1"], params["m1"], params["v1"])
    w1m = jnp.transpose(params["w1"], (2, 3, 1, 0)).reshape(-1, Cout) * s1[None, :]
    w1m = _pad_last(w1m, Cout_p).astype(jnp.bfloat16)
    b1p = _pad_last(b1[None, :], Cout_p).astype(jnp.float32)
    patches, (Ho, Wo) = im2col3x3(x, stride)
    h1 = fused_matmul_bias_act(patches, w1m, b1p, apply_relu=True)    # (M, Cout_p) bf16
    h1 = h1.reshape(N, Ho, Wo, Cout_p)                # padded channels are exact zeros

    # shortcut operands
    if stride != 1 or Cin != Cout:
        ssc, bsc = fold_bn(params["gsc"], params["bsc"], params["msc"], params["vsc"])
        wscm = jnp.transpose(params["wsc"][:, :, 0, 0], (1, 0)) * ssc[None, :]
        sc_w = _pad_last(wscm, Cout_p).astype(jnp.bfloat16)
        sc_b = _pad_last(bsc[None, :], Cout_p).astype(jnp.float32)
        shortcut = x[:, ::stride, ::stride, :]        # rows for the fused 1x1 conv
    else:
        sc_w = sc_b = None
        shortcut = _pad_last(x, Cout_p)               # identity residual, channel-padded

    # conv2 (3x3, stride 1, pad 1) + bn2 + shortcut + relu  -- single fused kernel, no im2col
    s2, b2 = fold_bn(params["g2"], params["b2"], params["m2"], params["v2"])
    w2m = jnp.transpose(params["w2"], (2, 3, 1, 0)).reshape(9, Cout, Cout) * s2[None, None, :]
    w2m = jnp.pad(w2m, ((0, 0), (0, Cout_p - Cout), (0, Cout_p - Cout))).astype(jnp.bfloat16)
    b2p = _pad_last(b2[None, :], Cout_p).astype(jnp.float32)
    out = conv3x3_bn_residual_relu(h1, w2m, b2p, shortcut, sc_w, sc_b)

    out = out[..., :Cout].astype(jnp.float32)
    return jnp.transpose(out, (0, 3, 1, 2))           # back to NCHW


# -----------------------------------------------------------------------------
# Pure-JAX reference (same inference-mode BN semantics) for validation
# -----------------------------------------------------------------------------
def _conv_ref(x, w, stride, pad):
    return lax.conv_general_dilated(
        x, w, (stride, stride), [(pad, pad), (pad, pad)],
        dimension_numbers=("NCHW", "OIHW", "NCHW"))


def _bn_ref(x, g, b, m, v, eps=1e-5):
    sh = (1, -1, 1, 1)
    return (x - m.reshape(sh)) / jnp.sqrt(v.reshape(sh) + eps) * g.reshape(sh) + b.reshape(sh)


def resnet_block_ref(x, p, stride):
    Cin, Cout = x.shape[1], p["w1"].shape[0]
    out = jax.nn.relu(_bn_ref(_conv_ref(x, p["w1"], stride, 1),
                              p["g1"], p["b1"], p["m1"], p["v1"]))
    out = _bn_ref(_conv_ref(out, p["w2"], 1, 1), p["g2"], p["b2"], p["m2"], p["v2"])
    if stride != 1 or Cin != Cout:
        sc = _bn_ref(_conv_ref(x, p["wsc"], stride, 0),
                     p["gsc"], p["bsc"], p["msc"], p["vsc"])
    else:
        sc = x
    return jax.nn.relu(out + sc)


def _make_params(key, Cin, Cout):
    ks = jax.random.split(key, 15)
    return {
        "w1": jax.random.normal(ks[0], (Cout, Cin, 3, 3), jnp.float32) * 0.1,
        "g1": 0.5 + jax.random.uniform(ks[1], (Cout,), jnp.float32),
        "b1": jax.random.normal(ks[2], (Cout,), jnp.float32) * 0.1,
        "m1": jax.random.normal(ks[3], (Cout,), jnp.float32) * 0.1,
        "v1": 0.5 + jax.random.uniform(ks[4], (Cout,), jnp.float32),
        "w2": jax.random.normal(ks[5], (Cout, Cout, 3, 3), jnp.float32) * 0.1,
        "g2": 0.5 + jax.random.uniform(ks[6], (Cout,), jnp.float32),
        "b2": jax.random.normal(ks[7], (Cout,), jnp.float32) * 0.1,
        "m2": jax.random.normal(ks[8], (Cout,), jnp.float32) * 0.1,
        "v2": 0.5 + jax.random.uniform(ks[9], (Cout,), jnp.float32),
        "wsc": jax.random.normal(ks[10], (Cout, Cin, 1, 1), jnp.float32) * 0.1,
        "gsc": 0.5 + jax.random.uniform(ks[11], (Cout,), jnp.float32),
        "bsc": jax.random.normal(ks[12], (Cout,), jnp.float32) * 0.1,
        "msc": jax.random.normal(ks[13], (Cout,), jnp.float32) * 0.1,
        "vsc": 0.5 + jax.random.uniform(ks[14], (Cout,), jnp.float32),
    }


if __name__ == "__main__":
    key = jax.random.PRNGKey(0)
    k_a, k_b, k_xa, k_xb = jax.random.split(key, 4)

    # Config A: projection shortcut (stride=2, Cin != Cout)
    N, Cin, Cout, H, W, stride = 2, 4, 8, 16, 16, 2
    params_a = _make_params(k_a, Cin, Cout)
    x_a = jax.random.normal(k_xa, (N, Cin, H, W), jnp.float32)
    out_a = jax.block_until_ready(resnet_block_forward(x_a, params_a, stride))
    ref_a = jax.block_until_ready(resnet_block_ref(x_a, params_a, stride))
    assert out_a.shape == (N, Cout, H // stride, W // stride), out_a.shape
    np.testing.assert_allclose(np.asarray(out_a), np.asarray(ref_a), rtol=5e-2, atol=5e-2)

    # Config B: identity shortcut (stride=1, Cin == Cout)
    params_b = _make_params(k_b, Cout, Cout)
    x_b = jax.random.normal(k_xb, (N, Cout, H, W), jnp.float32)
    out_b = jax.block_until_ready(resnet_block_forward(x_b, params_b, 1))
    ref_b = jax.block_until_ready(resnet_block_ref(x_b, params_b, 1))
    assert out_b.shape == (N, Cout, H, W), out_b.shape
    np.testing.assert_allclose(np.asarray(out_b), np.asarray(ref_b), rtol=5e-2, atol=5e-2)

    print("KERNEL_OK")
</pallas_src>

<mosaic_0001>
module attributes {stable_mosaic.version = 11 : i64} {
  func.func @_matmul_bias_act_kernel(%arg0: i32, %arg1: i32, %arg2: memref<128x36xbf16, #tpu.memory_space<vmem>>, %arg3: memref<36x128xbf16, #tpu.memory_space<vmem>>, %arg4: memref<1x128xf32, #tpu.memory_space<vmem>>, %arg5: memref<128x128xbf16, #tpu.memory_space<vmem>>) attributes {dimension_semantics = [#tpu.dimension_semantics<parallel>, #tpu.dimension_semantics<parallel>], iteration_bounds = array<i64: 1, 1>, scalar_prefetch = 0 : i64, scratch_operands = 0 : i64, tpu.core_type = #tpu.core_type<tc>, window_params = [{transform_indices = @transform_0, window_bounds = array<i64: 128, 36>}, {transform_indices = @transform_1, window_bounds = array<i64: 36, 128>}, {transform_indices = @transform_2, window_bounds = array<i64: 1, 128>}, {transform_indices = @transform_3, window_bounds = array<i64: 128, 128>}]} {
    %c0 = arith.constant 0 : index
    %c0_0 = arith.constant 0 : index
    %0 = vector.load %arg2[%c0, %c0_0] : memref<128x36xbf16, #tpu.memory_space<vmem>>, vector<128x36xbf16>
    %c0_1 = arith.constant 0 : index
    %c0_2 = arith.constant 0 : index
    %1 = vector.load %arg3[%c0_1, %c0_2] : memref<36x128xbf16, #tpu.memory_space<vmem>>, vector<36x128xbf16>
    %cst = arith.constant dense<0.000000e+00> : vector<128x128xf32>
    %2 = tpu.matmul %0, %1, %cst {dimension_numbers = #tpu.dot_dimension_numbers<[1], [0], [0], [1], [0, 0, 1, 1], [], []>} : vector<128x36xbf16>, vector<36x128xbf16>, vector<128x128xf32> -> vector<128x128xf32>
    %c0_3 = arith.constant 0 : index
    %c0_4 = arith.constant 0 : index
    %3 = vector.load %arg4[%c0_3, %c0_4] : memref<1x128xf32, #tpu.memory_space<vmem>>, vector<1x128xf32>
    %4 = vector.broadcast %3 : vector<1x128xf32> to vector<128x128xf32>
    %5 = arith.addf %2, %4 : vector<128x128xf32>
    %cst_5 = arith.constant 0.000000e+00 : f32
    %6 = vector.broadcast %cst_5 : f32 to vector<128x128xf32>
    %7 = arith.maximumf %5, %6 : vector<128x128xf32>
    %8 = arith.truncf %7 : vector<128x128xf32> to vector<128x128xbf16>
    %c0_6 = arith.constant 0 : index
    %c0_7 = arith.constant 0 : index
    %9 = vector.load %arg5[%c0_6, %c0_7] : memref<128x128xbf16, #tpu.memory_space<vmem>>, vector<128x128xbf16>
    tpu.vector_store %arg5[%c0_6, %c0_7], %8 {strides = array<i32>} : memref<128x128xbf16, #tpu.memory_space<vmem>>, vector<128x128xbf16>,
    return
  }
  func.func @transform_0(%arg0: i32, %arg1: i32) -> (i32, i32) {
    %c0_i32 = arith.constant 0 : i32
    %c0_i32_0 = arith.constant 0 : i32
    return %arg0, %c0_i32 : i32, i32
  }
  func.func @transform_1(%arg0: i32, %arg1: i32) -> (i32, i32) {
    %c0_i32 = arith.constant 0 : i32
    %c0_i32_0 = arith.constant 0 : i32
    return %c0_i32, %arg1 : i32, i32
  }
  func.func @transform_2(%arg0: i32, %arg1: i32) -> (i32, i32) {
    %c0_i32 = arith.constant 0 : i32
    %c0_i32_0 = arith.constant 0 : i32
    return %c0_i32, %arg1 : i32, i32
  }
  func.func @transform_3(%arg0: i32, %arg1: i32) -> (i32, i32) {
    %c0_i32 = arith.constant 0 : i32
    return %arg0, %arg1 : i32, i32
  }
}

module attributes {stable_mosaic.version = 11 : i64} {
  func.func @_conv3x3_res_kernel(%arg0: i32, %arg1: i32, %arg2: memref<1x10x10x128xbf16, #tpu.memory_space<vmem>>, %arg3: memref<9x128x128xbf16, #tpu.memory_space<vmem>>, %arg4: memref<1x128xf32, #tpu.memory_space<vmem>>, %arg5: memref<1x8x8x4xbf16, #tpu.memory_space<vmem>>, %arg6: memref<4x128xbf16, #tpu.memory_space<vmem>>, %arg7: memref<1x128xf32, #tpu.memory_space<vmem>>, %arg8: memref<1x8x8x128xbf16, #tpu.memory_space<vmem>>) attributes {dimension_semantics = [#tpu.dimension_semantics<parallel>, #tpu.dimension_semantics<parallel>], iteration_bounds = array<i64: 2, 1>, scalar_prefetch = 0 : i64, scratch_operands = 0 : i64, tpu.core_type = #tpu.core_type<tc>, window_params = [{transform_indices = @transform_0, window_bounds = array<i64: 1, 10, 10, 128>}, {transform_indices = @transform_1, window_bounds = array<i64: 9, 128, 128>}, {transform_indices = @transform_2, window_bounds = array<i64: 1, 128>}, {transform_indices = @transform_3, window_bounds = array<i64: 1, 8, 8, 4>}, {transform_indices = @transform_4, window_bounds = array<i64: 4, 128>}, {transform_indices = @transform_5, window_bounds = array<i64: 1, 128>}, {transform_indices = @transform_6, window_bounds = array<i64: 1, 8, 8, 128>}]} {
    %c0 = arith.constant 0 : index
    %c0_0 = arith.constant 0 : index
    %0 = vector.load %arg4[%c0, %c0_0] : memref<1x128xf32, #tpu.memory_space<vmem>>, vector<1x128xf32>
    %cst = arith.constant 0.000000e+00 : f32
    %1 = vector.broadcast %cst : f32 to vector<8x128xf32>
    %c0_1 = arith.constant 0 : index
    %c0_2 = arith.constant 0 : index
    %c0_3 = arith.constant 0 : index
    %c0_4 = arith.constant 0 : index
    %2 = vector.load %arg2[%c0_1, %c0_2, %c0_3, %c0_4] : memref<1x10x10x128xbf16, #tpu.memory_space<vmem>>, vector<1x1x8x128xbf16>
    %3 = vector.shape_cast %2 : vector<1x1x8x128xbf16> to vector<8x128xbf16>
    %c0_5 = arith.constant 0 : index
    %c0_6 = arith.constant 0 : index
    %c0_7 = arith.constant 0 : index
    %4 = vector.load %arg3[%c0_5, %c0_6, %c0_7] : memref<9x128x128xbf16, #tpu.memory_space<vmem>>, vector<1x128x128xbf16>
    %5 = vector.shape_cast %4 : vector<1x128x128xbf16> to vector<128x128xbf16>
    %cst_8 = arith.constant dense<0.000000e+00> : vector<8x128xf32>
    %6 = tpu.matmul %3, %5, %cst_8 {dimension_numbers = #tpu.dot_dimension_numbers<[1], [0], [0], [1], [0, 0, 1, 1], [], []>} : vector<8x128xbf16>, vector<128x128xbf16>, vector<8x128xf32> -> vector<8x128xf32>
    %7 = arith.addf %1, %6 : vector<8x128xf32>
    %c0_9 = arith.constant 0 : index
    %c0_10 = arith.constant 0 : index
    %c1 = arith.constant 1 : index
    %c0_11 = arith.constant 0 : index
    %8 = vector.load %arg2[%c0_9, %c0_10, %c1, %c0_11] : memref<1x10x10x128xbf16, #tpu.memory_space<vmem>>, vector<1x1x8x128xbf16>
    %9 = vector.shape_cast %8 : vector<1x1x8x128xbf16> to vector<8x128xbf16>
    %c1_12 = arith.constant 1 : index
    %c0_13 = arith.constant 0 : index
    %c0_14 = arith.constant 0 : index
    %10 = vector.load %arg3[%c1_12, %c0_13, %c0_14] : memref<9x128x128xbf16, #tpu.memory_space<vmem>>, vector<1x128x128xbf16>
    %11 = vector.shape_cast %10 : vector<1x128x128xbf16> to vector<128x128xbf16>
    %cst_15 = arith.constant dense<0.000000e+00> : vector<8x128xf32>
    %12 = tpu.matmul %9, %11, %cst_15 {dimension_numbers = #tpu.dot_dimension_numbers<[1], [0], [0], [1], [0, 0, 1, 1], [], []>} : vector<8x128xbf16>, vector<128x128xbf16>, vector<8x128xf32> -> vector<8x128xf32>
    %13 = arith.addf %7, %12 : vector<8x128xf32>
    %c0_16 = arith.constant 0 : index
    %c0_17 = arith.constant 0 : index
    %c2 = arith.constant 2 : index
    %c0_18 = arith.constant 0 : index
    %14 = vector.load %arg2[%c0_16, %c0_17, %c2, %c0_18] : memref<1x10x10x128xbf16, #tpu.memory_space<vmem>>, vector<1x1x8x128xbf16>
    %15 = vector.shape_cast %14 : vector<1x1x8x128xbf16> to vector<8x128xbf16>
    %c2_19 = arith.constant 2 : index
    %c0_20 = arith.constant 0 : index
    %c0_21 = arith.constant 0 : index
    %16 = vector.load %arg3[%c2_19, %c0_20, %c0_21] : memref<9x128x128xbf16, #tpu.memory_space<vmem>>, vector<1x128x128xbf16>
    %17 = vector.shape_cast %16 : vector<1x128x128xbf16> to vector<128x128xbf16>
    %cst_22 = arith.constant dense<0.000000e+00> : vector<8x128xf32>
    %18 = tpu.matmul %15, %17, %cst_22 {dimension_numbers = #tpu.dot_dimension_numbers<[1], [0], [0], [1], [0, 0, 1, 1], [], []>} : vector<8x128xbf16>, vector<128x128xbf16>, vector<8x128xf32> -> vector<8x128xf32>
    %19 = arith.addf %13, %18 : vector<8x128xf32>
    %c0_23 = arith.constant 0 : index
    %c1_24 = arith.constant 1 : index
    %c0_25 = arith.constant 0 : index
    %c0_26 = arith.constant 0 : index
    %20 = vector.load %arg2[%c0_23, %c1_24, %c0_25, %c0_26] : memref<1x10x10x128xbf16, #tpu.memory_space<vmem>>, vector<1x1x8x128xbf16>
    %21 = vector.shape_cast %20 : vector<1x1x8x128xbf16> to vector<8x128xbf16>
    %c3 = arith.constant 3 : index
    %c0_27 = arith.constant 0 : index
    %c0_28 = arith.constant 0 : index
    %22 = vector.load %arg3[%c3, %c0_27, %c0_28] : memref<9x128x128xbf16, #tpu.memory_space<vmem>>, vector<1x128x128xbf16>
    %23 = vector.shape_cast %22 : vector<1x128x128xbf16> to vector<128x128xbf16>
    %cst_29 = arith.constant dense<0.000000e+00> : vector<8x128xf32>
    %24 = tpu.matmul %21, %23, %cst_29 {dimension_numbers = #tpu.dot_dimension_numbers<[1], [0], [0], [1], [0, 0, 1, 1], [], []>} : vector<8x128xbf16>, vector<128x128xbf16>, vector<8x128xf32> -> vector<8x128xf32>
    %25 = arith.addf %19, %24 : vector<8x128xf32>
    %c0_30 = arith.constant 0 : index
    %c1_31 = arith.constant 1 : index
    %c1_32 = arith.constant 1 : index
    %c0_33 = arith.constant 0 : index
    %26 = vector.load %arg2[%c0_30, %c1_31, %c1_32, %c0_33] : memref<1x10x10x128xbf16, #tpu.memory_space<vmem>>, vector<1x1x8x128xbf16>
    %27 = vector.shape_cast %26 : vector<1x1x8x128xbf16> to vector<8x128xbf16>
    %c4 = arith.constant 4 : index
    %c0_34 = arith.constant 0 : index
    %c0_35 = arith.constant 0 : index
    %28 = vector.load %arg3[%c4, %c0_34, %c0_35] : memref<9x128x128xbf16, #tpu.memory_space<vmem>>, vector<1x128x128xbf16>
    %29 = vector.shape_cast %28 : vector<1x128x128xbf16> to vector<128x128xbf16>
    %cst_36 = arith.constant dense<0.000000e+00> : vector<8x128xf32>
    %30 = tpu.matmul %27, %29, %cst_36 {dimension_numbers = #tpu.dot_dimension_numbers<[1], [0], [0], [1], [0, 0, 1, 1], [], []>} : vector<8x128xbf16>, vector<128x128xbf16>, vector<8x128xf32> -> vector<8x128xf32>
    %31 = arith.addf %25, %30 : vector<8x128xf32>
    %c0_37 = arith.constant 0 : index
    %c1_38 = arith.constant 1 : index
    %c2_39 = arith.constant 2 : index
    %c0_40 = arith.constant 0 : index
    %32 = vector.load %arg2[%c0_37, %c1_38, %c2_39, %c0_40] : memref<1x10x10x128xbf16, #tpu.memory_space<vmem>>, vector<1x1x8x128xbf16>
    %33 = vector.shape_cast %32 : vector<1x1x8x128xbf16> to vector<8x128xbf16>
    %c5 = arith.constant 5 : index
    %c0_41 = arith.constant 0 : index
    %c0_42 = arith.constant 0 : index
    %34 = vector.load %arg3[%c5, %c0_41, %c0_42] : memref<9x128x128xbf16, #tpu.memory_space<vmem>>, vector<1x128x128xbf16>
    %35 = vector.shape_cast %34 : vector<1x128x128xbf16> to vector<128x128xbf16>
    %cst_43 = arith.constant dense<0.000000e+00> : vector<8x128xf32>
    %36 = tpu.matmul %33, %35, %cst_43 {dimension_numbers = #tpu.dot_dimension_numbers<[1], [0], [0], [1], [0, 0, 1, 1], [], []>} : vector<8x128xbf16>, vector<128x128xbf16>, vector<8x128xf32> -> vector<8x128xf32>
    %37 = arith.addf %31, %36 : vector<8x128xf32>
    %c0_44 = arith.constant 0 : index
    %c2_45 = arith.constant 2 : index
    %c0_46 = arith.constant 0 : index
    %c0_47 = arith.constant 0 : index
    %38 = vector.load %arg2[%c0_44, %c2_45, %c0_46, %c0_47] : memref<1x10x10x128xbf16, #tpu.memory_space<vmem>>, vector<1x1x8x128xbf16>
    %39 = vector.shape_cast %38 : vector<1x1x8x128xbf16> to vector<8x128xbf16>
    %c6 = arith.constant 6 : index
    %c0_48 = arith.constant 0 : index
    %c0_49 = arith.constant 0 : index
    %40 = vector.load %arg3[%c6, %c0_48, %c0_49] : memref<9x128x128xbf16, #tpu.memory_space<vmem>>, vector<1x128x128xbf16>
    %41 = vector.shape_cast %40 : vector<1x128x128xbf16> to vector<128x128xbf16>
    %cst_50 = arith.constant dense<0.000000e+00> : vector<8x128xf32>
    %42 = tpu.matmul %39, %41, %cst_50 {dimension_numbers = #tpu.dot_dimension_numbers<[1], [0], [0], [1], [0, 0, 1, 1], [], []>} : vector<8x128xbf16>, vector<128x128xbf16>, vector<8x128xf32> -> vector<8x128xf32>
    %43 = arith.addf %37, %42 : vector<8x128xf32>
    %c0_51 = arith.constant 0 : index
    %c2_52 = arith.constant 2 : index
    %c1_53 = arith.constant 1 : index
    %c0_54 = arith.constant 0 : index
    %44 = vector.load %arg2[%c0_51, %c2_52, %c1_53, %c0_54] : memref<1x10x10x128xbf16, #tpu.memory_space<vmem>>, vector<1x1x8x128xbf16>
    %45 = vector.shape_cast %44 : vector<1x1x8x128xbf16> to vector<8x128xbf16>
    %c7 = arith.constant 7 : index
    %c0_55 = arith.constant 0 : index
    %c0_56 = arith.constant 0 : index
    %46 = vector.load %arg3[%c7, %c0_55, %c0_56] : memref<9x128x128xbf16, #tpu.memory_space<vmem>>, vector<1x128x128xbf16>
    %47 = vector.shape_cast %46 : vector<1x128x128xbf16> to vector<128x128xbf16>
    %cst_57 = arith.constant dense<0.000000e+00> : vector<8x128xf32>
    %48 = tpu.matmul %45, %47, %cst_57 {dimension_numbers = #tpu.dot_dimension_numbers<[1], [0], [0], [1], [0, 0, 1, 1], [], []>} : vector<8x128xbf16>, vector<128x128xbf16>, vector<8x128xf32> -> vector<8x128xf32>
    %49 = arith.addf %43, %48 : vector<8x128xf32>
    %c0_58 = arith.constant 0 : index
    %c2_59 = arith.constant 2 : index
    %c2_60 = arith.constant 2 : index
    %c0_61 = arith.constant 0 : index
    %50 = vector.load %arg2[%c0_58, %c2_59, %c2_60, %c0_61] : memref<1x10x10x128xbf16, #tpu.memory_space<vmem>>, vector<1x1x8x128xbf16>
    %51 = vector.shape_cast %50 : vector<1x1x8x128xbf16> to vector<8x128xbf16>
    %c8 = arith.constant 8 : index
    %c0_62 = arith.constant 0 : index
    %c0_63 = arith.constant 0 : index
    %52 = vector.load %arg3[%c8, %c0_62, %c0_63] : memref<9x128x128xbf16, #tpu.memory_space<vmem>>, vector<1x128x128xbf16>
    %53 = vector.shape_cast %52 : vector<1x128x128xbf16> to vector<128x128xbf16>
    %cst_64 = arith.constant dense<0.000000e+00> : vector<8x128xf32>
    %54 = tpu.matmul %51, %53, %cst_64 {dimension_numbers = #tpu.dot_dimension_numbers<[1], [0], [0], [1], [0, 0, 1, 1], [], []>} : vector<8x128xbf16>, vector<128x128xbf16>, vector<8x128xf32> -> vector<8x128xf32>
    %55 = arith.addf %49, %54 : vector<8x128xf32>
    %56 = vector.broadcast %0 : vector<1x128xf32> to vector<8x128xf32>
    %57 = arith.addf %55, %56 : vector<8x128xf32>
    %c0_65 = arith.constant 0 : index
    %c0_66 = arith.constant 0 : index
    %c0_67 = arith.constant 0 : index
    %c0_68 = arith.constant 0 : index
    %58 = vector.load %arg5[%c0_65, %c0_66, %c0_67, %c0_68] : memref<1x8x8x4xbf16, #tpu.memory_space<vmem>>, vector<1x1x8x4xbf16>
    %59 = vector.shape_cast %58 : vector<1x1x8x4xbf16> to vector<8x4xbf16>
    %c0_69 = arith.constant 0 : index
    %c0_70 = arith.constant 0 : index
    %60 = vector.load %arg6[%c0_69, %c0_70] : memref<4x128xbf16, #tpu.memory_space<vmem>>, vector<4x128xbf16>
    %cst_71 = arith.constant dense<0.000000e+00> : vector<8x128xf32>
    %61 = tpu.matmul %59, %60, %cst_71 {dimension_numbers = #tpu.dot_dimension_numbers<[1], [0], [0], [1], [0, 0, 1, 1], [], []>} : vector<8x4xbf16>, vector<4x128xbf16>, vector<8x128xf32> -> vector<8x128xf32>
    %62 = arith.addf %57, %61 : vector<8x128xf32>
    %c0_72 = arith.constant 0 : index
    %c0_73 = arith.constant 0 : index
    %63 = vector.load %arg7[%c0_72, %c0_73] : memref<1x128xf32, #tpu.memory_space<vmem>>, vector<1x128xf32>
    %64 = vector.broadcast %63 : vector<1x128xf32> to vector<8x128xf32>
    %65 = arith.addf %62, %64 : vector<8x128xf32>
    %cst_74 = arith.constant 0.000000e+00 : f32
    %66 = vector.broadcast %cst_74 : f32 to vector<8x128xf32>
    %67 = arith.maximumf %65, %66 : vector<8x128xf32>
    %68 = arith.truncf %67 : vector<8x128xf32> to vector<8x128xbf16>
    %c0_75 = arith.constant 0 : index
    %c0_76 = arith.constant 0 : index
    %c0_77 = arith.constant 0 : index
    %c0_78 = arith.constant 0 : index
    %69 = vector.load %arg8[%c0_75, %c0_76, %c0_77, %c0_78] : memref<1x8x8x128xbf16, #tpu.memory_space<vmem>>, vector<1x1x8x128xbf16>
    %70 = vector.shape_cast %69 : vector<1x1x8x128xbf16> to vector<8x128xbf16>
    %71 = vector.shape_cast %68 : vector<8x128xbf16> to vector<1x1x8x128xbf16>
    tpu.vector_store %arg8[%c0_75, %c0_76, %c0_77, %c0_78], %71 {strides = array<i32>} : memref<1x8x8x128xbf16, #tpu.memory_space<vmem>>, vector<1x1x8x128xbf16>,
    %cst_79 = arith.constant 0.000000e+00 : f32
    %72 = vector.broadcast %cst_79 : f32 to vector<8x128xf32>
    %c0_80 = arith.constant 0 : index
    %c1_81 = arith.constant 1 : index
    %c0_82 = arith.constant 0 : index
    %c0_83 = arith.constant 0 : index
    %73 = vector.load %arg2[%c0_80, %c1_81, %c0_82, %c0_83] : memref<1x10x10x128xbf16, #tpu.memory_space<vmem>>, vector<1x1x8x128xbf16>
    %74 = vector.shape_cast %73 : vector<1x1x8x128xbf16> to vector<8x128xbf16>
    %c0_84 = arith.constant 0 : index
    %c0_85 = arith.constant 0 : index
    %c0_86 = arith.constant 0 : index
    %75 = vector.load %arg3[%c0_84, %c0_85, %c0_86] : memref<9x128x128xbf16, #tpu.memory_space<vmem>>, vector<1x128x128xbf16>
    %76 = vector.shape_cast %75 : vector<1x128x128xbf16> to vector<128x128xbf16>
    %cst_87 = arith.constant dense<0.000000e+00> : vector<8x128xf32>
    %77 = tpu.matmul %74, %76, %cst_87 {dimension_numbers = #tpu.dot_dimension_numbers<[1], [0], [0], [1], [0, 0, 1, 1], [], []>} : vector<8x128xbf16>, vector<128x128xbf16>, vector<8x128xf32> -> vector<8x128xf32>
    %78 = arith.addf %72, %77 : vector<8x128xf32>
    %c0_88 = arith.constant 0 : index
    %c1_89 = arith.constant 1 : index
    %c1_90 = arith.constant 1 : index
    %c0_91 = arith.constant 0 : index
    %79 = vector.load %arg2[%c0_88, %c1_89, %c1_90, %c0_91] : memref<1x10x10x128xbf16, #tpu.memory_space<vmem>>, vector<1x1x8x128xbf16>
    %80 = vector.shape_cast %79 : vector<1x1x8x128xbf16> to vector<8x128xbf16>
    %c1_92 = arith.constant 1 : index
    %c0_93 = arith.constant 0 : index
    %c0_94 = arith.constant 0 : index
    %81 = vector.load %arg3[%c1_92, %c0_93, %c0_94] : memref<9x128x128xbf16, #tpu.memory_space<vmem>>, vector<1x128x128xbf16>
    %82 = vector.shape_cast %81 : vector<1x128x128xbf16> to vector<128x128xbf16>
    %cst_95 = arith.constant dense<0.000000e+00> : vector<8x128xf32>
    %83 = tpu.matmul %80, %82, %cst_95 {dimension_numbers = #tpu.dot_dimension_numbers<[1], [0], [0], [1], [0, 0, 1, 1], [], []>} : vector<8x128xbf16>, vector<128x128xbf16>, vector<8x128xf32> -> vector<8x128xf32>
    %84 = arith.addf %78, %83 : vector<8x128xf32>
    %c0_96 = arith.constant 0 : index
    %c1_97 = arith.constant 1 : index
    %c2_98 = arith.constant 2 : index
    %c0_99 = arith.constant 0 : index
    %85 = vector.load %arg2[%c0_96, %c1_97, %c2_98, %c0_99] : memref<1x10x10x128xbf16, #tpu.memory_space<vmem>>, vector<1x1x8x128xbf16>
    %86 = vector.shape_cast %85 : vector<1x1x8x128xbf16> to vector<8x128xbf16>
    %c2_100 = arith.constant 2 : index
    %c0_101 = arith.constant 0 : index
    %c0_102 = arith.constant 0 : index
    %87 = vector.load %arg3[%c2_100, %c0_101, %c0_102] : memref<9x128x128xbf16, #tpu.memory_space<vmem>>, vector<1x128x128xbf16>
    %88 = vector.shape_cast %87 : vector<1x128x128xbf16> to vector<128x128xbf16>
    %cst_103 = arith.constant dense<0.000000e+00> : vector<8x128xf32>
    %89 = tpu.matmul %86, %88, %cst_103 {dimension_numbers = #tpu.dot_dimension_numbers<[1], [0], [0], [1], [0, 0, 1, 1], [], []>} : vector<8x128xbf16>, vector<128x128xbf16>, vector<8x128xf32> -> vector<8x128xf32>
    %90 = arith.addf %84, %89 : vector<8x128xf32>
    %c0_104 = arith.constant 0 : index
    %c2_105 = arith.constant 2 : index
    %c0_106 = arith.constant 0 : index
    %c0_107 = arith.constant 0 : index
    %91 = vector.load %arg2[%c0_104, %c2_105, %c0_106, %c0_107] : memref<1x10x10x128xbf16, #tpu.memory_space<vmem>>, vector<1x1x8x128xbf16>
    %92 = vector.shape_cast %91 : vector<1x1x8x128xbf16> to vector<8x128xbf16>
    %c3_108 = arith.constant 3 : index
    %c0_109 = arith.constant 0 : index
    %c0_110 = arith.constant 0 : index
    %93 = vector.load %arg3[%c3_108, %c0_109, %c0_110] : memref<9x128x128xbf16, #tpu.memory_space<vmem>>, vector<1x128x128xbf16>
    %94 = vector.shape_cast %93 : vector<1x128x128xbf16> to vector<128x128xbf16>
    %cst_111 = arith.constant dense<0.000000e+00> : vector<8x128xf32>
    %95 = tpu.matmul %92, %94, %cst_111 {dimension_numbers = #tpu.dot_dimension_numbers<[1], [0], [0], [1], [0, 0, 1, 1], [], []>} : vector<8x128xbf16>, vector<128x128xbf16>, vector<8x128xf32> -> vector<8x128xf32>
    %96 = arith.addf %90, %95 : vector<8x128xf32>
    %c0_112 = arith.constant 0 : index
    %c2_113 = arith.constant 2 : index
    %c1_114 = arith.constant 1 : index
    %c0_115 = arith.constant 0 : index
    %97 = vector.load %arg2[%c0_112, %c2_113, %c1_114, %c0_115] : memref<1x10x10x128xbf16, #tpu.memory_space<vmem>>, vector<1x1x8x128xbf16>
    %98 = vector.shape_cast %97 : vector<1x1x8x128xbf16> to vector<8x128xbf16>
    %c4_116 = arith.constant 4 : index
    %c0_117 = arith.constant 0 : index
    %c0_118 = arith.constant 0 : index
    %99 = vector.load %arg3[%c4_116, %c0_117, %c0_118] : memref<9x128x128xbf16, #tpu.memory_space<vmem>>, vector<1x128x128xbf16>
    %100 = vector.shape_cast %99 : vector<1x128x128xbf16> to vector<128x128xbf16>
    %cst_119 = arith.constant dense<0.000000e+00> : vector<8x128xf32>
    %101 = tpu.matmul %98, %100, %cst_119 {dimension_numbers = #tpu.dot_dimension_numbers<[1], [0], [0], [1], [0, 0, 1, 1], [], []>} : vector<8x128xbf16>, vector<128x128xbf16>, vector<8x128xf32> -> vector<8x128xf32>
    %102 = arith.addf %96, %101 : vector<8x128xf32>
    %c0_120 = arith.constant 0 : index
    %c2_121 = arith.constant 2 : index
    %c2_122 = arith.constant 2 : index
    %c0_123 = arith.constant 0 : index
    %103 = vector.load %arg2[%c0_120, %c2_121, %c2_122, %c0_123] : memref<1x10x10x128xbf16, #tpu.memory_space<vmem>>, vector<1x1x8x128xbf16>
    %104 = vector.shape_cast %103 : vector<1x1x8x128xbf16> to vector<8x128xbf16>
    %c5_124 = arith.constant 5 : index
    %c0_125 = arith.constant 0 : index
    %c0_126 = arith.constant 0 : index
    %105 = vector.load %arg3[%c5_124, %c0_125, %c0_126] : memref<9x128x128xbf16, #tpu.memory_space<vmem>>, vector<1x128x128xbf16>
    %106 = vector.shape_cast %105 : vector<1x128x128xbf16> to vector<128x128xbf16>
    %cst_127 = arith.constant dense<0.000000e+00> : vector<8x128xf32>
    %107 = tpu.matmul %104, %106, %cst_127 {dimension_numbers = #tpu.dot_dimension_numbers<[1], [0], [0], [1], [0, 0, 1, 1], [], []>} : vector<8x128xbf16>, vector<128x128xbf16>, vector<8x128xf32> -> vector<8x128xf32>
    %108 = arith.addf %102, %107 : vector<8x128xf32>
    %c0_128 = arith.constant 0 : index
    %c3_129 = arith.constant 3 : index
    %c0_130 = arith.constant 0 : index
    %c0_131 = arith.constant 0 : index
    %109 = vector.load %arg2[%c0_128, %c3_129, %c0_130, %c0_131] : memref<1x10x10x128xbf16, #tpu.memory_space<vmem>>, vector<1x1x8x128xbf16>
    %110 = vector.shape_cast %109 : vector<1x1x8x128xbf16> to vector<8x128xbf16>
    %c6_132 = arith.constant 6 : index
    %c0_133 = arith.constant 0 : index
    %c0_134 = arith.constant 0 : index
    %111 = vector.load %arg3[%c6_132, %c0_133, %c0_134] : memref<9x128x128xbf16, #tpu.memory_space<vmem>>, vector<1x128x128xbf16>
    %112 = vector.shape_cast %111 : vector<1x128x128xbf16> to vector<128x128xbf16>
    %cst_135 = arith.constant dense<0.000000e+00> : vector<8x128xf32>
    %113 = tpu.matmul %110, %112, %cst_135 {dimension_numbers = #tpu.dot_dimension_numbers<[1], [0], [0], [1], [0, 0, 1, 1], [], []>} : vector<8x128xbf16>, vector<128x128xbf16>, vector<8x128xf32> -> vector<8x128xf32>
    %114 = arith.addf %108, %113 : vector<8x128xf32>
    %c0_136 = arith.constant 0 : index
    %c3_137 = arith.constant 3 : index
    %c1_138 = arith.constant 1 : index
    %c0_139 = arith.constant 0 : index
    %115 = vector.load %arg2[%c0_136, %c3_137, %c1_138, %c0_139] : memref<1x10x10x128xbf16, #tpu.memory_space<vmem>>, vector<1x1x8x128xbf16>
    %116 = vector.shape_cast %115 : vector<1x1x8x128xbf16> to vector<8x128xbf16>
    %c7_140 = arith.constant 7 : index
    %c0_141 = arith.constant 0 : index
    %c0_142 = arith.constant 0 : index
    %117 = vector.load %arg3[%c7_140, %c0_141, %c0_142] : memref<9x128x128xbf16, #tpu.memory_space<vmem>>, vector<1x128x128xbf16>
    %118 = vector.shape_cast %117 : vector<1x128x128xbf16> to vector<128x128xbf16>
    %cst_143 = arith.constant dense<0.000000e+00> : vector<8x128xf32>
    %119 = tpu.matmul %116, %118, %cst_143 {dimension_numbers = #tpu.dot_dimension_numbers<[1], [0], [0], [1], [0, 0, 1, 1], [], []>} : vector<8x128xbf16>, vector<128x128xbf16>, vector<8x128xf32> -> vector<8x128xf32>
    %120 = arith.addf %114, %119 : vector<8x128xf32>
    %c0_144 = arith.constant 0 : index
    %c3_145 = arith.constant 3 : index
    %c2_146 = arith.constant 2 : index
    %c0_147 = arith.constant 0 : index
    %121 = vector.load %arg2[%c0_144, %c3_145, %c2_146, %c0_147] : memref<1x10x10x128xbf16, #tpu.memory_space<vmem>>, vector<1x1x8x128xbf16>
    %122 = vector.shape_cast %121 : vector<1x1x8x128xbf16> to vector<8x128xbf16>
    %c8_148 = arith.constant 8 : index
    %c0_149 = arith.constant 0 : index
    %c0_150 = arith.constant 0 : index
    %123 = vector.load %arg3[%c8_148, %c0_149, %c0_150] : memref<9x128x128xbf16, #tpu.memory_space<vmem>>, vector<1x128x128xbf16>
    %124 = vector.shape_cast %123 : vector<1x128x128xbf16> to vector<128x128xbf16>
    %cst_151 = arith.constant dense<0.000000e+00> : vector<8x128xf32>
    %125 = tpu.matmul %122, %124, %cst_151 {dimension_numbers = #tpu.dot_dimension_numbers<[1], [0], [0], [1], [0, 0, 1, 1], [], []>} : vector<8x128xbf16>, vector<128x128xbf16>, vector<8x128xf32> -> vector<8x128xf32>
    %126 = arith.addf %120, %125 : vector<8x128xf32>
    %127 = vector.broadcast %0 : vector<1x128xf32> to vector<8x128xf32>
    %128 = arith.addf %126, %127 : vector<8x128xf32>
    %c0_152 = arith.constant 0 : index
    %c1_153 = arith.constant 1 : index
    %c0_154 = arith.constant 0 : index
    %c0_155 = arith.constant 0 : index
    %129 = vector.load %arg5[%c0_152, %c1_153, %c0_154, %c0_155] : memref<1x8x8x4xbf16, #tpu.memory_space<vmem>>, vector<1x1x8x4xbf16>
    %130 = vector.shape_cast %129 : vector<1x1x8x4xbf16> to vector<8x4xbf16>
    %c0_156 = arith.constant 0 : index
    %c0_157 = arith.constant 0 : index
    %131 = vector.load %arg6[%c0_156, %c0_157] : memref<4x128xbf16, #tpu.memory_space<vmem>>, vector<4x128xbf16>
    %cst_158 = arith.constant dense<0.000000e+00> : vector<8x128xf32>
    %132 = tpu.matmul %130, %131, %cst_158 {dimension_numbers = #tpu.dot_dimension_numbers<[1], [0], [0], [1], [0, 0, 1, 1], [], []>} : vector<8x4xbf16>, vector<4x128xbf16>, vector<8x128xf32> -> vector<8x128xf32>
    %133 = arith.addf %128, %132 : vector<8x128xf32>
    %c0_159 = arith.constant 0 : index
    %c0_160 = arith.constant 0 : index
    %134 = vector.load %arg7[%c0_159, %c0_160] : memref<1x128xf32, #tpu.memory_space<vmem>>, vector<1x128xf32>
    %135 = vector.broadcast %134 : vector<1x128xf32> to vector<8x128xf32>
    %136 = arith.addf %133, %135 : vector<8x128xf32>
    %cst_161 = arith.constant 0.000000e+00 : f32
    %137 = vector.broadcast %cst_161 : f32 to vector<8x128xf32>
    %138 = arith.maximumf %136, %137 : vector<8x128xf32>
    %139 = arith.truncf %138 : vector<8x128xf32> to vector<8x128xbf16>
    %c0_162 = arith.constant 0 : index
    %c1_163 = arith.constant 1 : index
    %c0_164 = arith.constant 0 : index
    %c0_165 = arith.constant 0 : index
    %140 = vector.load %arg8[%c0_162, %c1_163, %c0_164, %c0_165] : memref<1x8x8x128xbf16, #tpu.memory_space<vmem>>, vector<1x1x8x128xbf16>
    %141 = vector.shape_cast %140 : vector<1x1x8x128xbf16> to vector<8x128xbf16>
    %142 = vector.shape_cast %139 : vector<8x128xbf16> to vector<1x1x8x128xbf16>
    tpu.vector_store %arg8[%c0_162, %c1_163, %c0_164, %c0_165], %142 {strides = array<i32>} : memref<1x8x8x128xbf16, #tpu.memory_space<vmem>>, vector<1x1x8x128xbf16>,
    %cst_166 = arith.constant 0.000000e+00 : f32
    %143 = vector.broadcast %cst_166 : f32 to vector<8x128xf32>
    %c0_167 = arith.constant 0 : index
    %c2_168 = arith.constant 2 : index
    %c0_169 = arith.constant 0 : index
    %c0_170 = arith.constant 0 : index
    %144 = vector.load %arg2[%c0_167, %c2_168, %c0_169, %c0_170] : memref<1x10x10x128xbf16, #tpu.memory_space<vmem>>, vector<1x1x8x128xbf16>
    %145 = vector.shape_cast %144 : vector<1x1x8x128xbf16> to vector<8x128xbf16>
    %c0_171 = arith.constant 0 : index
    %c0_172 = arith.constant 0 : index
    %c0_173 = arith.constant 0 : index
    %146 = vector.load %arg3[%c0_171, %c0_172, %c0_173] : memref<9x128x128xbf16, #tpu.memory_space<vmem>>, vector<1x128x128xbf16>
    %147 = vector.shape_cast %146 : vector<1x128x128xbf16> to vector<128x128xbf16>
    %cst_174 = arith.constant dense<0.000000e+00> : vector<8x128xf32>
    %148 = tpu.matmul %145, %147, %cst_174 {dimension_numbers = #tpu.dot_dimension_numbers<[1], [0], [0], [1], [0, 0, 1, 1], [], []>} : vector<8x128xbf16>, vector<128x128xbf16>, vector<8x128xf32> -> vector<8x128xf32>
    %149 = arith.addf %143, %148 : vector<8x128xf32>
    %c0_175 = arith.constant 0 : index
    %c2_176 = arith.constant 2 : index
    %c1_177 = arith.constant 1 : index
    %c0_178 = arith.constant 0 : index
    %150 = vector.load %arg2[%c0_175, %c2_176, %c1_177, %c0_178] : memref<1x10x10x128xbf16, #tpu.memory_space<vmem>>, vector<1x1x8x128xbf16>
    %151 = vector.shape_cast %150 : vector<1x1x8x128xbf16> to vector<8x128xbf16>
    %c1_179 = arith.constant 1 : index
    %c0_180 = arith.constant 0 : index
    %c0_181 = arith.constant 0 : index
    %152 = vector.load %arg3[%c1_179, %c0_180, %c0_181] : memref<9x128x128xbf16, #tpu.memory_space<vmem>>, vector<1x128x128xbf16>
    %153 = vector.shape_cast %152 : vector<1x128x128xbf16> to vector<128x128xbf16>
    %cst_182 = arith.constant dense<0.000000e+00> : vector<8x128xf32>
    %154 = tpu.matmul %151, %153, %cst_182 {dimension_numbers = #tpu.dot_dimension_numbers<[1], [0], [0], [1], [0, 0, 1, 1], [], []>} : vector<8x128xbf16>, vector<128x128xbf16>, vector<8x128xf32> -> vector<8x128xf32>
    %155 = arith.addf %149, %154 : vector<8x128xf32>
    %c0_183 = arith.constant 0 : index
    %c2_184 = arith.constant 2 : index
    %c2_185 = arith.constant 2 : index
    %c0_186 = arith.constant 0 : index
    %156 = vector.load %arg2[%c0_183, %c2_184, %c2_185, %c0_186] : memref<1x10x10x128xbf16, #tpu.memory_space<vmem>>, vector<1x1x8x128xbf16>
    %157 = vector.shape_cast %156 : vector<1x1x8x128xbf16> to vector<8x128xbf16>
    %c2_187 = arith.constant 2 : index
    %c0_188 = arith.constant 0 : index
    %c0_189 = arith.constant 0 : index
    %158 = vector.load %arg3[%c2_187, %c0_188, %c0_189] : memref<9x128x128xbf16, #tpu.memory_space<vmem>>, vector<1x128x128xbf16>
    %159 = vector.shape_cast %158 : vector<1x128x128xbf16> to vector<128x128xbf16>
    %cst_190 = arith.constant dense<0.000000e+00> : vector<8x128xf32>
    %160 = tpu.matmul %157, %159, %cst_190 {dimension_numbers = #tpu.dot_dimension_numbers<[1], [0], [0], [1], [0, 0, 1, 1], [], []>} : vector<8x128xbf16>, vector<128x128xbf16>, vector<8x128xf32> -> vector<8x128xf32>
    %161 = arith.addf %155, %160 : vector<8x128xf32>
    %c0_191 = arith.constant 0 : index
    %c3_192 = arith.constant 3 : index
    %c0_193 = arith.constant 0 : index
    %c0_194 = arith.constant 0 : index
    %162 = vector.load %arg2[%c0_191, %c3_192, %c0_193, %c0_194] : memref<1x10x10x128xbf16, #tpu.memory_space<vmem>>, vector<1x1x8x128xbf16>
    %163 = vector.shape_cast %162 : vector<1x1x8x128xbf16> to vector<8x128xbf16>
    %c3_195 = arith.constant 3 : index
    %c0_196 = arith.constant 0 : index
    %c0_197 = arith.constant 0 : index
    %164 = vector.load %arg3[%c3_195, %c0_196, %c0_197] : memref<9x128x128xbf16, #tpu.memory_space<vmem>>, vector<1x128x128xbf16>
    %165 = vector.shape_cast %164 : vector<1x128x128xbf16> to vector<128x128xbf16>
    %cst_198 = arith.constant dense<0.000000e+00> : vector<8x128xf32>
    %166 = tpu.matmul %163, %165, %cst_198 {dimension_numbers = #tpu.dot_dimension_numbers<[1], [0], [0], [1], [0, 0, 1, 1], [], []>} : vector<8x128xbf16>, vector<128x128xbf16>, vector<8x128xf32> -> vector<8x128xf32>
    %167 = arith.addf %161, %166 : vector<8x128xf32>
    %c0_199 = arith.constant 0 : index
    %c3_200 = arith.constant 3 : index
    %c1_201 = arith.constant 1 : index
    %c0_202 = arith.constant 0 : index
    %168 = vector.load %arg2[%c0_199, %c3_200, %c1_201, %c0_202] : memref<1x10x10x128xbf16, #tpu.memory_space<vmem>>, vector<1x1x8x128xbf16>
    %169 = vector.shape_cast %168 : vector<1x1x8x128xbf16> to vector<8x128xbf16>
    %c4_203 = arith.constant 4 : index
    %c0_204 = arith.constant 0 : index
    %c0_205 = arith.constant 0 : index
    %170 = vector.load %arg3[%c4_203, %c0_204, %c0_205] : memref<9x128x128xbf16, #tpu.memory_space<vmem>>, vector<1x128x128xbf16>
    %171 = vector.shape_cast %170 : vector<1x128x128xbf16> to vector<128x128xbf16>
    %cst_206 = arith.constant dense<0.000000e+00> : vector<8x128xf32>
    %172 = tpu.matmul %169, %171, %cst_206 {dimension_numbers = #tpu.dot_dimension_numbers<[1], [0], [0], [1], [0, 0, 1, 1], [], []>} : vector<8x128xbf16>, vector<128x128xbf16>, vector<8x128xf32> -> vector<8x128xf32>
    %173 = arith.addf %167, %172 : vector<8x128xf32>
    %c0_207 = arith.constant 0 : index
    %c3_208 = arith.constant 3 : index
    %c2_209 = arith.constant 2 : index
    %c0_210 = arith.constant 0 : index
    %174 = vector.load %arg2[%c0_207, %c3_208, %c2_209, %c0_210] : memref<1x10x10x128xbf16, #tpu.memory_space<vmem>>, vector<1x1x8x128xbf16>
    %175 = vector.shape_cast %174 : vector<1x1x8x128xbf16> to vector<8x128xbf16>
    %c5_211 = arith.constant 5 : index
    %c0_212 = arith.constant 0 : index
    %c0_213 = arith.constant 0 : index
    %176 = vector.load %arg3[%c5_211, %c0_212, %c0_213] : memref<9x128x128xbf16, #tpu.memory_space<vmem>>, vector<1x128x128xbf16>
    %177 = vector.shape_cast %176 : vector<1x128x128xbf16> to vector<128x128xbf16>
    %cst_214 = arith.constant dense<0.000000e+00> : vector<8x128xf32>
    %178 = tpu.matmul %175, %177, %cst_214 {dimension_numbers = #tpu.dot_dimension_numbers<[1], [0], [0], [1], [0, 0, 1, 1], [], []>} : vector<8x128xbf16>, vector<128x128xbf16>, vector<8x128xf32> -> vector<8x128xf32>
    %179 = arith.addf %173, %178 : vector<8x128xf32>
    %c0_215 = arith.constant 0 : index
    %c4_216 = arith.constant 4 : index
    %c0_217 = arith.constant 0 : index
    %c0_218 = arith.constant 0 : index
    %180 = vector.load %arg2[%c0_215, %c4_216, %c0_217, %c0_218] : memref<1x10x10x128xbf16, #tpu.memory_space<vmem>>, vector<1x1x8x128xbf16>
    %181 = vector.shape_cast %180 : vector<1x1x8x128xbf16> to vector<8x128xbf16>
    %c6_219 = arith.constant 6 : index
    %c0_220 = arith.constant 0 : index
    %c0_221 = arith.constant 0 : index
    %182 = vector.load %arg3[%c6_219, %c0_220, %c0_221] : memref<9x128x128xbf16, #tpu.memory_space<vmem>>, vector<1x128x128xbf16>
    %183 = vector.shape_cast %182 : vector<1x128x128xbf16> to vector<128x128xbf16>
    %cst_222 = arith.constant dense<0.000000e+00> : vector<8x128xf32>
    %184 = tpu.matmul %181, %183, %cst_222 {dimension_numbers = #tpu.dot_dimension_numbers<[1], [0], [0], [1], [0, 0, 1, 1], [], []>} : vector<8x128xbf16>, vector<128x128xbf16>, vector<8x128xf32> -> vector<8x128xf32>
    %185 = arith.addf %179, %184 : vector<8x128xf32>
    %c0_223 = arith.constant 0 : index
    %c4_224 = arith.constant 4 : index
    %c1_225 = arith.constant 1 : index
    %c0_226 = arith.constant 0 : index
    %186 = vector.load %arg2[%c0_223, %c4_224, %c1_225, %c0_226] : memref<1x10x10x128xbf16, #tpu.memory_space<vmem>>, vector<1x1x8x128xbf16>
    %187 = vector.shape_cast %186 : vector<1x1x8x128xbf16> to vector<8x128xbf16>
    %c7_227 = arith.constant 7 : index
    %c0_228 = arith.constant 0 : index
    %c0_229 = arith.constant 0 : index
    %188 = vector.load %arg3[%c7_227, %c0_228, %c0_229] : memref<9x128x128xbf16, #tpu.memory_space<vmem>>, vector<1x128x128xbf16>
    %189 = vector.shape_cast %188 : vector<1x128x128xbf16> to vector<128x128xbf16>
    %cst_230 = arith.constant dense<0.000000e+00> : vector<8x128xf32>
    %190 = tpu.matmul %187, %189, %cst_230 {dimension_numbers = #tpu.dot_dimension_numbers<[1], [0], [0], [1], [0, 0, 1, 1], [], []>} : vector<8x128xbf16>, vector<128x128xbf16>, vector<8x128xf32> -> vector<8x128xf32>
    %191 = arith.addf %185, %190 : vector<8x128xf32>
    %c0_231 = arith.constant 0 : index
    %c4_232 = arith.constant 4 : index
    %c2_233 = arith.constant 2 : index
    %c0_234 = arith.constant 0 : index
    %192 = vector.load %arg2[%c0_231, %c4_232, %c2_233, %c0_234] : memref<1x10x10x128xbf16, #tpu.memory_space<vmem>>, vector<1x1x8x128xbf16>
    %193 = vector.shape_cast %192 : vector<1x1x8x128xbf16> to vector<8x128xbf16>
    %c8_235 = arith.constant 8 : index
    %c0_236 = arith.constant 0 : index
    %c0_237 = arith.constant 0 : index
    %194 = vector.load %arg3[%c8_235, %c0_236, %c0_237] : memref<9x128x128xbf16, #tpu.memory_space<vmem>>, vector<1x128x128xbf16>
    %195 = vector.shape_cast %194 : vector<1x128x128xbf16> to vector<128x128xbf16>
    %cst_238 = arith.constant dense<0.000000e+00> : vector<8x128xf32>
    %196 = tpu.matmul %193, %195, %cst_238 {dimension_numbers = #tpu.dot_dimension_numbers<[1], [0], [0], [1], [0, 0, 1, 1], [], []>} : vector<8x128xbf16>, vector<128x128xbf16>, vector<8x128xf32> -> vector<8x128xf32>
    %197 = arith.addf %191, %196 : vector<8x128xf32>
    %198 = vector.broadcast %0 : vector<1x128xf32> to vector<8x128xf32>
    %199 = arith.addf %197, %198 : vector<8x128xf32>
    %c0_239 = arith.constant 0 : index
    %c2_240 = arith.constant 2 : index
    %c0_241 = arith.constant 0 : index
    %c0_242 = arith.constant 0 : index
    %200 = vector.load %arg5[%c0_239, %c2_240, %c0_241, %c0_242] : memref<1x8x8x4xbf16, #tpu.memory_space<vmem>>, vector<1x1x8x4xbf16>
    %201 = vector.shape_cast %200 : vector<1x1x8x4xbf16> to vector<8x4xbf16>
    %c0_243 = arith.constant 0 : index
    %c0_244 = arith.constant 0 : index
    %202 = vector.load %arg6[%c0_243, %c0_244] : memref<4x128xbf16, #tpu.memory_space<vmem>>, vector<4x128xbf16>
    %cst_245 = arith.constant dense<0.000000e+00> : vector<8x128xf32>
    %203 = tpu.matmul %201, %202, %cst_245 {dimension_numbers = #tpu.dot_dimension_numbers<[1], [0], [0], [1], [0, 0, 1, 1], [], []>} : vector<8x4xbf16>, vector<4x128xbf16>, vector<8x128xf32> -> vector<8x128xf32>
    %204 = arith.addf %199, %203 : vector<8x128xf32>
    %c0_246 = arith.constant 0 : index
    %c0_247 = arith.constant 0 : index
    %205 = vector.load %arg7[%c0_246, %c0_247] : memref<1x128xf32, #tpu.memory_space<vmem>>, vector<1x128xf32>
    %206 = vector.broadcast %205 : vector<1x128xf32> to vector<8x128xf32>
    %207 = arith.addf %204, %206 : vector<8x128xf32>
    %cst_248 = arith.constant 0.000000e+00 : f32
    %208 = vector.broadcast %cst_248 : f32 to vector<8x128xf32>
    %209 = arith.maximumf %207, %208 : vector<8x128xf32>
    %210 = arith.truncf %209 : vector<8x128xf32> to vector<8x128xbf16>
    %c0_249 = arith.constant 0 : index
    %c2_250 = arith.constant 2 : index
    %c0_251 = arith.constant 0 : index
    %c0_252 = arith.constant 0 : index
    %211 = vector.load %arg8[%c0_249, %c2_250, %c0_251, %c0_252] : memref<1x8x8x128xbf16, #tpu.memory_space<vmem>>, vector<1x1x8x128xbf16>
    %212 = vector.shape_cast %211 : vector<1x1x8x128xbf16> to vector<8x128xbf16>
    %213 = vector.shape_cast %210 : vector<8x128xbf16> to vector<1x1x8x128xbf16>
    tpu.vector_store %arg8[%c0_249, %c2_250, %c0_251, %c0_252], %213 {strides = array<i32>} : memref<1x8x8x128xbf16, #tpu.memory_space<vmem>>, vector<1x1x8x128xbf16>,
    %cst_253 = arith.constant 0.000000e+00 : f32
    %214 = vector.broadcast %cst_253 : f32 to vector<8x128xf32>
    %c0_254 = arith.constant 0 : index
    %c3_255 = arith.constant 3 : index
    %c0_256 = arith.constant 0 : index
    %c0_257 = arith.constant 0 : index
    %215 = vector.load %arg2[%c0_254, %c3_255, %c0_256, %c0_257] : memref<1x10x10x128xbf16, #tpu.memory_space<vmem>>, vector<1x1x8x128xbf16>
    %216 = vector.shape_cast %215 : vector<1x1x8x128xbf16> to vector<8x128xbf16>
    %c0_258 = arith.constant 0 : index
    %c0_259 = arith.constant 0 : index
    %c0_260 = arith.constant 0 : index
    %217 = vector.load %arg3[%c0_258, %c0_259, %c0_260] : memref<9x128x128xbf16, #tpu.memory_space<vmem>>, vector<1x128x128xbf16>
    %218 = vector.shape_cast %217 : vector<1x128x128xbf16> to vector<128x128xbf16>
    %cst_261 = arith.constant dense<0.000000e+00> : vector<8x128xf32>
    %219 = tpu.matmul %216, %218, %cst_261 {dimension_numbers = #tpu.dot_dimension_numbers<[1], [0], [0], [1], [0, 0, 1, 1], [], []>} : vector<8x128xbf16>, vector<128x128xbf16>, vector<8x128xf32> -> vector<8x128xf32>
    %220 = arith.addf %214, %219 : vector<8x128xf32>
    %c0_262 = arith.constant 0 : index
    %c3_263 = arith.constant 3 : index
    %c1_264 = arith.constant 1 : index
    %c0_265 = arith.constant 0 : index
    %221 = vector.load %arg2[%c0_262, %c3_263, %c1_264, %c0_265] : memref<1x10x10x128xbf16, #tpu.memory_space<vmem>>, vector<1x1x8x128xbf16>
    %222 = vector.shape_cast %221 : vector<1x1x8x128xbf16> to vector<8x128xbf16>
    %c1_266 = arith.constant 1 : index
    %c0_267 = arith.constant 0 : index
    %c0_268 = arith.constant 0 : index
    %223 = vector.load %arg3[%c1_266, %c0_267, %c0_268] : memref<9x128x128xbf16, #tpu.memory_space<vmem>>, vector<1x128x128xbf16>
    %224 = vector.shape_cast %223 : vector<1x128x128xbf16> to vector<128x128xbf16>
    %cst_269 = arith.constant dense<0.000000e+00> : vector<8x128xf32>
    %225 = tpu.matmul %222, %224, %cst_269 {dimension_numbers = #tpu.dot_dimension_numbers<[1], [0], [0], [1], [0, 0, 1, 1], [], []>} : vector<8x128xbf16>, vector<128x128xbf16>, vector<8x128xf32> -> vector<8x128xf32>
    %226 = arith.addf %220, %225 : vector<8x128xf32>
    %c0_270 = arith.constant 0 : index
    %c3_271 = arith.constant 3 : index
    %c2_272 = arith.constant 2 : index
    %c0_273 = arith.constant 0 : index
    %227 = vector.load %arg2[%c0_270, %c3_271, %c2_272, %c0_273] : memref<1x10x10x128xbf16, #tpu.memory_space<vmem>>, vector<1x1x8x128xbf16>
    %228 = vector.shape_cast %227 : vector<1x1x8x128xbf16> to vector<8x128xbf16>
    %c2_274 = arith.constant 2 : index
    %c0_275 = arith.constant 0 : index
    %c0_276 = arith.constant 0 : index
    %229 = vector.load %arg3[%c2_274, %c0_275, %c0_276] : memref<9x128x128xbf16, #tpu.memory_space<vmem>>, vector<1x128x128xbf16>
    %230 = vector.shape_cast %229 : vector<1x128x128xbf16> to vector<128x128xbf16>
    %cst_277 = arith.constant dense<0.000000e+00> : vector<8x128xf32>
    %231 = tpu.matmul %228, %230, %cst_277 {dimension_numbers = #tpu.dot_dimension_numbers<[1], [0], [0], [1], [0, 0, 1, 1], [], []>} : vector<8x128xbf16>, vector<128x128xbf16>, vector<8x128xf32> -> vector<8x128xf32>
    %232 = arith.addf %226, %231 : vector<8x128xf32>
    %c0_278 = arith.constant 0 : index
    %c4_279 = arith.constant 4 : index
    %c0_280 = arith.constant 0 : index
    %c0_281 = arith.constant 0 : index
    %233 = vector.load %arg2[%c0_278, %c4_279, %c0_280, %c0_281] : memref<1x10x10x128xbf16, #tpu.memory_space<vmem>>, vector<1x1x8x128xbf16>
    %234 = vector.shape_cast %233 : vector<1x1x8x128xbf16> to vector<8x128xbf16>
    %c3_282 = arith.constant 3 : index
    %c0_283 = arith.constant 0 : index
    %c0_284 = arith.constant 0 : index
    %235 = vector.load %arg3[%c3_282, %c0_283, %c0_284] : memref<9x128x128xbf16, #tpu.memory_space<vmem>>, vector<1x128x128xbf16>
    %236 = vector.shape_cast %235 : vector<1x128x128xbf16> to vector<128x128xbf16>
    %cst_285 = arith.constant dense<0.000000e+00> : vector<8x128xf32>
    %237 = tpu.matmul %234, %236, %cst_285 {dimension_numbers = #tpu.dot_dimension_numbers<[1], [0], [0], [1], [0, 0, 1, 1], [], []>} : vector<8x128xbf16>, vector<128x128xbf16>, vector<8x128xf32> -> vector<8x128xf32>
    %238 = arith.addf %232, %237 : vector<8x128xf32>
    %c0_286 = arith.constant 0 : index
    %c4_287 = arith.constant 4 : index
    %c1_288 = arith.constant 1 : index
    %c0_289 = arith.constant 0 : index
    %239 = vector.load %arg2[%c0_286, %c4_287, %c1_288, %c0_289] : memref<1x10x10x128xbf16, #tpu.memory_space<vmem>>, vector<1x1x8x128xbf16>
    %240 = vector.shape_cast %239 : vector<1x1x8x128xbf16> to vector<8x128xbf16>
    %c4_290 = arith.constant 4 : index
    %c0_291 = arith.constant 0 : index
    %c0_292 = arith.constant 0 : index
    %241 = vector.load %arg3[%c4_290, %c0_291, %c0_292] : memref<9x128x128xbf16, #tpu.memory_space<vmem>>, vector<1x128x128xbf16>
    %242 = vector.shape_cast %241 : vector<1x128x128xbf16> to vector<128x128xbf16>
    %cst_293 = arith.constant dense<0.000000e+00> : vector<8x128xf32>
    %243 = tpu.matmul %240, %242, %cst_293 {dimension_numbers = #tpu.dot_dimension_numbers<[1], [0], [0], [1], [0, 0, 1, 1], [], []>} : vector<8x128xbf16>, vector<128x128xbf16>, vector<8x128xf32> -> vector<8x128xf32>
    %244 = arith.addf %238, %243 : vector<8x128xf32>
    %c0_294 = arith.constant 0 : index
    %c4_295 = arith.constant 4 : index
    %c2_296 = arith.constant 2 : index
    %c0_297 = arith.constant 0 : index
    %245 = vector.load %arg2[%c0_294, %c4_295, %c2_296, %c0_297] : memref<1x10x10x128xbf16, #tpu.memory_space<vmem>>, vector<1x1x8x128xbf16>
    %246 = vector.shape_cast %245 : vector<1x1x8x128xbf16> to vector<8x128xbf16>
    %c5_298 = arith.constant 5 : index
    %c0_299 = arith.constant 0 : index
    %c0_300 = arith.constant 0 : index
    %247 = vector.load %arg3[%c5_298, %c0_299, %c0_300] : memref<9x128x128xbf16, #tpu.memory_space<vmem>>, vector<1x128x128xbf16>
    %248 = vector.shape_cast %247 : vector<1x128x128xbf16> to vector<128x128xbf16>
    %cst_301 = arith.constant dense<0.000000e+00> : vector<8x128xf32>
    %249 = tpu.matmul %246, %248, %cst_301 {dimension_numbers = #tpu.dot_dimension_numbers<[1], [0], [0], [1], [0, 0, 1, 1], [], []>} : vector<8x128xbf16>, vector<128x128xbf16>, vector<8x128xf32> -> vector<8x128xf32>
    %250 = arith.addf %244, %249 : vector<8x128xf32>
    %c0_302 = arith.constant 0 : index
    %c5_303 = arith.constant 5 : index
    %c0_304 = arith.constant 0 : index
    %c0_305 = arith.constant 0 : index
    %251 = vector.load %arg2[%c0_302, %c5_303, %c0_304, %c0_305] : memref<1x10x10x128xbf16, #tpu.memory_space<vmem>>, vector<1x1x8x128xbf16>
    %252 = vector.shape_cast %251 : vector<1x1x8x128xbf16> to vector<8x128xbf16>
    %c6_306 = arith.constant 6 : index
    %c0_307 = arith.constant 0 : index
    %c0_308 = arith.constant 0 : index
    %253 = vector.load %arg3[%c6_306, %c0_307, %c0_308] : memref<9x128x128xbf16, #tpu.memory_space<vmem>>, vector<1x128x128xbf16>
    %254 = vector.shape_cast %253 : vector<1x128x128xbf16> to vector<128x128xbf16>
    %cst_309 = arith.constant dense<0.000000e+00> : vector<8x128xf32>
    %255 = tpu.matmul %252, %254, %cst_309 {dimension_numbers = #tpu.dot_dimension_numbers<[1], [0], [0], [1], [0, 0, 1, 1], [], []>} : vector<8x128xbf16>, vector<128x128xbf16>, vector<8x128xf32> -> vector<8x128xf32>
    %256 = arith.addf %250, %255 : vector<8x128xf32>
    %c0_310 = arith.constant 0 : index
    %c5_311 = arith.constant 5 : index
    %c1_312 = arith.constant 1 : index
    %c0_313 = arith.constant 0 : index
    %257 = vector.load %arg2[%c0_310, %c5_311, %c1_312, %c0_313] : memref<1x10x10x128xbf16, #tpu.memory_space<vmem>>, vector<1x1x8x128xbf16>
    %258 = vector.shape_cast %257 : vector<1x1x8x128xbf16> to vector<8x128xbf16>
    %c7_314 = arith.constant 7 : index
    %c0_315 = arith.constant 0 : index
    %c0_316 = arith.constant 0 : index
    %259 = vector.load %arg3[%c7_314, %c0_315, %c0_316] : memref<9x128x128xbf16, #tpu.memory_space<vmem>>, vector<1x128x128xbf16>
    %260 = vector.shape_cast %259 : vector<1x128x128xbf16> to vector<128x128xbf16>
    %cst_317 = arith.constant dense<0.000000e+00> : vector<8x128xf32>
    %261 = tpu.matmul %258, %260, %cst_317 {dimension_numbers = #tpu.dot_dimension_numbers<[1], [0], [0], [1], [0, 0, 1, 1], [], []>} : vector<8x128xbf16>, vector<128x128xbf16>, vector<8x128xf32> -> vector<8x128xf32>
    %262 = arith.addf %256, %261 : vector<8x128xf32>
    %c0_318 = arith.constant 0 : index
    %c5_319 = arith.constant 5 : index
    %c2_320 = arith.constant 2 : index
    %c0_321 = arith.constant 0 : index
    %263 = vector.load %arg2[%c0_318, %c5_319, %c2_320, %c0_321] : memref<1x10x10x128xbf16, #tpu.memory_space<vmem>>, vector<1x1x8x128xbf16>
    %264 = vector.shape_cast %263 : vector<1x1x8x128xbf16> to vector<8x128xbf16>
    %c8_322 = arith.constant 8 : index
    %c0_323 = arith.constant 0 : index
    %c0_324 = arith.constant 0 : index
    %265 = vector.load %arg3[%c8_322, %c0_323, %c0_324] : memref<9x128x128xbf16, #tpu.memory_space<vmem>>, vector<1x128x128xbf16>
    %266 = vector.shape_cast %265 : vector<1x128x128xbf16> to vector<128x128xbf16>
    %cst_325 = arith.constant dense<0.000000e+00> : vector<8x128xf32>
    %267 = tpu.matmul %264, %266, %cst_325 {dimension_numbers = #tpu.dot_dimension_numbers<[1], [0], [0], [1], [0, 0, 1, 1], [], []>} : vector<8x128xbf16>, vector<128x128xbf16>, vector<8x128xf32> -> vector<8x128xf32>
    %268 = arith.addf %262, %267 : vector<8x128xf32>
    %269 = vector.broadcast %0 : vector<1x128xf32> to vector<8x128xf32>
    %270 = arith.addf %268, %269 : vector<8x128xf32>
    %c0_326 = arith.constant 0 : index
    %c3_327 = arith.constant 3 : index
    %c0_328 = arith.constant 0 : index
    %c0_329 = arith.constant 0 : index
    %271 = vector.load %arg5[%c0_326, %c3_327, %c0_328, %c0_329] : memref<1x8x8x4xbf16, #tpu.memory_space<vmem>>, vector<1x1x8x4xbf16>
    %272 = vector.shape_cast %271 : vector<1x1x8x4xbf16> to vector<8x4xbf16>
    %c0_330 = arith.constant 0 : index
    %c0_331 = arith.constant 0 : index
    %273 = vector.load %arg6[%c0_330, %c0_331] : memref<4x128xbf16, #tpu.memory_space<vmem>>, vector<4x128xbf16>
    %cst_332 = arith.constant dense<0.000000e+00> : vector<8x128xf32>
    %274 = tpu.matmul %272, %273, %cst_332 {dimension_numbers = #tpu.dot_dimension_numbers<[1], [0], [0], [1], [0, 0, 1, 1], [], []>} : vector<8x4xbf16>, vector<4x128xbf16>, vector<8x128xf32> -> vector<8x128xf32>
    %275 = arith.addf %270, %274 : vector<8x128xf32>
    %c0_333 = arith.constant 0 : index
    %c0_334 = arith.constant 0 : index
    %276 = vector.load %arg7[%c0_333, %c0_334] : memref<1x128xf32, #tpu.memory_space<vmem>>, vector<1x128xf32>
    %277 = vector.broadcast %276 : vector<1x128xf32> to vector<8x128xf32>
    %278 = arith.addf %275, %277 : vector<8x128xf32>
    %cst_335 = arith.constant 0.000000e+00 : f32
    %279 = vector.broadcast %cst_335 : f32 to vector<8x128xf32>
    %280 = arith.maximumf %278, %279 : vector<8x128xf32>
    %281 = arith.truncf %280 : vector<8x128xf32> to vector<8x128xbf16>
    %c0_336 = arith.constant 0 : index
    %c3_337 = arith.constant 3 : index
    %c0_338 = arith.constant 0 : index
    %c0_339 = arith.constant 0 : index
    %282 = vector.load %arg8[%c0_336, %c3_337, %c0_338, %c0_339] : memref<1x8x8x128xbf16, #tpu.memory_space<vmem>>, vector<1x1x8x128xbf16>
    %283 = vector.shape_cast %282 : vector<1x1x8x128xbf16> to vector<8x128xbf16>
    %284 = vector.shape_cast %281 : vector<8x128xbf16> to vector<1x1x8x128xbf16>
    tpu.vector_store %arg8[%c0_336, %c3_337, %c0_338, %c0_339], %284 {strides = array<i32>} : memref<1x8x8x128xbf16, #tpu.memory_space<vmem>>, vector<1x1x8x128xbf16>,
    %cst_340 = arith.constant 0.000000e+00 : f32
    %285 = vector.broadcast %cst_340 : f32 to vector<8x128xf32>
    %c0_341 = arith.constant 0 : index
    %c4_342 = arith.constant 4 : index
    %c0_343 = arith.constant 0 : index
    %c0_344 = arith.constant 0 : index
    %286 = vector.load %arg2[%c0_341, %c4_342, %c0_343, %c0_344] : memref<1x10x10x128xbf16, #tpu.memory_space<vmem>>, vector<1x1x8x128xbf16>
    %287 = vector.shape_cast %286 : vector<1x1x8x128xbf16> to vector<8x128xbf16>
    %c0_345 = arith.constant 0 : index
    %c0_346 = arith.constant 0 : index
    %c0_347 = arith.constant 0 : index
    %288 = vector.load %arg3[%c0_345, %c0_346, %c0_347] : memref<9x128x128xbf16, #tpu.memory_space<vmem>>, vector<1x128x128xbf16>
    %289 = vector.shape_cast %288 : vector<1x128x128xbf16> to vector<128x128xbf16>
    %cst_348 = arith.constant dense<0.000000e+00> : vector<8x128xf32>
    %290 = tpu.matmul %287, %289, %cst_348 {dimension_numbers = #tpu.dot_dimension_numbers<[1], [0], [0], [1], [0, 0, 1, 1], [], []>} : vector<8x128xbf16>, vector<128x128xbf16>, vector<8x128xf32> -> vector<8x128xf32>
    %291 = arith.addf %285, %290 : vector<8x128xf32>
    %c0_349 = arith.constant 0 : index
    %c4_350 = arith.constant 4 : index
    %c1_351 = arith.constant 1 : index
    %c0_352 = arith.constant 0 : index
    %292 = vector.load %arg2[%c0_349, %c4_350, %c1_351, %c0_352] : memref<1x10x10x128xbf16, #tpu.memory_space<vmem>>, vector<1x1x8x128xbf16>
    %293 = vector.shape_cast %292 : vector<1x1x8x128xbf16> to vector<8x128xbf16>
    %c1_353 = arith.constant 1 : index
    %c0_354 = arith.constant 0 : index
    %c0_355 = arith.constant 0 : index
    %294 = vector.load %arg3[%c1_353, %c0_354, %c0_355] : memref<9x128x128xbf16, #tpu.memory_space<vmem>>, vector<1x128x128xbf16>
    %295 = vector.shape_cast %294 : vector<1x128x128xbf16> to vector<128x128xbf16>
    %cst_356 = arith.constant dense<0.000000e+00> : vector<8x128xf32>
    %296 = tpu.matmul %293, %295, %cst_356 {dimension_numbers = #tpu.dot_dimension_numbers<[1], [0], [0], [1], [0, 0, 1, 1], [], []>} : vector<8x128xbf16>, vector<128x128xbf16>, vector<8x128xf32> -> vector<8x128xf32>
    %297 = arith.addf %291, %296 : vector<8x128xf32>
    %c0_357 = arith.constant 0 : index
    %c4_358 = arith.constant 4 : index
    %c2_359 = arith.constant 2 : index
    %c0_360 = arith.constant 0 : index
    %298 = vector.load %arg2[%c0_357, %c4_358, %c2_359, %c0_360] : memref<1x10x10x128xbf16, #tpu.memory_space<vmem>>, vector<1x1x8x128xbf16>
    %299 = vector.shape_cast %298 : vector<1x1x8x128xbf16> to vector<8x128xbf16>
    %c2_361 = arith.constant 2 : index
    %c0_362 = arith.constant 0 : index
    %c0_363 = arith.constant 0 : index
    %300 = vector.load %arg3[%c2_361, %c0_362, %c0_363] : memref<9x128x128xbf16, #tpu.memory_space<vmem>>, vector<1x128x128xbf16>
    %301 = vector.shape_cast %300 : vector<1x128x128xbf16> to vector<128x128xbf16>
    %cst_364 = arith.constant dense<0.000000e+00> : vector<8x128xf32>
    %302 = tpu.matmul %299, %301, %cst_364 {dimension_numbers = #tpu.dot_dimension_numbers<[1], [0], [0], [1], [0, 0, 1, 1], [], []>} : vector<8x128xbf16>, vector<128x128xbf16>, vector<8x128xf32> -> vector<8x128xf32>
    %303 = arith.addf %297, %302 : vector<8x128xf32>
    %c0_365 = arith.constant 0 : index
    %c5_366 = arith.constant 5 : index
    %c0_367 = arith.constant 0 : index
    %c0_368 = arith.constant 0 : index
    %304 = vector.load %arg2[%c0_365, %c5_366, %c0_367, %c0_368] : memref<1x10x10x128xbf16, #tpu.memory_space<vmem>>, vector<1x1x8x128xbf16>
    %305 = vector.shape_cast %304 : vector<1x1x8x128xbf16> to vector<8x128xbf16>
    %c3_369 = arith.constant 3 : index
    %c0_370 = arith.constant 0 : index
    %c0_371 = arith.constant 0 : index
    %306 = vector.load %arg3[%c3_369, %c0_370, %c0_371] : memref<9x128x128xbf16, #tpu.memory_space<vmem>>, vector<1x128x128xbf16>
    %307 = vector.shape_cast %306 : vector<1x128x128xbf16> to vector<128x128xbf16>
    %cst_372 = arith.constant dense<0.000000e+00> : vector<8x128xf32>
    %308 = tpu.matmul %305, %307, %cst_372 {dimension_numbers = #tpu.dot_dimension_numbers<[1], [0], [0], [1], [0, 0, 1, 1], [], []>} : vector<8x128xbf16>, vector<128x128xbf16>, vector<8x128xf32> -> vector<8x128xf32>
    %309 = arith.addf %303, %308 : vector<8x128xf32>
    %c0_373 = arith.constant 0 : index
    %c5_374 = arith.constant 5 : index
    %c1_375 = arith.constant 1 : index
    %c0_376 = arith.constant 0 : index
    %310 = vector.load %arg2[%c0_373, %c5_374, %c1_375, %c0_376] : memref<1x10x10x128xbf16, #tpu.memory_space<vmem>>, vector<1x1x8x128xbf16>
    %311 = vector.shape_cast %310 : vector<1x1x8x128xbf16> to vector<8x128xbf16>
    %c4_377 = arith.constant 4 : index
    %c0_378 = arith.constant 0 : index
    %c0_379 = arith.constant 0 : index
    %312 = vector.load %arg3[%c4_377, %c0_378, %c0_379] : memref<9x128x128xbf16, #tpu.memory_space<vmem>>, vector<1x128x128xbf16>
    %313 = vector.shape_cast %312 : vector<1x128x128xbf16> to vector<128x128xbf16>
    %cst_380 = arith.constant dense<0.000000e+00> : vector<8x128xf32>
    %314 = tpu.matmul %311, %313, %cst_380 {dimension_numbers = #tpu.dot_dimension_numbers<[1], [0], [0], [1], [0, 0, 1, 1], [], []>} : vector<8x128xbf16>, vector<128x128xbf16>, vector<8x128xf32> -> vector<8x128xf32>
    %315 = arith.addf %309, %314 : vector<8x128xf32>
    %c0_381 = arith.constant 0 : index
    %c5_382 = arith.constant 5 : index
    %c2_383 = arith.constant 2 : index
    %c0_384 = arith.constant 0 : index
    %316 = vector.load %arg2[%c0_381, %c5_382, %c2_383, %c0_384] : memref<1x10x10x128xbf16, #tpu.memory_space<vmem>>, vector<1x1x8x128xbf16>
    %317 = vector.shape_cast %316 : vector<1x1x8x128xbf16> to vector<8x128xbf16>
    %c5_385 = arith.constant 5 : index
    %c0_386 = arith.constant 0 : index
    %c0_387 = arith.constant 0 : index
    %318 = vector.load %arg3[%c5_385, %c0_386, %c0_387] : memref<9x128x128xbf16, #tpu.memory_space<vmem>>, vector<1x128x128xbf16>
    %319 = vector.shape_cast %318 : vector<1x128x128xbf16> to vector<128x128xbf16>
    %cst_388 = arith.constant dense<0.000000e+00> : vector<8x128xf32>
    %320 = tpu.matmul %317, %319, %cst_388 {dimension_numbers = #tpu.dot_dimension_numbers<[1], [0], [0], [1], [0, 0, 1, 1], [], []>} : vector<8x128xbf16>, vector<128x128xbf16>, vector<8x128xf32> -> vector<8x128xf32>
    %321 = arith.addf %315, %320 : vector<8x128xf32>
    %c0_389 = arith.constant 0 : index
    %c6_390 = arith.constant 6 : index
    %c0_391 = arith.constant 0 : index
    %c0_392 = arith.constant 0 : index
    %322 = vector.load %arg2[%c0_389, %c6_390, %c0_391, %c0_392] : memref<1x10x10x128xbf16, #tpu.memory_space<vmem>>, vector<1x1x8x128xbf16>
    %323 = vector.shape_cast %322 : vector<1x1x8x128xbf16> to vector<8x128xbf16>
    %c6_393 = arith.constant 6 : index
    %c0_394 = arith.constant 0 : index
    %c0_395 = arith.constant 0 : index
    %324 = vector.load %arg3[%c6_393, %c0_394, %c0_395] : memref<9x128x128xbf16, #tpu.memory_space<vmem>>, vector<1x128x128xbf16>
    %325 = vector.shape_cast %324 : vector<1x128x128xbf16> to vector<128x128xbf16>
    %cst_396 = arith.constant dense<0.000000e+00> : vector<8x128xf32>
    %326 = tpu.matmul %323, %325, %cst_396 {dimension_numbers = #tpu.dot_dimension_numbers<[1], [0], [0], [1], [0, 0, 1, 1], [], []>} : vector<8x128xbf16>, vector<128x128xbf16>, vector<8x128xf32> -> vector<8x128xf32>
    %327 = arith.addf %321, %326 : vector<8x128xf32>
    %c0_397 = arith.constant 0 : index
    %c6_398 = arith.constant 6 : index
    %c1_399 = arith.constant 1 : index
    %c0_400 = arith.constant 0 : index
    %328 = vector.load %arg2[%c0_397, %c6_398, %c1_399, %c0_400] : memref<1x10x10x128xbf16, #tpu.memory_space<vmem>>, vector<1x1x8x128xbf16>
    %329 = vector.shape_cast %328 : vector<1x1x8x128xbf16> to vector<8x128xbf16>
    %c7_401 = arith.constant 7 : index
    %c0_402 = arith.constant 0 : index
    %c0_403 = arith.constant 0 : index
    %330 = vector.load %arg3[%c7_401, %c0_402, %c0_403] : memref<9x128x128xbf16, #tpu.memory_space<vmem>>, vector<1x128x128xbf16>
    %331 = vector.shape_cast %330 : vector<1x128x128xbf16> to vector<128x128xbf16>
    %cst_404 = arith.constant dense<0.000000e+00> : vector<8x128xf32>
    %332 = tpu.matmul %329, %331, %cst_404 {dimension_numbers = #tpu.dot_dimension_numbers<[1], [0], [0], [1], [0, 0, 1, 1], [], []>} : vector<8x128xbf16>, vector<128x128xbf16>, vector<8x128xf32> -> vector<8x128xf32>
    %333 = arith.addf %327, %332 : vector<8x128xf32>
    %c0_405 = arith.constant 0 : index
    %c6_406 = arith.constant 6 : index
    %c2_407 = arith.constant 2 : index
    %c0_408 = arith.constant 0 : index
    %334 = vector.load %arg2[%c0_405, %c6_406, %c2_407, %c0_408] : memref<1x10x10x128xbf16, #tpu.memory_space<vmem>>, vector<1x1x8x128xbf16>
    %335 = vector.shape_cast %334 : vector<1x1x8x128xbf16> to vector<8x128xbf16>
    %c8_409 = arith.constant 8 : index
    %c0_410 = arith.constant 0 : index
    %c0_411 = arith.constant 0 : index
    %336 = vector.load %arg3[%c8_409, %c0_410, %c0_411] : memref<9x128x128xbf16, #tpu.memory_space<vmem>>, vector<1x128x128xbf16>
    %337 = vector.shape_cast %336 : vector<1x128x128xbf16> to vector<128x128xbf16>
    %cst_412 = arith.constant dense<0.000000e+00> : vector<8x128xf32>
    %338 = tpu.matmul %335, %337, %cst_412 {dimension_numbers = #tpu.dot_dimension_numbers<[1], [0], [0], [1], [0, 0, 1, 1], [], []>} : vector<8x128xbf16>, vector<128x128xbf16>, vector<8x128xf32> -> vector<8x128xf32>
    %339 = arith.addf %333, %338 : vector<8x128xf32>
    %340 = vector.broadcast %0 : vector<1x128xf32> to vector<8x128xf32>
    %341 = arith.addf %339, %340 : vector<8x128xf32>
    %c0_413 = arith.constant 0 : index
    %c4_414 = arith.constant 4 : index
    %c0_415 = arith.constant 0 : index
    %c0_416 = arith.constant 0 : index
    %342 = vector.load %arg5[%c0_413, %c4_414, %c0_415, %c0_416] : memref<1x8x8x4xbf16, #tpu.memory_space<vmem>>, vector<1x1x8x4xbf16>
    %343 = vector.shape_cast %342 : vector<1x1x8x4xbf16> to vector<8x4xbf16>
    %c0_417 = arith.constant 0 : index
    %c0_418 = arith.constant 0 : index
    %344 = vector.load %arg6[%c0_417, %c0_418] : memref<4x128xbf16, #tpu.memory_space<vmem>>, vector<4x128xbf16>
    %cst_419 = arith.constant dense<0.000000e+00> : vector<8x128xf32>
    %345 = tpu.matmul %343, %344, %cst_419 {dimension_numbers = #tpu.dot_dimension_numbers<[1], [0], [0], [1], [0, 0, 1, 1], [], []>} : vector<8x4xbf16>, vector<4x128xbf16>, vector<8x128xf32> -> vector<8x128xf32>
    %346 = arith.addf %341, %345 : vector<8x128xf32>
    %c0_420 = arith.constant 0 : index
    %c0_421 = arith.constant 0 : index
    %347 = vector.load %arg7[%c0_420, %c0_421] : memref<1x128xf32, #tpu.memory_space<vmem>>, vector<1x128xf32>
    %348 = vector.broadcast %347 : vector<1x128xf32> to vector<8x128xf32>
    %349 = arith.addf %346, %348 : vector<8x128xf32>
    %cst_422 = arith.constant 0.000000e+00 : f32
    %350 = vector.broadcast %cst_422 : f32 to vector<8x128xf32>
    %351 = arith.maximumf %349, %350 : vector<8x128xf32>
    %352 = arith.truncf %351 : vector<8x128xf32> to vector<8x128xbf16>
    %c0_423 = arith.constant 0 : index
    %c4_424 = arith.constant 4 : index
    %c0_425 = arith.constant 0 : index
    %c0_426 = arith.constant 0 : index
    %353 = vector.load %arg8[%c0_423, %c4_424, %c0_425, %c0_426] : memref<1x8x8x128xbf16, #tpu.memory_space<vmem>>, vector<1x1x8x128xbf16>
    %354 = vector.shape_cast %353 : vector<1x1x8x128xbf16> to vector<8x128xbf16>
    %355 = vector.shape_cast %352 : vector<8x128xbf16> to vector<1x1x8x128xbf16>
    tpu.vector_store %arg8[%c0_423, %c4_424, %c0_425, %c0_426], %355 {strides = array<i32>} : memref<1x8x8x128xbf16, #tpu.memory_space<vmem>>, vector<1x1x8x128xbf16>,
    %cst_427 = arith.constant 0.000000e+00 : f32
    %356 = vector.broadcast %cst_427 : f32 to vector<8x128xf32>
    %c0_428 = arith.constant 0 : index
    %c5_429 = arith.constant 5 : index
    %c0_430 = arith.constant 0 : index
    %c0_431 = arith.constant 0 : index
    %357 = vector.load %arg2[%c0_428, %c5_429, %c0_430, %c0_431] : memref<1x10x10x128xbf16, #tpu.memory_space<vmem>>, vector<1x1x8x128xbf16>
    %358 = vector.shape_cast %357 : vector<1x1x8x128xbf16> to vector<8x128xbf16>
    %c0_432 = arith.constant 0 : index
    %c0_433 = arith.constant 0 : index
    %c0_434 = arith.constant 0 : index
    %359 = vector.load %arg3[%c0_432, %c0_433, %c0_434] : memref<9x128x128xbf16, #tpu.memory_space<vmem>>, vector<1x128x128xbf16>
    %360 = vector.shape_cast %359 : vector<1x128x128xbf16> to vector<128x128xbf16>
    %cst_435 = arith.constant dense<0.000000e+00> : vector<8x128xf32>
    %361 = tpu.matmul %358, %360, %cst_435 {dimension_numbers = #tpu.dot_dimension_numbers<[1], [0], [0], [1], [0, 0, 1, 1], [], []>} : vector<8x128xbf16>, vector<128x128xbf16>, vector<8x128xf32> -> vector<8x128xf32>
    %362 = arith.addf %356, %361 : vector<8x128xf32>
    %c0_436 = arith.constant 0 : index
    %c5_437 = arith.constant 5 : index
    %c1_438 = arith.constant 1 : index
    %c0_439 = arith.constant 0 : index
    %363 = vector.load %arg2[%c0_436, %c5_437, %c1_438, %c0_439] : memref<1x10x10x128xbf16, #tpu.memory_space<vmem>>, vector<1x1x8x128xbf16>
    %364 = vector.shape_cast %363 : vector<1x1x8x128xbf16> to vector<8x128xbf16>
    %c1_440 = arith.constant 1 : index
    %c0_441 = arith.constant 0 : index
    %c0_442 = arith.constant 0 : index
    %365 = vector.load %arg3[%c1_440, %c0_441, %c0_442] : memref<9x128x128xbf16, #tpu.memory_space<vmem>>, vector<1x128x128xbf16>
    %366 = vector.shape_cast %365 : vector<1x128x128xbf16> to vector<128x128xbf16>
    %cst_443 = arith.constant dense<0.000000e+00> : vector<8x128xf32>
    %367 = tpu.matmul %364, %366, %cst_443 {dimension_numbers = #tpu.dot_dimension_numbers<[1], [0], [0], [1], [0, 0, 1, 1], [], []>} : vector<8x128xbf16>, vector<128x128xbf16>, vector<8x128xf32> -> vector<8x128xf32>
    %368 = arith.addf %362, %367 : vector<8x128xf32>
    %c0_444 = arith.constant 0 : index
    %c5_445 = arith.constant 5 : index
    %c2_446 = arith.constant 2 : index
    %c0_447 = arith.constant 0 : index
    %369 = vector.load %arg2[%c0_444, %c5_445, %c2_446, %c0_447] : memref<1x10x10x128xbf16, #tpu.memory_space<vmem>>, vector<1x1x8x128xbf16>
    %370 = vector.shape_cast %369 : vector<1x1x8x128xbf16> to vector<8x128xbf16>
    %c2_448 = arith.constant 2 : index
    %c0_449 = arith.constant 0 : index
    %c0_450 = arith.constant 0 : index
    %371 = vector.load %arg3[%c2_448, %c0_449, %c0_450] : memref<9x128x128xbf16, #tpu.memory_space<vmem>>, vector<1x128x128xbf16>
    %372 = vector.shape_cast %371 : vector<1x128x128xbf16> to vector<128x128xbf16>
    %cst_451 = arith.constant dense<0.000000e+00> : vector<8x128xf32>
    %373 = tpu.matmul %370, %372, %cst_451 {dimension_numbers = #tpu.dot_dimension_numbers<[1], [0], [0], [1], [0, 0, 1, 1], [], []>} : vector<8x128xbf16>, vector<128x128xbf16>, vector<8x128xf32> -> vector<8x128xf32>
    %374 = arith.addf %368, %373 : vector<8x128xf32>
    %c0_452 = arith.constant 0 : index
    %c6_453 = arith.constant 6 : index
    %c0_454 = arith.constant 0 : index
    %c0_455 = arith.constant 0 : index
    %375 = vector.load %arg2[%c0_452, %c6_453, %c0_454, %c0_455] : memref<1x10x10x128xbf16, #tpu.memory_space<vmem>>, vector<1x1x8x128xbf16>
    %376 = vector.shape_cast %375 : vector<1x1x8x128xbf16> to vector<8x128xbf16>
    %c3_456 = arith.constant 3 : index
    %c0_457 = arith.constant 0 : index
    %c0_458 = arith.constant 0 : index
    %377 = vector.load %arg3[%c3_456, %c0_457, %c0_458] : memref<9x128x128xbf16, #tpu.memory_space<vmem>>, vector<1x128x128xbf16>
    %378 = vector.shape_cast %377 : vector<1x128x128xbf16> to vector<128x128xbf16>
    %cst_459 = arith.constant dense<0.000000e+00> : vector<8x128xf32>
    %379 = tpu.matmul %376, %378, %cst_459 {dimension_numbers = #tpu.dot_dimension_numbers<[1], [0], [0], [1], [0, 0, 1, 1], [], []>} : vector<8x128xbf16>, vector<128x128xbf16>, vector<8x128xf32> -> vector<8x128xf32>
    %380 = arith.addf %374, %379 : vector<8x128xf32>
    %c0_460 = arith.constant 0 : index
    %c6_461 = arith.constant 6 : index
    %c1_462 = arith.constant 1 : index
    %c0_463 = arith.constant 0 : index
    %381 = vector.load %arg2[%c0_460, %c6_461, %c1_462, %c0_463] : memref<1x10x10x128xbf16, #tpu.memory_space<vmem>>, vector<1x1x8x128xbf16>
    %382 = vector.shape_cast %381 : vector<1x1x8x128xbf16> to vector<8x128xbf16>
    %c4_464 = arith.constant 4 : index
    %c0_465 = arith.constant 0 : index
    %c0_466 = arith.constant 0 : index
    %383 = vector.load %arg3[%c4_464, %c0_465, %c0_466] : memref<9x128x128xbf16, #tpu.memory_space<vmem>>, vector<1x128x128xbf16>
    %384 = vector.shape_cast %383 : vector<1x128x128xbf16> to vector<128x128xbf16>
    %cst_467 = arith.constant dense<0.000000e+00> : vector<8x128xf32>
    %385 = tpu.matmul %382, %384, %cst_467 {dimension_numbers = #tpu.dot_dimension_numbers<[1], [0], [0], [1], [0, 0, 1, 1], [], []>} : vector<8x128xbf16>, vector<128x128xbf16>, vector<8x128xf32> -> vector<8x128xf32>
    %386 = arith.addf %380, %385 : vector<8x128xf32>
    %c0_468 = arith.constant 0 : index
    %c6_469 = arith.constant 6 : index
    %c2_470 = arith.constant 2 : index
    %c0_471 = arith.constant 0 : index
    %387 = vector.load %arg2[%c0_468, %c6_469, %c2_470, %c0_471] : memref<1x10x10x128xbf16, #tpu.memory_space<vmem>>, vector<1x1x8x128xbf16>
    %388 = vector.shape_cast %387 : vector<1x1x8x128xbf16> to vector<8x128xbf16>
    %c5_472 = arith.constant 5 : index
    %c0_473 = arith.constant 0 : index
    %c0_474 = arith.constant 0 : index
    %389 = vector.load %arg3[%c5_472, %c0_473, %c0_474] : memref<9x128x128xbf16, #tpu.memory_space<vmem>>, vector<1x128x128xbf16>
    %390 = vector.shape_cast %389 : vector<1x128x128xbf16> to vector<128x128xbf16>
    %cst_475 = arith.constant dense<0.000000e+00> : vector<8x128xf32>
    %391 = tpu.matmul %388, %390, %cst_475 {dimension_numbers = #tpu.dot_dimension_numbers<[1], [0], [0], [1], [0, 0, 1, 1], [], []>} : vector<8x128xbf16>, vector<128x128xbf16>, vector<8x128xf32> -> vector<8x128xf32>
    %392 = arith.addf %386, %391 : vector<8x128xf32>
    %c0_476 = arith.constant 0 : index
    %c7_477 = arith.constant 7 : index
    %c0_478 = arith.constant 0 : index
    %c0_479 = arith.constant 0 : index
    %393 = vector.load %arg2[%c0_476, %c7_477, %c0_478, %c0_479] : memref<1x10x10x128xbf16, #tpu.memory_space<vmem>>, vector<1x1x8x128xbf16>
    %394 = vector.shape_cast %393 : vector<1x1x8x128xbf16> to vector<8x128xbf16>
    %c6_480 = arith.constant 6 : index
    %c0_481 = arith.constant 0 : index
    %c0_482 = arith.constant 0 : index
    %395 = vector.load %arg3[%c6_480, %c0_481, %c0_482] : memref<9x128x128xbf16, #tpu.memory_space<vmem>>, vector<1x128x128xbf16>
    %396 = vector.shape_cast %395 : vector<1x128x128xbf16> to vector<128x128xbf16>
    %cst_483 = arith.constant dense<0.000000e+00> : vector<8x128xf32>
    %397 = tpu.matmul %394, %396, %cst_483 {dimension_numbers = #tpu.dot_dimension_numbers<[1], [0], [0], [1], [0, 0, 1, 1], [], []>} : vector<8x128xbf16>, vector<128x128xbf16>, vector<8x128xf32> -> vector<8x128xf32>
    %398 = arith.addf %392, %397 : vector<8x128xf32>
    %c0_484 = arith.constant 0 : index
    %c7_485 = arith.constant 7 : index
    %c1_486 = arith.constant 1 : index
    %c0_487 = arith.constant 0 : index
    %399 = vector.load %arg2[%c0_484, %c7_485, %c1_486, %c0_487] : memref<1x10x10x128xbf16, #tpu.memory_space<vmem>>, vector<1x1x8x128xbf16>
    %400 = vector.shape_cast %399 : vector<1x1x8x128xbf16> to vector<8x128xbf16>
    %c7_488 = arith.constant 7 : index
    %c0_489 = arith.constant 0 : index
    %c0_490 = arith.constant 0 : index
    %401 = vector.load %arg3[%c7_488, %c0_489, %c0_490] : memref<9x128x128xbf16, #tpu.memory_space<vmem>>, vector<1x128x128xbf16>
    %402 = vector.shape_cast %401 : vector<1x128x128xbf16> to vector<128x128xbf16>
    %cst_491 = arith.constant dense<0.000000e+00> : vector<8x128xf32>
    %403 = tpu.matmul %400, %402, %cst_491 {dimension_numbers = #tpu.dot_dimension_numbers<[1], [0], [0], [1], [0, 0, 1, 1], [], []>} : vector<8x128xbf16>, vector<128x128xbf16>, vector<8x128xf32> -> vector<8x128xf32>
    %404 = arith.addf %398, %403 : vector<8x128xf32>
    %c0_492 = arith.constant 0 : index
    %c7_493 = arith.constant 7 : index
    %c2_494 = arith.constant 2 : index
    %c0_495 = arith.constant 0 : index
    %405 = vector.load %arg2[%c0_492, %c7_493, %c2_494, %c0_495] : memref<1x10x10x128xbf16, #tpu.memory_space<vmem>>, vector<1x1x8x128xbf16>
    %406 = vector.shape_cast %405 : vector<1x1x8x128xbf16> to vector<8x128xbf16>
    %c8_496 = arith.constant 8 : index
    %c0_497 = arith.constant 0 : index
    %c0_498 = arith.constant 0 : index
    %407 = vector.load %arg3[%c8_496, %c0_497, %c0_498] : memref<9x128x128xbf16, #tpu.memory_space<vmem>>, vector<1x128x128xbf16>
    %408 = vector.shape_cast %407 : vector<1x128x128xbf16> to vector<128x128xbf16>
    %cst_499 = arith.constant dense<0.000000e+00> : vector<8x128xf32>
    %409 = tpu.matmul %406, %408, %cst_499 {dimension_numbers = #tpu.dot_dimension_numbers<[1], [0], [0], [1], [0, 0, 1, 1], [], []>} : vector<8x128xbf16>, vector<128x128xbf16>, vector<8x128xf32> -> vector<8x128xf32>
    %410 = arith.addf %404, %409 : vector<8x128xf32>
    %411 = vector.broadcast %0 : vector<1x128xf32> to vector<8x128xf32>
    %412 = arith.addf %410, %411 : vector<8x128xf32>
    %c0_500 = arith.constant 0 : index
    %c5_501 = arith.constant 5 : index
    %c0_502 = arith.constant 0 : index
    %c0_503 = arith.constant 0 : index
    %413 = vector.load %arg5[%c0_500, %c5_501, %c0_502, %c0_503] : memref<1x8x8x4xbf16, #tpu.memory_space<vmem>>, vector<1x1x8x4xbf16>
    %414 = vector.shape_cast %413 : vector<1x1x8x4xbf16> to vector<8x4xbf16>
    %c0_504 = arith.constant 0 : index
    %c0_505 = arith.constant 0 : index
    %415 = vector.load %arg6[%c0_504, %c0_505] : memref<4x128xbf16, #tpu.memory_space<vmem>>, vector<4x128xbf16>
    %cst_506 = arith.constant dense<0.000000e+00> : vector<8x128xf32>
    %416 = tpu.matmul %414, %415, %cst_506 {dimension_numbers = #tpu.dot_dimension_numbers<[1], [0], [0], [1], [0, 0, 1, 1], [], []>} : vector<8x4xbf16>, vector<4x128xbf16>, vector<8x128xf32> -> vector<8x128xf32>
    %417 = arith.addf %412, %416 : vector<8x128xf32>
    %c0_507 = arith.constant 0 : index
    %c0_508 = arith.constant 0 : index
    %418 = vector.load %arg7[%c0_507, %c0_508] : memref<1x128xf32, #tpu.memory_space<vmem>>, vector<1x128xf32>
    %419 = vector.broadcast %418 : vector<1x128xf32> to vector<8x128xf32>
    %420 = arith.addf %417, %419 : vector<8x128xf32>
    %cst_509 = arith.constant 0.000000e+00 : f32
    %421 = vector.broadcast %cst_509 : f32 to vector<8x128xf32>
    %422 = arith.maximumf %420, %421 : vector<8x128xf32>
    %423 = arith.truncf %422 : vector<8x128xf32> to vector<8x128xbf16>
    %c0_510 = arith.constant 0 : index
    %c5_511 = arith.constant 5 : index
    %c0_512 = arith.constant 0 : index
    %c0_513 = arith.constant 0 : index
    %424 = vector.load %arg8[%c0_510, %c5_511, %c0_512, %c0_513] : memref<1x8x8x128xbf16, #tpu.memory_space<vmem>>, vector<1x1x8x128xbf16>
    %425 = vector.shape_cast %424 : vector<1x1x8x128xbf16> to vector<8x128xbf16>
    %426 = vector.shape_cast %423 : vector<8x128xbf16> to vector<1x1x8x128xbf16>
    tpu.vector_store %arg8[%c0_510, %c5_511, %c0_512, %c0_513], %426 {strides = array<i32>} : memref<1x8x8x128xbf16, #tpu.memory_space<vmem>>, vector<1x1x8x128xbf16>,
    %cst_514 = arith.constant 0.000000e+00 : f32
    %427 = vector.broadcast %cst_514 : f32 to vector<8x128xf32>
    %c0_515 = arith.constant 0 : index
    %c6_516 = arith.constant 6 : index
    %c0_517 = arith.constant 0 : index
    %c0_518 = arith.constant 0 : index
    %428 = vector.load %arg2[%c0_515, %c6_516, %c0_517, %c0_518] : memref<1x10x10x128xbf16, #tpu.memory_space<vmem>>, vector<1x1x8x128xbf16>
    %429 = vector.shape_cast %428 : vector<1x1x8x128xbf16> to vector<8x128xbf16>
    %c0_519 = arith.constant 0 : index
    %c0_520 = arith.constant 0 : index
    %c0_521 = arith.constant 0 : index
    %430 = vector.load %arg3[%c0_519, %c0_520, %c0_521] : memref<9x128x128xbf16, #tpu.memory_space<vmem>>, vector<1x128x128xbf16>
    %431 = vector.shape_cast %430 : vector<1x128x128xbf16> to vector<128x128xbf16>
    %cst_522 = arith.constant dense<0.000000e+00> : vector<8x128xf32>
    %432 = tpu.matmul %429, %431, %cst_522 {dimension_numbers = #tpu.dot_dimension_numbers<[1], [0], [0], [1], [0, 0, 1, 1], [], []>} : vector<8x128xbf16>, vector<128x128xbf16>, vector<8x128xf32> -> vector<8x128xf32>
    %433 = arith.addf %427, %432 : vector<8x128xf32>
    %c0_523 = arith.constant 0 : index
    %c6_524 = arith.constant 6 : index
    %c1_525 = arith.constant 1 : index
    %c0_526 = arith.constant 0 : index
    %434 = vector.load %arg2[%c0_523, %c6_524, %c1_525, %c0_526] : memref<1x10x10x128xbf16, #tpu.memory_space<vmem>>, vector<1x1x8x128xbf16>
    %435 = vector.shape_cast %434 : vector<1x1x8x128xbf16> to vector<8x128xbf16>
    %c1_527 = arith.constant 1 : index
    %c0_528 = arith.constant 0 : index
    %c0_529 = arith.constant 0 : index
    %436 = vector.load %arg3[%c1_527, %c0_528, %c0_529] : memref<9x128x128xbf16, #tpu.memory_space<vmem>>, vector<1x128x128xbf16>
    %437 = vector.shape_cast %436 : vector<1x128x128xbf16> to vector<128x128xbf16>
    %cst_530 = arith.constant dense<0.000000e+00> : vector<8x128xf32>
    %438 = tpu.matmul %435, %437, %cst_530 {dimension_numbers = #tpu.dot_dimension_numbers<[1], [0], [0], [1], [0, 0, 1, 1], [], []>} : vector<8x128xbf16>, vector<128x128xbf16>, vector<8x128xf32> -> vector<8x128xf32>
    %439 = arith.addf %433, %438 : vector<8x128xf32>
    %c0_531 = arith.constant 0 : index
    %c6_532 = arith.constant 6 : index
    %c2_533 = arith.constant 2 : index
    %c0_534 = arith.constant 0 : index
    %440 = vector.load %arg2[%c0_531, %c6_532, %c2_533, %c0_534] : memref<1x10x10x128xbf16, #tpu.memory_space<vmem>>, vector<1x1x8x128xbf16>
    %441 = vector.shape_cast %440 : vector<1x1x8x128xbf16> to vector<8x128xbf16>
    %c2_535 = arith.constant 2 : index
    %c0_536 = arith.constant 0 : index
    %c0_537 = arith.constant 0 : index
    %442 = vector.load %arg3[%c2_535, %c0_536, %c0_537] : memref<9x128x128xbf16, #tpu.memory_space<vmem>>, vector<1x128x128xbf16>
    %443 = vector.shape_cast %442 : vector<1x128x128xbf16> to vector<128x128xbf16>
    %cst_538 = arith.constant dense<0.000000e+00> : vector<8x128xf32>
    %444 = tpu.matmul %441, %443, %cst_538 {dimension_numbers = #tpu.dot_dimension_numbers<[1], [0], [0], [1], [0, 0, 1, 1], [], []>} : vector<8x128xbf16>, vector<128x128xbf16>, vector<8x128xf32> -> vector<8x128xf32>
    %445 = arith.addf %439, %444 : vector<8x128xf32>
    %c0_539 = arith.constant 0 : index
    %c7_540 = arith.constant 7 : index
    %c0_541 = arith.constant 0 : index
    %c0_542 = arith.constant 0 : index
    %446 = vector.load %arg2[%c0_539, %c7_540, %c0_541, %c0_542] : memref<1x10x10x128xbf16, #tpu.memory_space<vmem>>, vector<1x1x8x128xbf16>
    %447 = vector.shape_cast %446 : vector<1x1x8x128xbf16> to vector<8x128xbf16>
    %c3_543 = arith.constant 3 : index
    %c0_544 = arith.constant 0 : index
    %c0_545 = arith.constant 0 : index
    %448 = vector.load %arg3[%c3_543, %c0_544, %c0_545] : memref<9x128x128xbf16, #tpu.memory_space<vmem>>, vector<1x128x128xbf16>
    %449 = vector.shape_cast %448 : vector<1x128x128xbf16> to vector<128x128xbf16>
    %cst_546 = arith.constant dense<0.000000e+00> : vector<8x128xf32>
    %450 = tpu.matmul %447, %449, %cst_546 {dimension_numbers = #tpu.dot_dimension_numbers<[1], [0], [0], [1], [0, 0, 1, 1], [], []>} : vector<8x128xbf16>, vector<128x128xbf16>, vector<8x128xf32> -> vector<8x128xf32>
    %451 = arith.addf %445, %450 : vector<8x128xf32>
    %c0_547 = arith.constant 0 : index
    %c7_548 = arith.constant 7 : index
    %c1_549 = arith.constant 1 : index
    %c0_550 = arith.constant 0 : index
    %452 = vector.load %arg2[%c0_547, %c7_548, %c1_549, %c0_550] : memref<1x10x10x128xbf16, #tpu.memory_space<vmem>>, vector<1x1x8x128xbf16>
    %453 = vector.shape_cast %452 : vector<1x1x8x128xbf16> to vector<8x128xbf16>
    %c4_551 = arith.constant 4 : index
    %c0_552 = arith.constant 0 : index
    %c0_553 = arith.constant 0 : index
    %454 = vector.load %arg3[%c4_551, %c0_552, %c0_553] : memref<9x128x128xbf16, #tpu.memory_space<vmem>>, vector<1x128x128xbf16>
    %455 = vector.shape_cast %454 : vector<1x128x128xbf16> to vector<128x128xbf16>
    %cst_554 = arith.constant dense<0.000000e+00> : vector<8x128xf32>
    %456 = tpu.matmul %453, %455, %cst_554 {dimension_numbers = #tpu.dot_dimension_numbers<[1], [0], [0], [1], [0, 0, 1, 1], [], []>} : vector<8x128xbf16>, vector<128x128xbf16>, vector<8x128xf32> -> vector<8x128xf32>
    %457 = arith.addf %451, %456 : vector<8x128xf32>
    %c0_555 = arith.constant 0 : index
    %c7_556 = arith.constant 7 : index
    %c2_557 = arith.constant 2 : index
    %c0_558 = arith.constant 0 : index
    %458 = vector.load %arg2[%c0_555, %c7_556, %c2_557, %c0_558] : memref<1x10x10x128xbf16, #tpu.memory_space<vmem>>, vector<1x1x8x128xbf16>
    %459 = vector.shape_cast %458 : vector<1x1x8x128xbf16> to vector<8x128xbf16>
    %c5_559 = arith.constant 5 : index
    %c0_560 = arith.constant 0 : index
    %c0_561 = arith.constant 0 : index
    %460 = vector.load %arg3[%c5_559, %c0_560, %c0_561] : memref<9x128x128xbf16, #tpu.memory_space<vmem>>, vector<1x128x128xbf16>
    %461 = vector.shape_cast %460 : vector<1x128x128xbf16> to vector<128x128xbf16>
    %cst_562 = arith.constant dense<0.000000e+00> : vector<8x128xf32>
    %462 = tpu.matmul %459, %461, %cst_562 {dimension_numbers = #tpu.dot_dimension_numbers<[1], [0], [0], [1], [0, 0, 1, 1], [], []>} : vector<8x128xbf16>, vector<128x128xbf16>, vector<8x128xf32> -> vector<8x128xf32>
    %463 = arith.addf %457, %462 : vector<8x128xf32>
    %c0_563 = arith.constant 0 : index
    %c8_564 = arith.constant 8 : index
    %c0_565 = arith.constant 0 : index
    %c0_566 = arith.constant 0 : index
    %464 = vector.load %arg2[%c0_563, %c8_564, %c0_565, %c0_566] : memref<1x10x10x128xbf16, #tpu.memory_space<vmem>>, vector<1x1x8x128xbf16>
    %465 = vector.shape_cast %464 : vector<1x1x8x128xbf16> to vector<8x128xbf16>
    %c6_567 = arith.constant 6 : index
    %c0_568 = arith.constant 0 : index
    %c0_569 = arith.constant 0 : index
    %466 = vector.load %arg3[%c6_567, %c0_568, %c0_569] : memref<9x128x128xbf16, #tpu.memory_space<vmem>>, vector<1x128x128xbf16>
    %467 = vector.shape_cast %466 : vector<1x128x128xbf16> to vector<128x128xbf16>
    %cst_570 = arith.constant dense<0.000000e+00> : vector<8x128xf32>
    %468 = tpu.matmul %465, %467, %cst_570 {dimension_numbers = #tpu.dot_dimension_numbers<[1], [0], [0], [1], [0, 0, 1, 1], [], []>} : vector<8x128xbf16>, vector<128x128xbf16>, vector<8x128xf32> -> vector<8x128xf32>
    %469 = arith.addf %463, %468 : vector<8x128xf32>
    %c0_571 = arith.constant 0 : index
    %c8_572 = arith.constant 8 : index
    %c1_573 = arith.constant 1 : index
    %c0_574 = arith.constant 0 : index
    %470 = vector.load %arg2[%c0_571, %c8_572, %c1_573, %c0_574] : memref<1x10x10x128xbf16, #tpu.memory_space<vmem>>, vector<1x1x8x128xbf16>
    %471 = vector.shape_cast %470 : vector<1x1x8x128xbf16> to vector<8x128xbf16>
    %c7_575 = arith.constant 7 : index
    %c0_576 = arith.constant 0 : index
    %c0_577 = arith.constant 0 : index
    %472 = vector.load %arg3[%c7_575, %c0_576, %c0_577] : memref<9x128x128xbf16, #tpu.memory_space<vmem>>, vector<1x128x128xbf16>
    %473 = vector.shape_cast %472 : vector<1x128x128xbf16> to vector<128x128xbf16>
    %cst_578 = arith.constant dense<0.000000e+00> : vector<8x128xf32>
    %474 = tpu.matmul %471, %473, %cst_578 {dimension_numbers = #tpu.dot_dimension_numbers<[1], [0], [0], [1], [0, 0, 1, 1], [], []>} : vector<8x128xbf16>, vector<128x128xbf16>, vector<8x128xf32> -> vector<8x128xf32>
    %475 = arith.addf %469, %474 : vector<8x128xf32>
    %c0_579 = arith.constant 0 : index
    %c8_580 = arith.constant 8 : index
    %c2_581 = arith.constant 2 : index
    %c0_582 = arith.constant 0 : index
    %476 = vector.load %arg2[%c0_579, %c8_580, %c2_581, %c0_582] : memref<1x10x10x128xbf16, #tpu.memory_space<vmem>>, vector<1x1x8x128xbf16>
    %477 = vector.shape_cast %476 : vector<1x1x8x128xbf16> to vector<8x128xbf16>
    %c8_583 = arith.constant 8 : index
    %c0_584 = arith.constant 0 : index
    %c0_585 = arith.constant 0 : index
    %478 = vector.load %arg3[%c8_583, %c0_584, %c0_585] : memref<9x128x128xbf16, #tpu.memory_space<vmem>>, vector<1x128x128xbf16>
    %479 = vector.shape_cast %478 : vector<1x128x128xbf16> to vector<128x128xbf16>
    %cst_586 = arith.constant dense<0.000000e+00> : vector<8x128xf32>
    %480 = tpu.matmul %477, %479, %cst_586 {dimension_numbers = #tpu.dot_dimension_numbers<[1], [0], [0], [1], [0, 0, 1, 1], [], []>} : vector<8x128xbf16>, vector<128x128xbf16>, vector<8x128xf32> -> vector<8x128xf32>
    %481 = arith.addf %475, %480 : vector<8x128xf32>
    %482 = vector.broadcast %0 : vector<1x128xf32> to vector<8x128xf32>
    %483 = arith.addf %481, %482 : vector<8x128xf32>
    %c0_587 = arith.constant 0 : index
    %c6_588 = arith.constant 6 : index
    %c0_589 = arith.constant 0 : index
    %c0_590 = arith.constant 0 : index
    %484 = vector.load %arg5[%c0_587, %c6_588, %c0_589, %c0_590] : memref<1x8x8x4xbf16, #tpu.memory_space<vmem>>, vector<1x1x8x4xbf16>
    %485 = vector.shape_cast %484 : vector<1x1x8x4xbf16> to vector<8x4xbf16>
    %c0_591 = arith.constant 0 : index
    %c0_592 = arith.constant 0 : index
    %486 = vector.load %arg6[%c0_591, %c0_592] : memref<4x128xbf16, #tpu.memory_space<vmem>>, vector<4x128xbf16>
    %cst_593 = arith.constant dense<0.000000e+00> : vector<8x128xf32>
    %487 = tpu.matmul %485, %486, %cst_593 {dimension_numbers = #tpu.dot_dimension_numbers<[1], [0], [0], [1], [0, 0, 1, 1], [], []>} : vector<8x4xbf16>, vector<4x128xbf16>, vector<8x128xf32> -> vector<8x128xf32>
    %488 = arith.addf %483, %487 : vector<8x128xf32>
    %c0_594 = arith.constant 0 : index
    %c0_595 = arith.constant 0 : index
    %489 = vector.load %arg7[%c0_594, %c0_595] : memref<1x128xf32, #tpu.memory_space<vmem>>, vector<1x128xf32>
    %490 = vector.broadcast %489 : vector<1x128xf32> to vector<8x128xf32>
    %491 = arith.addf %488, %490 : vector<8x128xf32>
    %cst_596 = arith.constant 0.000000e+00 : f32
    %492 = vector.broadcast %cst_596 : f32 to vector<8x128xf32>
    %493 = arith.maximumf %491, %492 : vector<8x128xf32>
    %494 = arith.truncf %493 : vector<8x128xf32> to vector<8x128xbf16>
    %c0_597 = arith.constant 0 : index
    %c6_598 = arith.constant 6 : index
    %c0_599 = arith.constant 0 : index
    %c0_600 = arith.constant 0 : index
    %495 = vector.load %arg8[%c0_597, %c6_598, %c0_599, %c0_600] : memref<1x8x8x128xbf16, #tpu.memory_space<vmem>>, vector<1x1x8x128xbf16>
    %496 = vector.shape_cast %495 : vector<1x1x8x128xbf16> to vector<8x128xbf16>
    %497 = vector.shape_cast %494 : vector<8x128xbf16> to vector<1x1x8x128xbf16>
    tpu.vector_store %arg8[%c0_597, %c6_598, %c0_599, %c0_600], %497 {strides = array<i32>} : memref<1x8x8x128xbf16, #tpu.memory_space<vmem>>, vector<1x1x8x128xbf16>,
    %cst_601 = arith.constant 0.000000e+00 : f32
    %498 = vector.broadcast %cst_601 : f32 to vector<8x128xf32>
    %c0_602 = arith.constant 0 : index
    %c7_603 = arith.constant 7 : index
    %c0_604 = arith.constant 0 : index
    %c0_605 = arith.constant 0 : index
    %499 = vector.load %arg2[%c0_602, %c7_603, %c0_604, %c0_605] : memref<1x10x10x128xbf16, #tpu.memory_space<vmem>>, vector<1x1x8x128xbf16>
    %500 = vector.shape_cast %499 : vector<1x1x8x128xbf16> to vector<8x128xbf16>
    %c0_606 = arith.constant 0 : index
    %c0_607 = arith.constant 0 : index
    %c0_608 = arith.constant 0 : index
    %501 = vector.load %arg3[%c0_606, %c0_607, %c0_608] : memref<9x128x128xbf16, #tpu.memory_space<vmem>>, vector<1x128x128xbf16>
    %502 = vector.shape_cast %501 : vector<1x128x128xbf16> to vector<128x128xbf16>
    %cst_609 = arith.constant dense<0.000000e+00> : vector<8x128xf32>
    %503 = tpu.matmul %500, %502, %cst_609 {dimension_numbers = #tpu.dot_dimension_numbers<[1], [0], [0], [1], [0, 0, 1, 1], [], []>} : vector<8x128xbf16>, vector<128x128xbf16>, vector<8x128xf32> -> vector<8x128xf32>
    %504 = arith.addf %498, %503 : vector<8x128xf32>
    %c0_610 = arith.constant 0 : index
    %c7_611 = arith.constant 7 : index
    %c1_612 = arith.constant 1 : index
    %c0_613 = arith.constant 0 : index
    %505 = vector.load %arg2[%c0_610, %c7_611, %c1_612, %c0_613] : memref<1x10x10x128xbf16, #tpu.memory_space<vmem>>, vector<1x1x8x128xbf16>
    %506 = vector.shape_cast %505 : vector<1x1x8x128xbf16> to vector<8x128xbf16>
    %c1_614 = arith.constant 1 : index
    %c0_615 = arith.constant 0 : index
    %c0_616 = arith.constant 0 : index
    %507 = vector.load %arg3[%c1_614, %c0_615, %c0_616] : memref<9x128x128xbf16, #tpu.memory_space<vmem>>, vector<1x128x128xbf16>
    %508 = vector.shape_cast %507 : vector<1x128x128xbf16> to vector<128x128xbf16>
    %cst_617 = arith.constant dense<0.000000e+00> : vector<8x128xf32>
    %509 = tpu.matmul %506, %508, %cst_617 {dimension_numbers = #tpu.dot_dimension_numbers<[1], [0], [0], [1], [0, 0, 1, 1], [], []>} : vector<8x128xbf16>, vector<128x128xbf16>, vector<8x128xf32> -> vector<8x128xf32>
    %510 = arith.addf %504, %509 : vector<8x128xf32>
    %c0_618 = arith.constant 0 : index
    %c7_619 = arith.constant 7 : index
    %c2_620 = arith.constant 2 : index
    %c0_621 = arith.constant 0 : index
    %511 = vector.load %arg2[%c0_618, %c7_619, %c2_620, %c0_621] : memref<1x10x10x128xbf16, #tpu.memory_space<vmem>>, vector<1x1x8x128xbf16>
    %512 = vector.shape_cast %511 : vector<1x1x8x128xbf16> to vector<8x128xbf16>
    %c2_622 = arith.constant 2 : index
    %c0_623 = arith.constant 0 : index
    %c0_624 = arith.constant 0 : index
    %513 = vector.load %arg3[%c2_622, %c0_623, %c0_624] : memref<9x128x128xbf16, #tpu.memory_space<vmem>>, vector<1x128x128xbf16>
    %514 = vector.shape_cast %513 : vector<1x128x128xbf16> to vector<128x128xbf16>
    %cst_625 = arith.constant dense<0.000000e+00> : vector<8x128xf32>
    %515 = tpu.matmul %512, %514, %cst_625 {dimension_numbers = #tpu.dot_dimension_numbers<[1], [0], [0], [1], [0, 0, 1, 1], [], []>} : vector<8x128xbf16>, vector<128x128xbf16>, vector<8x128xf32> -> vector<8x128xf32>
    %516 = arith.addf %510, %515 : vector<8x128xf32>
    %c0_626 = arith.constant 0 : index
    %c8_627 = arith.constant 8 : index
    %c0_628 = arith.constant 0 : index
    %c0_629 = arith.constant 0 : index
    %517 = vector.load %arg2[%c0_626, %c8_627, %c0_628, %c0_629] : memref<1x10x10x128xbf16, #tpu.memory_space<vmem>>, vector<1x1x8x128xbf16>
    %518 = vector.shape_cast %517 : vector<1x1x8x128xbf16> to vector<8x128xbf16>
    %c3_630 = arith.constant 3 : index
    %c0_631 = arith.constant 0 : index
    %c0_632 = arith.constant 0 : index
    %519 = vector.load %arg3[%c3_630, %c0_631, %c0_632] : memref<9x128x128xbf16, #tpu.memory_space<vmem>>, vector<1x128x128xbf16>
    %520 = vector.shape_cast %519 : vector<1x128x128xbf16> to vector<128x128xbf16>
    %cst_633 = arith.constant dense<0.000000e+00> : vector<8x128xf32>
    %521 = tpu.matmul %518, %520, %cst_633 {dimension_numbers = #tpu.dot_dimension_numbers<[1], [0], [0], [1], [0, 0, 1, 1], [], []>} : vector<8x128xbf16>, vector<128x128xbf16>, vector<8x128xf32> -> vector<8x128xf32>
    %522 = arith.addf %516, %521 : vector<8x128xf32>
    %c0_634 = arith.constant 0 : index
    %c8_635 = arith.constant 8 : index
    %c1_636 = arith.constant 1 : index
    %c0_637 = arith.constant 0 : index
    %523 = vector.load %arg2[%c0_634, %c8_635, %c1_636, %c0_637] : memref<1x10x10x128xbf16, #tpu.memory_space<vmem>>, vector<1x1x8x128xbf16>
    %524 = vector.shape_cast %523 : vector<1x1x8x128xbf16> to vector<8x128xbf16>
    %c4_638 = arith.constant 4 : index
    %c0_639 = arith.constant 0 : index
    %c0_640 = arith.constant 0 : index
    %525 = vector.load %arg3[%c4_638, %c0_639, %c0_640] : memref<9x128x128xbf16, #tpu.memory_space<vmem>>, vector<1x128x128xbf16>
    %526 = vector.shape_cast %525 : vector<1x128x128xbf16> to vector<128x128xbf16>
    %cst_641 = arith.constant dense<0.000000e+00> : vector<8x128xf32>
    %527 = tpu.matmul %524, %526, %cst_641 {dimension_numbers = #tpu.dot_dimension_numbers<[1], [0], [0], [1], [0, 0, 1, 1], [], []>} : vector<8x128xbf16>, vector<128x128xbf16>, vector<8x128xf32> -> vector<8x128xf32>
    %528 = arith.addf %522, %527 : vector<8x128xf32>
    %c0_642 = arith.constant 0 : index
    %c8_643 = arith.constant 8 : index
    %c2_644 = arith.constant 2 : index
    %c0_645 = arith.constant 0 : index
    %529 = vector.load %arg2[%c0_642, %c8_643, %c2_644, %c0_645] : memref<1x10x10x128xbf16, #tpu.memory_space<vmem>>, vector<1x1x8x128xbf16>
    %530 = vector.shape_cast %529 : vector<1x1x8x128xbf16> to vector<8x128xbf16>
    %c5_646 = arith.constant 5 : index
    %c0_647 = arith.constant 0 : index
    %c0_648 = arith.constant 0 : index
    %531 = vector.load %arg3[%c5_646, %c0_647, %c0_648] : memref<9x128x128xbf16, #tpu.memory_space<vmem>>, vector<1x128x128xbf16>
    %532 = vector.shape_cast %531 : vector<1x128x128xbf16> to vector<128x128xbf16>
    %cst_649 = arith.constant dense<0.000000e+00> : vector<8x128xf32>
    %533 = tpu.matmul %530, %532, %cst_649 {dimension_numbers = #tpu.dot_dimension_numbers<[1], [0], [0], [1], [0, 0, 1, 1], [], []>} : vector<8x128xbf16>, vector<128x128xbf16>, vector<8x128xf32> -> vector<8x128xf32>
    %534 = arith.addf %528, %533 : vector<8x128xf32>
    %c0_650 = arith.constant 0 : index
    %c9 = arith.constant 9 : index
    %c0_651 = arith.constant 0 : index
    %c0_652 = arith.constant 0 : index
    %535 = vector.load %arg2[%c0_650, %c9, %c0_651, %c0_652] : memref<1x10x10x128xbf16, #tpu.memory_space<vmem>>, vector<1x1x8x128xbf16>
    %536 = vector.shape_cast %535 : vector<1x1x8x128xbf16> to vector<8x128xbf16>
    %c6_653 = arith.constant 6 : index
    %c0_654 = arith.constant 0 : index
    %c0_655 = arith.constant 0 : index
    %537 = vector.load %arg3[%c6_653, %c0_654, %c0_655] : memref<9x128x128xbf16, #tpu.memory_space<vmem>>, vector<1x128x128xbf16>
    %538 = vector.shape_cast %537 : vector<1x128x128xbf16> to vector<128x128xbf16>
    %cst_656 = arith.constant dense<0.000000e+00> : vector<8x128xf32>
    %539 = tpu.matmul %536, %538, %cst_656 {dimension_numbers = #tpu.dot_dimension_numbers<[1], [0], [0], [1], [0, 0, 1, 1], [], []>} : vector<8x128xbf16>, vector<128x128xbf16>, vector<8x128xf32> -> vector<8x128xf32>
    %540 = arith.addf %534, %539 : vector<8x128xf32>
    %c0_657 = arith.constant 0 : index
    %c9_658 = arith.constant 9 : index
    %c1_659 = arith.constant 1 : index
    %c0_660 = arith.constant 0 : index
    %541 = vector.load %arg2[%c0_657, %c9_658, %c1_659, %c0_660] : memref<1x10x10x128xbf16, #tpu.memory_space<vmem>>, vector<1x1x8x128xbf16>
    %542 = vector.shape_cast %541 : vector<1x1x8x128xbf16> to vector<8x128xbf16>
    %c7_661 = arith.constant 7 : index
    %c0_662 = arith.constant 0 : index
    %c0_663 = arith.constant 0 : index
    %543 = vector.load %arg3[%c7_661, %c0_662, %c0_663] : memref<9x128x128xbf16, #tpu.memory_space<vmem>>, vector<1x128x128xbf16>
    %544 = vector.shape_cast %543 : vector<1x128x128xbf16> to vector<128x128xbf16>
    %cst_664 = arith.constant dense<0.000000e+00> : vector<8x128xf32>
    %545 = tpu.matmul %542, %544, %cst_664 {dimension_numbers = #tpu.dot_dimension_numbers<[1], [0], [0], [1], [0, 0, 1, 1], [], []>} : vector<8x128xbf16>, vector<128x128xbf16>, vector<8x128xf32> -> vector<8x128xf32>
    %546 = arith.addf %540, %545 : vector<8x128xf32>
    %c0_665 = arith.constant 0 : index
    %c9_666 = arith.constant 9 : index
    %c2_667 = arith.constant 2 : index
    %c0_668 = arith.constant 0 : index
    %547 = vector.load %arg2[%c0_665, %c9_666, %c2_667, %c0_668] : memref<1x10x10x128xbf16, #tpu.memory_space<vmem>>, vector<1x1x8x128xbf16>
    %548 = vector.shape_cast %547 : vector<1x1x8x128xbf16> to vector<8x128xbf16>
    %c8_669 = arith.constant 8 : index
    %c0_670 = arith.constant 0 : index
    %c0_671 = arith.constant 0 : index
    %549 = vector.load %arg3[%c8_669, %c0_670, %c0_671] : memref<9x128x128xbf16, #tpu.memory_space<vmem>>, vector<1x128x128xbf16>
    %550 = vector.shape_cast %549 : vector<1x128x128xbf16> to vector<128x128xbf16>
    %cst_672 = arith.constant dense<0.000000e+00> : vector<8x128xf32>
    %551 = tpu.matmul %548, %550, %cst_672 {dimension_numbers = #tpu.dot_dimension_numbers<[1], [0], [0], [1], [0, 0, 1, 1], [], []>} : vector<8x128xbf16>, vector<128x128xbf16>, vector<8x128xf32> -> vector<8x128xf32>
    %552 = arith.addf %546, %551 : vector<8x128xf32>
    %553 = vector.broadcast %0 : vector<1x128xf32> to vector<8x128xf32>
    %554 = arith.addf %552, %553 : vector<8x128xf32>
    %c0_673 = arith.constant 0 : index
    %c7_674 = arith.constant 7 : index
    %c0_675 = arith.constant 0 : index
    %c0_676 = arith.constant 0 : index
    %555 = vector.load %arg5[%c0_673, %c7_674, %c0_675, %c0_676] : memref<1x8x8x4xbf16, #tpu.memory_space<vmem>>, vector<1x1x8x4xbf16>
    %556 = vector.shape_cast %555 : vector<1x1x8x4xbf16> to vector<8x4xbf16>
    %c0_677 = arith.constant 0 : index
    %c0_678 = arith.constant 0 : index
    %557 = vector.load %arg6[%c0_677, %c0_678] : memref<4x128xbf16, #tpu.memory_space<vmem>>, vector<4x128xbf16>
    %cst_679 = arith.constant dense<0.000000e+00> : vector<8x128xf32>
    %558 = tpu.matmul %556, %557, %cst_679 {dimension_numbers = #tpu.dot_dimension_numbers<[1], [0], [0], [1], [0, 0, 1, 1], [], []>} : vector<8x4xbf16>, vector<4x128xbf16>, vector<8x128xf32> -> vector<8x128xf32>
    %559 = arith.addf %554, %558 : vector<8x128xf32>
    %c0_680 = arith.constant 0 : index
    %c0_681 = arith.constant 0 : index
    %560 = vector.load %arg7[%c0_680, %c0_681] : memref<1x128xf32, #tpu.memory_space<vmem>>, vector<1x128xf32>
    %561 = vector.broadcast %560 : vector<1x128xf32> to vector<8x128xf32>
    %562 = arith.addf %559, %561 : vector<8x128xf32>
    %cst_682 = arith.constant 0.000000e+00 : f32
    %563 = vector.broadcast %cst_682 : f32 to vector<8x128xf32>
    %564 = arith.maximumf %562, %563 : vector<8x128xf32>
    %565 = arith.truncf %564 : vector<8x128xf32> to vector<8x128xbf16>
    %c0_683 = arith.constant 0 : index
    %c7_684 = arith.constant 7 : index
    %c0_685 = arith.constant 0 : index
    %c0_686 = arith.constant 0 : index
    %566 = vector.load %arg8[%c0_683, %c7_684, %c0_685, %c0_686] : memref<1x8x8x128xbf16, #tpu.memory_space<vmem>>, vector<1x1x8x128xbf16>
    %567 = vector.shape_cast %566 : vector<1x1x8x128xbf16> to vector<8x128xbf16>
    %568 = vector.shape_cast %565 : vector<8x128xbf16> to vector<1x1x8x128xbf16>
    tpu.vector_store %arg8[%c0_683, %c7_684, %c0_685, %c0_686], %568 {strides = array<i32>} : memref<1x8x8x128xbf16, #tpu.memory_space<vmem>>, vector<1x1x8x128xbf16>,
    return
  }
  func.func @transform_0(%arg0: i32, %arg1: i32) -> (i32, i32, i32, i32) {
    %c0_i32 = arith.constant 0 : i32
    %c0_i32_0 = arith.constant 0 : i32
    %c0_i32_1 = arith.constant 0 : i32
    %c0_i32_2 = arith.constant 0 : i32
    return %arg0, %c0_i32, %c0_i32_0, %c0_i32_1 : i32, i32, i32, i32
  }
  func.func @transform_1(%arg0: i32, %arg1: i32) -> (i32, i32, i32) {
    %c0_i32 = arith.constant 0 : i32
    %c0_i32_0 = arith.constant 0 : i32
    %c0_i32_1 = arith.constant 0 : i32
    return %c0_i32, %c0_i32_0, %arg1 : i32, i32, i32
  }
  func.func @transform_2(%arg0: i32, %arg1: i32) -> (i32, i32) {
    %c0_i32 = arith.constant 0 : i32
    %c0_i32_0 = arith.constant 0 : i32
    return %c0_i32, %arg1 : i32, i32
  }
  func.func @transform_3(%arg0: i32, %arg1: i32) -> (i32, i32, i32, i32) {
    %c0_i32 = arith.constant 0 : i32
    %c0_i32_0 = arith.constant 0 : i32
    %c0_i32_1 = arith.constant 0 : i32
    %c0_i32_2 = arith.constant 0 : i32
    return %arg0, %c0_i32, %c0_i32_0, %c0_i32_1 : i32, i32, i32, i32
  }
  func.func @transform_4(%arg0: i32, %arg1: i32) -> (i32, i32) {
    %c0_i32 = arith.constant 0 : i32
    %c0_i32_0 = arith.constant 0 : i32
    return %c0_i32, %arg1 : i32, i32
  }
  func.func @transform_5(%arg0: i32, %arg1: i32) -> (i32, i32) {
    %c0_i32 = arith.constant 0 : i32
    %c0_i32_0 = arith.constant 0 : i32
    return %c0_i32, %arg1 : i32, i32
  }
  func.func @transform_6(%arg0: i32, %arg1: i32) -> (i32, i32, i32, i32) {
    %c0_i32 = arith.constant 0 : i32
    %c0_i32_0 = arith.constant 0 : i32
    %c0_i32_1 = arith.constant 0 : i32
    return %arg0, %c0_i32, %c0_i32_0, %arg1 : i32, i32, i32, i32
  }
}

</mosaic_0001>

<bundles_post_ra>
// kernel: resnet_block_forward.2
= control target key start
LH: loop header
LB: loop body
LE: loop exit
PB: predicated region body
PF: predicated region fallthrough
CT: control target
= control target key end

     0   :  { %vm120_vm0 = vcmask 1041408   ;;  %vm95_vm1 = vcmask 293888   ;;  %s428_s1 = inlined_call_operand.vmem [shape: bf16[36,128], index: 1, kind: input, shape index: {}]   ;;  %s429_s2 = inlined_call_operand.vmem [shape: f32[1,128], index: 2, kind: input, shape index: {}]   ;;  %s430_s0 = inlined_call_operand.vmem [shape: bf16[128,36], index: 0, kind: input, shape index: {}]   ;;  %s431_s3 = inlined_call_operand.vmem [shape: bf16[128,128], index: 3, kind: output, shape index: {}]  }
   0x1   :  { %v35_v0 = vld [vmem:[%s428_s1 + $0x10] sm:$0x3]  ;;  %v282_v4 = vld [vmem:[%s428_s1 + $0x8] sm:$0xff]  ;;  %v281_v5 = vld [vmem:[%s428_s1] sm:$0xff] }
   0x2   :  { %v89_v1 = vunpack.c.l.b16 %v35_v0  ;;  %v273_v6 = vld [vmem:[%s430_s0] sm:$0xff]  ;;  %v275_v7 = vld [vmem:[%s430_s0 + $0x10] sm:$0xff]  ;;  %v274_v10 = vld [vmem:[%s430_s0 + $0x8] sm:$0xff] }
   0x3   :  { %v277_v8 = vld [vmem:[%s430_s0 + $0x20] sm:$0xff]  ;;  %v279_v9 = vld [vmem:[%s430_s0 + $0x30] sm:$0xff]  ;;  %v276_v11 = vld [vmem:[%s430_s0 + $0x18] sm:$0xff] }
   0x4   :  { %v92_v2 = vpack.c.b16 %v89_v1, %v89_v1  ;;  %v278_v12 = vld [vmem:[%s430_s0 + $0x28] sm:$0xff]  ;;  %v280_v13 = vld [vmem:[%s430_s0 + $0x38] sm:$0xff]  ;;  %v339_v16 = vld [vmem:[%s429_s2] ss:$0 sm:$0xff] }
   0x6   :  { %v122_v3 = vsel %vm120_vm0, %v92_v2, 0 }
   0x7   :  { %129 = vmatpush.bf16.msra.mxu0 %v122_v3  ;;  %330 = vmatpush.bf16.msra.mxu1 %v122_v3 }
   0x8   :  { %331 = vmatpush.bf16.msra.mxu2 %v122_v3  ;;  %332 = vmatpush.bf16.msra.mxu3 %v122_v3 }
   0xb   :  { %130 = vmatpush.bf16.msra.mxu0 %v282_v4  ;;  %333 = vmatpush.bf16.msra.mxu1 %v282_v4 }
   0xc   :  { %334 = vmatpush.bf16.msra.mxu2 %v282_v4  ;;  %335 = vmatpush.bf16.msra.mxu3 %v282_v4 }
   0xf   :  { %131 = vmatpush.bf16.msra.mxu0 %v281_v5  ;;  %336 = vmatpush.bf16.msra.mxu1 %v281_v5 }
  0x10   :  { %337 = vmatpush.bf16.msra.mxu2 %v281_v5  ;;  %338 = vmatpush.bf16.msra.mxu3 %v281_v5 }
  0x12   :  { %265 = vmatmul.msk.bf16.vlgmr.msra.gmra.mxu0 %vm95_vm1, %v273_v6  ;;  %267 = vmatmul.msk.bf16.vlgmr.msra.gmra.mxu1 %vm95_vm1, %v275_v7 }
  0x13   :  { %269 = vmatmul.msk.bf16.vlgmr.msra.gmra.mxu2 %vm95_vm1, %v277_v8  ;;  %271 = vmatmul.msk.bf16.vlgmr.msra.gmra.mxu3 %vm95_vm1, %v279_v9 }
  0x22   :  { %266 = vmatmul.msk.bf16.gmra.mxu0 %vm95_vm1, %v274_v10  ;;  %268 = vmatmul.msk.bf16.gmra.mxu1 %vm95_vm1, %v276_v11 }
  0x23   :  { %270 = vmatmul.msk.bf16.gmra.mxu2 %vm95_vm1, %v278_v12  ;;  %272 = vmatmul.msk.bf16.gmra.mxu3 %vm95_vm1, %v280_v13 }
  0x8f   :  { %v133_v14 = vpop.f32.mrf.mxu0  ;;  %v143_v15 = vpop.f32.mrf.mxu1 }
  0x90   :  { %v134_v17 = vadd.f32 %v339_v16, %v133_v14  ;;  %v144_v18 = vadd.f32 %v339_v16, %v143_v15 }
  0x92   :  { %v173_v25 = vmax.f32 %v134_v17, 0.0  ;;  %v177_v26 = vmax.f32 %v144_v18, 0.0 }
  0x96   :  { %v153_v19 = vpop.f32.mrf.mxu2  ;;  %v163_v20 = vpop.f32.mrf.mxu3 }
  0x97   :  { %v135_v21 = vpop.f32.mrf.mxu0  ;;  %v145_v22 = vpop.f32.mrf.mxu1  ;;  %v154_v31 = vadd.f32 %v339_v16, %v153_v19  ;;  %v164_v32 = vadd.f32 %v339_v16, %v163_v20 }
  0x98   :  { %v136_v23 = vadd.f32 %v339_v16, %v135_v21  ;;  %v146_v24 = vadd.f32 %v339_v16, %v145_v22 }
  0x99   :  { %v181_v39 = vmax.f32 %v154_v31, 0.0  ;;  %v185_v40 = vmax.f32 %v164_v32, 0.0 }
  0x9a   :  { %v174_v27 = vmax.f32 %v136_v23, 0.0  ;;  %v178_v28 = vmax.f32 %v146_v24, 0.0 }
  0x9c   :  { %v286_v29 = vpack.c.bf16 %v174_v27, %v173_v25  ;;  %v296_v30 = vpack.c.bf16 %v178_v28, %v177_v26 }
  0x9e   :  { %287 = vst [vmem:[%s431_s3] sm:$0xff] %v286_v29   ;;  %v155_v33 = vpop.f32.mrf.mxu2  ;;  %v165_v34 = vpop.f32.mrf.mxu3 }
  0x9f   :  { %324 = vst [vmem:[%s431_s3 + $0x10] sm:$0xff] %v296_v30   ;;  %v156_v35 = vadd.f32 %v339_v16, %v155_v33  ;;  %v166_v36 = vadd.f32 %v339_v16, %v165_v34  ;;  %v138_v37 = vpop.f32.mrf.mxu0  ;;  %v148_v38 = vpop.f32.mrf.mxu1 }
  0xa0   :  { %v139_v45 = vadd.f32 %v339_v16, %v138_v37  ;;  %v149_v46 = vadd.f32 %v339_v16, %v148_v38 }
  0xa1   :  { %v182_v41 = vmax.f32 %v156_v35, 0.0  ;;  %v186_v42 = vmax.f32 %v166_v36, 0.0 }
  0xa2   :  { %v175_v53 = vmax.f32 %v139_v45, 0.0  ;;  %v179_v54 = vmax.f32 %v149_v46, 0.0 }
  0xa3   :  { %v306_v43 = vpack.c.bf16 %v182_v41, %v181_v39  ;;  %v316_v44 = vpack.c.bf16 %v186_v42, %v185_v40 }
  0xa5   :  { %326 = vst [vmem:[%s431_s3 + $0x20] sm:$0xff] %v306_v43  }
  0xa6   :  { %328 = vst [vmem:[%s431_s3 + $0x30] sm:$0xff] %v316_v44   ;;  %v158_v47 = vpop.f32.mrf.mxu2  ;;  %v168_v48 = vpop.f32.mrf.mxu3 }
  0xa7   :  { %v140_v49 = vpop.f32.mrf.mxu0  ;;  %v150_v50 = vpop.f32.mrf.mxu1  ;;  %v159_v59 = vadd.f32 %v339_v16, %v158_v47  ;;  %v169_v60 = vadd.f32 %v339_v16, %v168_v48 }
  0xa8   :  { %v141_v51 = vadd.f32 %v339_v16, %v140_v49  ;;  %v151_v52 = vadd.f32 %v339_v16, %v150_v50 }
  0xa9   :  { %v183_v1 = vmax.f32 %v159_v59, 0.0  ;;  %v187_v2 = vmax.f32 %v169_v60, 0.0 }
  0xaa   :  { %v176_v55 = vmax.f32 %v141_v51, 0.0  ;;  %v180_v56 = vmax.f32 %v151_v52, 0.0 }
  0xac   :  { %v291_v57 = vpack.c.bf16 %v176_v55, %v175_v53  ;;  %v301_v58 = vpack.c.bf16 %v180_v56, %v179_v54 }
  0xae   :  { %323 = vst [vmem:[%s431_s3 + $0x8] sm:$0xff] %v291_v57   ;;  %v160_v61 = vpop.f32.mrf.mxu2  ;;  %v170_v62 = vpop.f32.mrf.mxu3 }
  0xaf   :  { %325 = vst [vmem:[%s431_s3 + $0x18] sm:$0xff] %v301_v58   ;;  %v161_v63 = vadd.f32 %v339_v16, %v160_v61  ;;  %v171_v0 = vadd.f32 %v339_v16, %v170_v62 }
  0xb1   :  { %v184_v3 = vmax.f32 %v161_v63, 0.0  ;;  %v188_v4 = vmax.f32 %v171_v0, 0.0 }
  0xb3   :  { %v311_v5 = vpack.c.bf16 %v184_v3, %v183_v1  ;;  %v321_v6 = vpack.c.bf16 %v188_v4, %v187_v2 }
  0xb5   :  { %327 = vst [vmem:[%s431_s3 + $0x28] sm:$0xff] %v311_v5  }
  0xb6   :  { %329 = vst [vmem:[%s431_s3 + $0x38] sm:$0xff] %v321_v6  }

// kernel: resnet_block_forward.3
= control target key start
LH: loop header
LB: loop body
LE: loop exit
PB: predicated region body
PF: predicated region fallthrough
CT: control target
= control target key end

     0   :  { %s11027_s21 = smov 0   ;;  %s11029_s22 = smov 0   ;;  %s13191_s0 = inlined_call_operand.vmem [shape: bf16[2,10,10,128], index: 0, kind: input, shape index: {}]   ;;  %s13192_s1 = inlined_call_operand.vmem [shape: bf16[9,128,128], index: 1, kind: input, shape index: {}]   ;;  %s13193_s2 = inlined_call_operand.vmem [shape: f32[1,128], index: 2, kind: input, shape index: {}]   ;;  %s13194_s3 = inlined_call_operand.vmem [shape: bf16[2,8,8,4], index: 3, kind: input, shape index: {}]   ;;  %s13195_s4 = inlined_call_operand.vmem [shape: bf16[4,128], index: 4, kind: input, shape index: {}]   ;;  %s13196_s5 = inlined_call_operand.vmem [shape: f32[1,128], index: 5, kind: input, shape index: {}]   ;;  %s13197_s6 = inlined_call_operand.vmem [shape: bf16[2,8,8,128], index: 6, kind: output, shape index: {}]  }
   0x1   :  { %s11031_s23 = smov 0  }
   0x2 LB: > { %s28_s24 = sadd.s32 1, %s10986_s22  ;;  %p6912_p0 = scmp.ge.s32.totalorder %s10990_s23, 1  ;;  %s10990_s23 = sphi %s11031_s23, %s16_s23   ;;  %s10986_s22 = sphi %s11029_s22, %s13199_s22   ;;  %s10982_s21 = sphi %s11027_s21, %s13198_s21  }
   0x3   : > { %p30_p1 = scmp.ge.s32.totalorder %s28_s24, 2  ;;  %p270_p2 = scmp.lt.s32.totalorder %s10990_s23, 3 }
   0x5   : > { %s13201_s24 = smov (%p30_p1, %s28_s24), 0  ;;  %p271_p3 = pnand %p6912_p0, %p270_p2 }
   0x6   : > { %p322_p4 = scmp.lt.s32.totalorder (!%p271_p3), %s10982_s21, 1 }
   0x7   : > { %274 = sbr.rel (%p271_p3) target bundleno = 759 (0x2f7), region = 44 }
   0xc   : > { %v10372_v0 = vld [vmem:[%s13192_s1 + $0x78] sm:$0xff]  ;;  %v10371_v4 = vld [vmem:[%s13192_s1 + $0x70] sm:$0xff]  ;;  %s13203_s21 = smov (!%p322_p4, %s10982_s21), 1  ;;  %v10370_v8 = vld [vmem:[%s13192_s1 + $0x68] sm:$0xff]  ;;  %vm1141_vm0 = vcmask 1041408   ;;  %vm1137_vm1 = vcmask 31744  }
   0xd   : > { %v10380_v1 = vld [vmem:[%s13192_s1 + $0xb8] sm:$0xff]  ;;  %452 = vmatpush.bf16.msra.mxu0 %v10372_v0  ;;  %v10379_v5 = vld [vmem:[%s13192_s1 + $0xb0] sm:$0xff]  ;;  %v10378_v9 = vld [vmem:[%s13192_s1 + $0xa8] sm:$0xff]  ;;  %s10933_s29 = smul.u32 80, %s13203_s21  ;;  %s10355_s15 = sshll.u32 %s13203_s21, 5 }
   0xe   : > { %v10388_v2 = vld [vmem:[%s13192_s1 + $0xf8] sm:$0xff]  ;;  %597 = vmatpush.bf16.msra.mxu2 %v10380_v1  ;;  %v10387_v6 = vld [vmem:[%s13192_s1 + $0xf0] sm:$0xff]  ;;  %v10386_v10 = vld [vmem:[%s13192_s1 + $0xe8] sm:$0xff]  ;;  %s11332_s27 = scalar_lea.vmem %s13194_s3, %s10355_s15  ;;  %s11922_s25 = scalar_lea.vmem %s13197_s6, %s10355_s15 }
   0xf   : > { %v10364_v3 = vld [vmem:[%s13192_s1 + $0x38] sm:$0xff]  ;;  %678 = vmatpush.bf16.msra.mxu3 %v10388_v2  ;;  %v10363_v7 = vld [vmem:[%s13192_s1 + $0x30] sm:$0xff]  ;;  %v10362_v11 = vld [vmem:[%s13192_s1 + $0x28] sm:$0xff]  ;;  %s11099_s16 = scalar_lea.vmem %s13191_s0, %s10933_s29 }
  0x10   : > { %513 = vmatpush.bf16.msra.mxu1 %v10364_v3  ;;  %v10369_v12 = vld [vmem:[%s13192_s1 + $0x60] sm:$0xff]  ;;  %v10368_v16 = vld [vmem:[%s13192_s1 + $0x58] sm:$0xff]  ;;  %v10367_v23 = vld [vmem:[%s13192_s1 + $0x50] sm:$0xff] }
  0x11   : > { %453 = vmatpush.bf16.msra.mxu0 %v10371_v4  ;;  %v10377_v13 = vld [vmem:[%s13192_s1 + $0xa0] sm:$0xff]  ;;  %v10376_v17 = vld [vmem:[%s13192_s1 + $0x98] sm:$0xff]  ;;  %v10375_v24 = vld [vmem:[%s13192_s1 + $0x90] sm:$0xff] }
  0x12   : > { %598 = vmatpush.bf16.msra.mxu2 %v10379_v5  ;;  %v10385_v14 = vld [vmem:[%s13192_s1 + $0xe0] sm:$0xff]  ;;  %v10384_v18 = vld [vmem:[%s13192_s1 + $0xd8] sm:$0xff]  ;;  %v10383_v25 = vld [vmem:[%s13192_s1 + $0xd0] sm:$0xff] }
  0x13   : > { %679 = vmatpush.bf16.msra.mxu3 %v10387_v6  ;;  %v10361_v15 = vld [vmem:[%s13192_s1 + $0x20] sm:$0xff]  ;;  %v10360_v19 = vld [vmem:[%s13192_s1 + $0x18] sm:$0xff]  ;;  %v10359_v27 = vld [vmem:[%s13192_s1 + $0x10] sm:$0xff] }
  0x14   : > { %514 = vmatpush.bf16.msra.mxu1 %v10363_v7  ;;  %v373_v20 = vld [vmem:[%s11099_s16 + $0x4] sm:$0x1]  ;;  %v356_v22 = vld [vmem:[%s11099_s16] sm:$0xf]  ;;  %v10366_v30 = vld [vmem:[%s13192_s1 + $0x48] sm:$0xff] }
  0x15   : > { %454 = vmatpush.bf16.msra.mxu0 %v10370_v8  ;;  %v394_v21 = vunpack.c.l.b16 %v373_v20  ;;  %v393_v26 = vunpack.c.l.b16 %v356_v22  ;;  %v526_v28 = vld [vmem:[%s11099_s16] sm:$0xe]  ;;  %v10374_v31 = vld [vmem:[%s13192_s1 + $0x88] sm:$0xff]  ;;  %v10396_v38 = vld [vmem:[%s13192_s1 + $0x138] sm:$0xff] }
  0x16   : > { %599 = vmatpush.bf16.msra.mxu2 %v10378_v9  ;;  %v545_v32 = vunpack.c.l.b16 %v526_v28  ;;  %v10382_v34 = vld [vmem:[%s13192_s1 + $0xc8] sm:$0xff]  ;;  %v10365_v36 = vld [vmem:[%s13192_s1 + $0x40] sm:$0xff]  ;;  %v10412_v42 = vld [vmem:[%s13192_s1 + $0x1b8] sm:$0xff] }
  0x17   : > { %680 = vmatpush.bf16.msra.mxu3 %v10386_v10  ;;  %v395_v29 = vpack.c.b16 %v394_v21, %v393_v26  ;;  %v10358_v35 = vld [vmem:[%s13192_s1 + $0x8] sm:$0xff]  ;;  %v10373_v37 = vld [vmem:[%s13192_s1 + $0x80] sm:$0xff]  ;;  %v10420_v45 = vld [vmem:[%s13192_s1 + $0x1f8] sm:$0xff] }
  0x18   : > { %515 = vmatpush.bf16.msra.mxu1 %v10362_v11  ;;  %v546_v39 = vpack.c.b16 %v394_v21, %v545_v32  ;;  %v10381_v43 = vld [vmem:[%s13192_s1 + $0xc0] sm:$0xff]  ;;  %v10404_v46 = vld [vmem:[%s13192_s1 + $0x178] sm:$0xff]  ;;  %v10395_v49 = vld [vmem:[%s13192_s1 + $0x130] sm:$0xff] }
  0x19   : > { %455 = vmatpush.bf16.msra.mxu0 %v10369_v12  ;;  %v399_v33 = vshll.u32 %v395_v29, 16  ;;  %v397_v40 = vshrl.u32 %v395_v29, 16  ;;  %v10357_v44 = vld [vmem:[%s13192_s1] sm:$0xff]  ;;  %v10411_v50 = vld [vmem:[%s13192_s1 + $0x1b0] sm:$0xff]  ;;  %v7046_v53 = vld [vmem:[%s11099_s16 + $0x8] sm:$0xf] }
  0x1a   : > { %600 = vmatpush.bf16.msra.mxu2 %v10377_v13  ;;  %v547_v47 = vrot.slane %v546_v39, 1  ;;  %v10419_v51 = vld [vmem:[%s13192_s1 + $0x1f0] sm:$0xff]  ;;  %v10394_v54 = vld [vmem:[%s13192_s1 + $0x128] sm:$0xff]  ;;  %v10393_v58 = vld [vmem:[%s13192_s1 + $0x120] sm:$0xff] }
  0x1b   : > { %681 = vmatpush.bf16.msra.mxu3 %v10385_v14  ;;  %v401_v41 = vrot.slane %v399_v33, 1  ;;  %v10403_v52 = vld [vmem:[%s13192_s1 + $0x170] sm:$0xff]  ;;  %v10410_v55 = vld [vmem:[%s13192_s1 + $0x1a8] sm:$0xff]  ;;  %v10409_v59 = vld [vmem:[%s13192_s1 + $0x1a0] sm:$0xff] }
  0x1c   : > { %516 = vmatpush.bf16.msra.mxu1 %v10361_v15  ;;  %v10418_v56 = vld [vmem:[%s13192_s1 + $0x1e8] sm:$0xff]  ;;  %v10417_v62 = vld [vmem:[%s13192_s1 + $0x1e0] sm:$0xff]  ;;  %v7243_v2 = vld [vmem:[%s11099_s16 + $0x10] sm:$0xf] }
  0x1d   : > { %456 = vmatpush.bf16.msra.mxu0 %v10368_v16  ;;  %v402_v48 = vor.u32 %v401_v41, %v397_v40  ;;  %v10402_v57 = vld [vmem:[%s13192_s1 + $0x168] sm:$0xff]  ;;  %v10401_v63 = vld [vmem:[%s13192_s1 + $0x160] sm:$0xff]  ;;  %v11205_v3 = vld [vmem:[%s11099_s16 + $0x14] sm:$0x1]  ;;  %v973_v8 = vunpack.c.l.b16 %v7243_v2 }
  0x1e   : > { %601 = vmatpush.bf16.msra.mxu2 %v10376_v17  ;;  %v7095_v60 = vld [vmem:[%s11099_s16 + $0x8] sm:$0xf]  ;;  %v7096_v61 = vld [vmem:[%s11099_s16 + $0xc] sm:$0x1]  ;;  %v10392_v4 = vld [vmem:[%s13192_s1 + $0x118] sm:$0xff]  ;;  %v974_v9 = vunpack.c.l.b16 %v11205_v3 }
  0x1f   : > { %682 = vmatpush.bf16.msra.mxu3 %v10384_v18  ;;  %v713_v0 = vunpack.c.l.b16 %v7095_v60  ;;  %v714_v1 = vunpack.c.l.b16 %v7096_v61  ;;  %v10408_v5 = vld [vmem:[%s13192_s1 + $0x198] sm:$0xff]  ;;  %v10391_v11 = vld [vmem:[%s13192_s1 + $0x110] sm:$0xff]  ;;  %v7145_v17 = vld [vmem:[%s11099_s16 + $0x8] sm:$0xe] }
  0x20   : > { %517 = vmatpush.bf16.msra.mxu1 %v10360_v19  ;;  %v10416_v6 = vld [vmem:[%s13192_s1 + $0x1d8] sm:$0xff]  ;;  %v10407_v12 = vld [vmem:[%s13192_s1 + $0x190] sm:$0xff]  ;;  %v975_v15 = vpack.c.b16 %v974_v9, %v973_v8  ;;  %v10390_v18 = vld [vmem:[%s13192_s1 + $0x108] sm:$0xff] }
  0x21   : > { %457 = vmatpush.bf16.msra.mxu0 %v10367_v23  ;;  %v10400_v7 = vld [vmem:[%s13192_s1 + $0x158] sm:$0xff]  ;;  %v715_v10 = vpack.c.b16 %v714_v1, %v713_v0  ;;  %v10415_v13 = vld [vmem:[%s13192_s1 + $0x1d0] sm:$0xff]  ;;  %v10406_v19 = vld [vmem:[%s13192_s1 + $0x188] sm:$0xff]  ;;  %v805_v23 = vunpack.c.l.b16 %v7145_v17 }
  0x22   : > { %602 = vmatpush.bf16.msra.mxu2 %v10375_v24  ;;  %v10399_v14 = vld [vmem:[%s13192_s1 + $0x150] sm:$0xff]  ;;  %v10414_v20 = vld [vmem:[%s13192_s1 + $0x1c8] sm:$0xff]  ;;  %v10389_v26 = vld [vmem:[%s13192_s1 + $0x100] sm:$0xff]  ;;  %v977_v32 = vshrl.u32 %v975_v15, 16 }
  0x23   : > { %683 = vmatpush.bf16.msra.mxu3 %v10383_v25  ;;  %v719_v16 = vshll.u32 %v715_v10, 16  ;;  %v10398_v21 = vld [vmem:[%s13192_s1 + $0x148] sm:$0xff]  ;;  %v717_v24 = vshrl.u32 %v715_v10, 16  ;;  %v10428_v28 = vld [vmem:[%s13192_s1 + $0x238] sm:$0xff]  ;;  %v10427_v39 = vld [vmem:[%s13192_s1 + $0x230] sm:$0xff] }
  0x24   : > { %518 = vmatpush.bf16.msra.mxu1 %v10359_v27  ;;  %v10405_v27 = vld [vmem:[%s13192_s1 + $0x180] sm:$0xff]  ;;  %v10444_v29 = vld [vmem:[%s13192_s1 + $0x78] sm:$0xff]  ;;  %v10443_v40 = vld [vmem:[%s13192_s1 + $0x70] sm:$0xff] }
  0x25   : > { %458 = vmatpush.bf16.msra.mxu0 %v10366_v30  ;;  %v721_v25 = vrot.slane %v719_v16, 1  ;;  %v10413_v30 = vld [vmem:[%s13192_s1 + $0x1c0] sm:$0xff]  ;;  %v10432_v61 = vld [vmem:[%s13192_s1 + $0x18] sm:$0xff]  ;;  %v7293_v0 = vld [vmem:[%s11099_s16 + $0x10] sm:$0xe] }
  0x26   : > { %603 = vmatpush.bf16.msra.mxu2 %v10374_v31  ;;  %v10397_v31 = vld [vmem:[%s13192_s1 + $0x140] sm:$0xff]  ;;  %v10448_v2 = vld [vmem:[%s13192_s1 + $0x98] sm:$0xff]  ;;  %v10438_v8 = vld [vmem:[%s13192_s1 + $0x48] sm:$0xff] }
  0x27   : > { %684 = vmatpush.bf16.msra.mxu3 %v10382_v34  ;;  %v1136_v34 = vld [vmem:[%s13195_s4] sm:$0x3]  ;;  %v10460_v3 = vld [vmem:[%s13192_s1 + $0xf8] sm:$0xff] }
  0x28   : > { %519 = vmatpush.bf16.msra.mxu1 %v10358_v35  ;;  %v806_v35 = vpack.c.b16 %v714_v1, %v805_v23  ;;  %v1143_v41 = vsel %vm1141_vm0, %v1136_v34, 0  ;;  %v10483_v34 = vld [vmem:[%s13192_s1 + $0x1b0] sm:$0xff] }
  0x29   : > { %459 = vmatpush.bf16.msra.mxu0 %v10365_v36  ;;  %v722_v36 = vor.u32 %v721_v25, %v717_v24  ;;  %v10459_v25 = vld [vmem:[%s13192_s1 + $0xf0] sm:$0xff] }
  0x2a   : > { %604 = vmatpush.bf16.msra.mxu2 %v10373_v37  ;;  %v7194_v37 = vld [vmem:[%s11099_s16 + $0x10] sm:$0xf] }
  0x2b   : > { %685 = vmatpush.bf16.msra.mxu3 %v10381_v43  ;;  %v807_v43 = vrot.slane %v806_v35, 1  ;;  %v10457_v35 = vld [vmem:[%s13192_s1 + $0xe0] sm:$0xff] }
  0x2c   : > { %520 = vmatpush.bf16.msra.mxu1 %v10357_v44  ;;  %460 = vmatmul.bf16.vlgmr.msra.gmra.mxu0 %v402_v48  ;;  %v10452_v44 = vld [vmem:[%s13192_s1 + $0xb8] sm:$0xff]  ;;  %v10451_v48 = vld [vmem:[%s13192_s1 + $0xb0] sm:$0xff] }
  0x2d   : > { %772 = vmatpush.bf16.msrb.mxu0 %v10396_v38  ;;  %605 = vmatmul.bf16.vlgmr.msra.gmra.mxu2 %v547_v47  ;;  %v10436_v38 = vld [vmem:[%s13192_s1 + $0x38] sm:$0xff]  ;;  %v10442_v47 = vld [vmem:[%s13192_s1 + $0x68] sm:$0xff] }
  0x2e   : > { %938 = vmatpush.bf16.msrb.mxu2 %v10412_v42  ;;  %686 = vmatmul.bf16.vlgmr.msra.gmra.mxu3 %v7046_v53  ;;  %v10433_v53 = vld [vmem:[%s13192_s1 + $0x20] sm:$0xff] }
  0x2f   : > { %1032 = vmatpush.bf16.msrb.mxu3 %v10420_v45  ;;  %521 = vmatmul.bf16.vlgmr.msra.gmra.mxu1 %v356_v22  ;;  %v979_v22 = vshll.u32 %v975_v15, 16  ;;  %v10435_v45 = vld [vmem:[%s13192_s1 + $0x30] sm:$0xff]  ;;  %v10437_v15 = vld [vmem:[%s13192_s1 + $0x40] sm:$0xff] }
  0x30   : > { %857 = vmatpush.bf16.msrb.mxu1 %v10404_v46  ;;  %v10426_v46 = vld [vmem:[%s13192_s1 + $0x228] sm:$0xff] }
  0x31   : > { %773 = vmatpush.bf16.msrb.mxu0 %v10395_v49  ;;  %v981_v33 = vrot.slane %v979_v22, 1  ;;  %v10434_v49 = vld [vmem:[%s13192_s1 + $0x28] sm:$0xff]  ;;  %v10476_v22 = vld [vmem:[%s13192_s1 + $0x178] sm:$0xff] }
  0x32   : > { %939 = vmatpush.bf16.msrb.mxu2 %v10411_v50  ;;  %v10425_v50 = vld [vmem:[%s13192_s1 + $0x220] sm:$0xff] }
  0x33   : > { %1033 = vmatpush.bf16.msrb.mxu3 %v10419_v51  ;;  %v982_v42 = vor.u32 %v981_v33, %v977_v32  ;;  %v10441_v51 = vld [vmem:[%s13192_s1 + $0x60] sm:$0xff]  ;;  %v10466_v32 = vld [vmem:[%s13192_s1 + $0x128] sm:$0xff] }
  0x34   : > { %858 = vmatpush.bf16.msrb.mxu1 %v10403_v52  ;;  %v10450_v52 = vld [vmem:[%s13192_s1 + $0xa8] sm:$0xff] }
  0x35   : > { %774 = vmatpush.bf16.msrb.mxu0 %v10394_v54  ;;  %v10424_v54 = vld [vmem:[%s13192_s1 + $0x218] sm:$0xff] }
  0x36   : > { %940 = vmatpush.bf16.msrb.mxu2 %v10410_v55  ;;  %v10440_v55 = vld [vmem:[%s13192_s1 + $0x58] sm:$0xff] }
  0x37   : > { %1034 = vmatpush.bf16.msrb.mxu3 %v10418_v56  ;;  %v11317_v56 = vld [vmem:[%s11099_s16 + $0x8] sm:$0xf] }
  0x38   : > { %859 = vmatpush.bf16.msrb.mxu1 %v10402_v57  ;;  %v7344_v57 = vld [vmem:[%s11099_s16 + $0xc] sm:$0x1] }
  0x39   : > { %775 = vmatpush.bf16.msrb.mxu0 %v10393_v58  ;;  %v10449_v58 = vld [vmem:[%s13192_s1 + $0xa0] sm:$0xff]  ;;  %v1204_v60 = vunpack.c.l.b16 %v7344_v57  ;;  %v10479_v57 = vld [vmem:[%s13192_s1 + $0x190] sm:$0xff] }
  0x3a   : > { %941 = vmatpush.bf16.msrb.mxu2 %v10409_v59  ;;  %v1203_v59 = vunpack.c.l.b16 %v11317_v56 }
  0x3b   : > { %1035 = vmatpush.bf16.msrb.mxu3 %v10417_v62  ;;  %v10423_v62 = vld [vmem:[%s13192_s1 + $0x210] sm:$0xff] }
  0x3c   : > { %860 = vmatpush.bf16.msrb.mxu1 %v10401_v63  ;;  %v10439_v63 = vld [vmem:[%s13192_s1 + $0x50] sm:$0xff]  ;;  %v1205_v1 = vpack.c.b16 %v1204_v60, %v1203_v59  ;;  %v10470_v59 = vld [vmem:[%s13192_s1 + $0x148] sm:$0xff] }
  0x3d   : > { %776 = vmatpush.bf16.msrb.mxu0 %v10392_v4  ;;  %v1135_v4 = vld [vmem:[%s11332_s27] sm:$0xf] }
  0x3e   : > { %942 = vmatpush.bf16.msrb.mxu2 %v10408_v5  ;;  %v1065_v5 = vunpack.c.l.b16 %v7293_v0  ;;  %v1209_v10 = vshll.u32 %v1205_v1, 16  ;;  %v1207_v16 = vshrl.u32 %v1205_v1, 16  ;;  %v10492_v0 = vld [vmem:[%s13192_s1 + $0x1f8] sm:$0xff] }
  0x3f   : > { %1036 = vmatpush.bf16.msrb.mxu3 %v10416_v6  ;;  %v10431_v6 = vld [vmem:[%s13192_s1 + $0x10] sm:$0xff]  ;;  %v10500_v1 = vld [vmem:[%s13192_s1 + $0x238] sm:$0xff] }
  0x40   : > { %861 = vmatpush.bf16.msrb.mxu1 %v10400_v7  ;;  %v10422_v7 = vld [vmem:[%s13192_s1 + $0x208] sm:$0xff]  ;;  %v1211_v17 = vrot.slane %v1209_v10, 1  ;;  %v10499_v10 = vld [vmem:[%s13192_s1 + $0x230] sm:$0xff] }
  0x41   : > { %777 = vmatpush.bf16.msrb.mxu0 %v10391_v11  ;;  %v10447_v11 = vld [vmem:[%s13192_s1 + $0x90] sm:$0xff] }
  0x42   : > { %943 = vmatpush.bf16.msrb.mxu2 %v10407_v12  ;;  %v1066_v12 = vpack.c.b16 %v974_v9, %v1065_v5  ;;  %v10468_v9 = vld [vmem:[%s13192_s1 + $0x138] sm:$0xff]  ;;  %v1212_v23 = vor.u32 %v1211_v17, %v1207_v16  ;;  %v10490_v17 = vld [vmem:[%s13192_s1 + $0x1e8] sm:$0xff] }
  0x43   : > { %1037 = vmatpush.bf16.msrb.mxu3 %v10415_v13  ;;  %v10430_v13 = vld [vmem:[%s13192_s1 + $0x8] sm:$0xff]  ;;  %v10508_v16 = vld [vmem:[%s13192_s1 + $0x38] sm:$0xff] }
  0x44   : > { %862 = vmatpush.bf16.msrb.mxu1 %v10399_v14  ;;  %v10421_v14 = vld [vmem:[%s13192_s1 + $0x200] sm:$0xff] }
  0x45   : > { %778 = vmatpush.bf16.msrb.mxu0 %v10390_v18  ;;  %v10446_v18 = vld [vmem:[%s13192_s1 + $0x88] sm:$0xff] }
  0x46   : > { %944 = vmatpush.bf16.msrb.mxu2 %v10406_v19  ;;  %v1067_v19 = vrot.slane %v1066_v12, 1 }
  0x47   : > { %1038 = vmatpush.bf16.msrb.mxu3 %v10414_v20  ;;  %v10429_v20 = vld [vmem:[%s13192_s1] sm:$0xff] }
  0x48   : > { %863 = vmatpush.bf16.msrb.mxu1 %v10398_v21  ;;  %v7425_v21 = vld [vmem:[%s11099_s16 + $0x8] sm:$0xe] }
  0x49   : > { %779 = vmatpush.bf16.msrb.mxu0 %v10389_v26  ;;  %v1354_v24 = vunpack.c.l.b16 %v7425_v21  ;;  %v10467_v26 = vld [vmem:[%s13192_s1 + $0x130] sm:$0xff]  ;;  %v10497_v21 = vld [vmem:[%s13192_s1 + $0x220] sm:$0xff] }
  0x4a   : > { %945 = vmatpush.bf16.msrb.mxu2 %v10405_v27  ;;  %v10445_v27 = vld [vmem:[%s13192_s1 + $0x80] sm:$0xff] }
  0x4b   : > { %1039 = vmatpush.bf16.msrb.mxu3 %v10413_v30  ;;  %v10475_v30 = vld [vmem:[%s13192_s1 + $0x170] sm:$0xff] }
  0x4c   : > { %864 = vmatpush.bf16.msrb.mxu1 %v10397_v31  ;;  %780 = vmatmul.bf16.vlgmr.msrb.gmra.mxu0 %v722_v36  ;;  %v10458_v31 = vld [vmem:[%s13192_s1 + $0xe8] sm:$0xff] }
  0x4d   : > { %1117 = vmatpush.bf16.msra.mxu0 %v10428_v28  ;;  %946 = vmatmul.bf16.vlgmr.msrb.gmra.mxu2 %v7194_v37  ;;  %v1355_v28 = vpack.c.b16 %v1204_v60, %v1354_v24  ;;  %v10474_v36 = vld [vmem:[%s13192_s1 + $0x168] sm:$0xff]  ;;  %v10465_v37 = vld [vmem:[%s13192_s1 + $0x120] sm:$0xff] }
  0x4e   : > { %1262 = vmatpush.bf16.msra.mxu2 %v10444_v29  ;;  %1040 = vmatmul.bf16.vlgmr.msrb.gmra.mxu3 %v982_v42  ;;  %v10484_v29 = vld [vmem:[%s13192_s1 + $0x1b8] sm:$0xff]  ;;  %v10514_v24 = vld [vmem:[%s13192_s1 + $0x68] sm:$0xff] }
  0x4f   : > { %1323 = vmatpush.bf16.msra.mxu3 %v10436_v38  ;;  %865 = vmatmul.bf16.vlgmr.msrb.gmra.mxu1 %v807_v43  ;;  %v1356_v33 = vrot.slane %v1355_v28, 1  ;;  %v7523_v38 = vld [vmem:[%s11099_s16 + $0x10] sm:$0xf]  ;;  %v10488_v28 = vld [vmem:[%s13192_s1 + $0x1d8] sm:$0xff] }
  0x50   : > { %1152 = vmatpush.bf16.msra.mxu1 %v1143_v41  ;;  %v10473_v41 = vld [vmem:[%s13192_s1 + $0x160] sm:$0xff]  ;;  %v1519_v42 = vunpack.c.l.b16 %v7523_v38 }
  0x51   : > { %1118 = vmatpush.bf16.msra.mxu0 %v10427_v39  ;;  %v7524_v39 = vld [vmem:[%s11099_s16 + $0x14] sm:$0x1]  ;;  %v7770_v38 = vld [vmem:[%s11332_s27 + $0x4] sm:$0xf] }
  0x52   : > { %1263 = vmatpush.bf16.msra.mxu2 %v10443_v40  ;;  %v10482_v40 = vld [vmem:[%s13192_s1 + $0x1a8] sm:$0xff]  ;;  %v1520_v43 = vunpack.c.l.b16 %v7524_v39 }
  0x53   : > { %1324 = vmatpush.bf16.msra.mxu3 %v10435_v45  ;;  %v10464_v45 = vld [vmem:[%s13192_s1 + $0x118] sm:$0xff] }
  0x54   : > { %1406 = vmatpush.bf16.msrb.mxu1 %v10452_v44  ;;  %v10456_v44 = vld [vmem:[%s13192_s1 + $0xd8] sm:$0xff] }
  0x55   : > { %1119 = vmatpush.bf16.msra.mxu0 %v10426_v46  ;;  %v10481_v46 = vld [vmem:[%s13192_s1 + $0x1a0] sm:$0xff] }
  0x56   : > { %1264 = vmatpush.bf16.msra.mxu2 %v10442_v47  ;;  %v10472_v47 = vld [vmem:[%s13192_s1 + $0x158] sm:$0xff] }
  0x57   : > { %1325 = vmatpush.bf16.msra.mxu3 %v10434_v49  ;;  %v10455_v49 = vld [vmem:[%s13192_s1 + $0xd0] sm:$0xff] }
  0x58   : > { %1407 = vmatpush.bf16.msrb.mxu1 %v10451_v48  ;;  %v1521_v48 = vpack.c.b16 %v1520_v43, %v1519_v42  ;;  %v10494_v42 = vld [vmem:[%s13192_s1 + $0x208] sm:$0xff] }
  0x59   : > { %1120 = vmatpush.bf16.msra.mxu0 %v10425_v50  ;;  %v10463_v50 = vld [vmem:[%s13192_s1 + $0x110] sm:$0xff] }
  0x5a   : > { %1265 = vmatpush.bf16.msra.mxu2 %v10441_v51  ;;  %v10480_v51 = vld [vmem:[%s13192_s1 + $0x198] sm:$0xff]  ;;  %v1523_v60 = vshrl.u32 %v1521_v48, 16 }
  0x5b   : > { %1326 = vmatpush.bf16.msra.mxu3 %v10433_v53  ;;  %v1525_v53 = vshll.u32 %v1521_v48, 16 }
  0x5c   : > { %1408 = vmatpush.bf16.msrb.mxu1 %v10450_v52  ;;  %v10471_v52 = vld [vmem:[%s13192_s1 + $0x150] sm:$0xff] }
  0x5d   : > { %1121 = vmatpush.bf16.msra.mxu0 %v10424_v54  ;;  %v7573_v54 = vld [vmem:[%s11099_s16 + $0x10] sm:$0xe] }
  0x5e   : > { %1266 = vmatpush.bf16.msra.mxu2 %v10440_v55  ;;  %v10454_v55 = vld [vmem:[%s13192_s1 + $0xc8] sm:$0xff] }
  0x5f   : > { %1327 = vmatpush.bf16.msra.mxu3 %v10432_v61  ;;  %7342 = vmatmul.msk.bf16.vlgmr.msra.gmra.mxu1 %vm1137_vm1, %v1135_v4  ;;  %v1527_v61 = vrot.slane %v1525_v53, 1  ;;  %v1936_v4 = vld [vmem:[%s13195_s4] sm:$0x3] }
  0x60   : > { %1409 = vmatpush.bf16.msrb.mxu1 %v10449_v58  ;;  %v1610_v58 = vunpack.c.l.b16 %v7573_v54  ;;  %v1941_v12 = vsel %vm1141_vm0, %v1936_v4, 0  ;;  %v10493_v53 = vld [vmem:[%s13192_s1 + $0x200] sm:$0xff]  ;;  %v10524_v54 = vld [vmem:[%s13192_s1 + $0xb8] sm:$0xff] }
  0x61   : > { %1122 = vmatpush.bf16.msra.mxu0 %v10423_v62  ;;  %v10453_v62 = vld [vmem:[%s13192_s1 + $0xc0] sm:$0xff] }
  0x62   : > { %1267 = vmatpush.bf16.msra.mxu2 %v10439_v63  ;;  %v10461_v63 = vld [vmem:[%s13192_s1 + $0x100] sm:$0xff]  ;;  %v1611_v5 = vpack.c.b16 %v1520_v43, %v1610_v58  ;;  %v10511_v43 = vld [vmem:[%s13192_s1 + $0x50] sm:$0xff]  ;;  %v10502_v58 = vld [vmem:[%s13192_s1 + $0x8] sm:$0xff] }
  0x63   : > { %1328 = vmatpush.bf16.msra.mxu3 %v10431_v6  ;;  %v10469_v6 = vld [vmem:[%s13192_s1 + $0x140] sm:$0xff] }
  0x64   : > { %1410 = vmatpush.bf16.msrb.mxu1 %v10448_v2  ;;  %v10478_v2 = vld [vmem:[%s13192_s1 + $0x188] sm:$0xff] }
  0x65   : > { %1123 = vmatpush.bf16.msra.mxu0 %v10422_v7  ;;  %v1528_v7 = vor.u32 %v1527_v61, %v1523_v60 }
  0x66   : > { %1268 = vmatpush.bf16.msra.mxu2 %v10438_v8  ;;  %v10491_v8 = vld [vmem:[%s13192_s1 + $0x1f0] sm:$0xff] }
  0x67   : > { %1329 = vmatpush.bf16.msra.mxu3 %v10430_v13  ;;  %v10477_v13 = vld [vmem:[%s13192_s1 + $0x180] sm:$0xff] }
  0x68   : > { %1411 = vmatpush.bf16.msrb.mxu1 %v10447_v11  ;;  %v7474_v11 = vld [vmem:[%s11099_s16 + $0x10] sm:$0xf] }
  0x69   : > { %1124 = vmatpush.bf16.msra.mxu0 %v10421_v14  ;;  %v1612_v14 = vrot.slane %v1611_v5, 1  ;;  %v10540_v5 = vld [vmem:[%s13192_s1 + $0x138] sm:$0xff] }
  0x6a   : > { %1269 = vmatpush.bf16.msra.mxu2 %v10437_v15  ;;  %v10516_v15 = vld [vmem:[%s13192_s1 + $0x78] sm:$0xff] }
  0x6b   : > { %1330 = vmatpush.bf16.msra.mxu3 %v10429_v20  ;;  %v10489_v20 = vld [vmem:[%s13192_s1 + $0x1e0] sm:$0xff] }
  0x6c   : > { %1412 = vmatpush.bf16.msrb.mxu1 %v10446_v18  ;;  %1125 = vmatmul.bf16.vlgmr.msra.gmra.mxu0 %v1067_v19  ;;  %v10507_v18 = vld [vmem:[%s13192_s1 + $0x30] sm:$0xff]  ;;  %v7622_v19 = vld [vmem:[%s11099_s16 + $0x18] sm:$0xf] }
  0x6d   : > { %1485 = vmatpush.bf16.msrb.mxu0 %v10460_v3  ;;  %1270 = vmatmul.bf16.vlgmr.msra.gmra.mxu2 %v1212_v23  ;;  %v10498_v3 = vld [vmem:[%s13192_s1 + $0x228] sm:$0xff]  ;;  %v7672_v23 = vld [vmem:[%s11099_s16 + $0x1c] sm:$0x1] }
  0x6e   : > { %1578 = vmatpush.bf16.msrb.mxu2 %v10468_v9  ;;  %1331 = vmatmul.bf16.vlgmr.msra.gmra.mxu3 %v11317_v56  ;;  %v10462_v56 = vld [vmem:[%s13192_s1 + $0x108] sm:$0xff]  ;;  %v10515_v9 = vld [vmem:[%s13192_s1 + $0x70] sm:$0xff] }
  0x6f   : > { %1662 = vmatpush.bf16.msrb.mxu3 %v10476_v22  ;;  %v7671_v22 = vld [vmem:[%s11099_s16 + $0x18] sm:$0xf] }
  0x70   : > { %1413 = vmatpush.bf16.msrb.mxu1 %v10445_v27  ;;  %v1777_v27 = vunpack.c.l.b16 %v7672_v23  ;;  %v10519_v23 = vld [vmem:[%s13192_s1 + $0x90] sm:$0xff] }
  0x71   : > { %1486 = vmatpush.bf16.msrb.mxu0 %v10459_v25  ;;  %v10506_v25 = vld [vmem:[%s13192_s1 + $0x28] sm:$0xff] }
  0x72   : > { %1579 = vmatpush.bf16.msrb.mxu2 %v10467_v26  ;;  %v1776_v26 = vunpack.c.l.b16 %v7671_v22  ;;  %v7953_v22 = vld [vmem:[%s11099_s16 + $0x18] sm:$0xf] }
  0x73   : > { %1663 = vmatpush.bf16.msrb.mxu3 %v10475_v30  ;;  %1414 = vmatmul.bf16.vlgmr.msrb.gmra.mxu1 %v1356_v33  ;;  %v10513_v30 = vld [vmem:[%s13192_s1 + $0x60] sm:$0xff]  ;;  %v10487_v33 = vld [vmem:[%s13192_s1 + $0x1d0] sm:$0xff] }
  0x74   : > { %1742 = vmatpush.bf16.msra.mxu1 %v10484_v29  ;;  %v10496_v29 = vld [vmem:[%s13192_s1 + $0x218] sm:$0xff] }
  0x75   : > { %1487 = vmatpush.bf16.msrb.mxu0 %v10458_v31  ;;  %v10505_v31 = vld [vmem:[%s13192_s1 + $0x20] sm:$0xff] }
  0x76   : > { %1580 = vmatpush.bf16.msrb.mxu2 %v10466_v32  ;;  %v1778_v32 = vpack.c.b16 %v1777_v27, %v1776_v26  ;;  %v10536_v26 = vld [vmem:[%s13192_s1 + $0x118] sm:$0xff] }
  0x77   : > { %1664 = vmatpush.bf16.msrb.mxu3 %v10474_v36  ;;  %v10512_v36 = vld [vmem:[%s13192_s1 + $0x58] sm:$0xff] }
  0x78   : > { %1743 = vmatpush.bf16.msra.mxu1 %v10483_v34  ;;  %v10495_v34 = vld [vmem:[%s13192_s1 + $0x210] sm:$0xff]  ;;  %v1782_v39 = vshll.u32 %v1778_v32, 16 }
  0x79   : > { %1488 = vmatpush.bf16.msrb.mxu0 %v10457_v35  ;;  %v7721_v35 = vld [vmem:[%s11099_s16 + $0x18] sm:$0xe] }
  0x7a   : > { %1581 = vmatpush.bf16.msrb.mxu2 %v10465_v37  ;;  %v10504_v37 = vld [vmem:[%s13192_s1 + $0x18] sm:$0xff]  ;;  %v1784_v48 = vrot.slane %v1782_v39, 1 }
  0x7b   : > { %1665 = vmatpush.bf16.msrb.mxu3 %v10473_v41  ;;  %v10486_v41 = vld [vmem:[%s13192_s1 + $0x1c8] sm:$0xff] }
  0x7c   : > { %1744 = vmatpush.bf16.msra.mxu1 %v10482_v40  ;;  %v1867_v40 = vunpack.c.l.b16 %v7721_v35 }
  0x7d   : > { %1489 = vmatpush.bf16.msrb.mxu0 %v10456_v44  ;;  %v1780_v44 = vshrl.u32 %v1778_v32, 16  ;;  %v10518_v32 = vld [vmem:[%s13192_s1 + $0x88] sm:$0xff] }
  0x7e   : > { %1582 = vmatpush.bf16.msrb.mxu2 %v10464_v45  ;;  %v10503_v45 = vld [vmem:[%s13192_s1 + $0x10] sm:$0xff] }
  0x7f   : > { %1666 = vmatpush.bf16.msrb.mxu3 %v10472_v47  ;;  %v11570_v47 = vld [vmem:[%s11099_s16 + $0x14] sm:$0x1] }
  0x80   : > { %1745 = vmatpush.bf16.msra.mxu1 %v10481_v46  ;;  %v7773_v46 = vld [vmem:[%s11099_s16 + $0x10] sm:$0xf] }
  0x81   : > { %1490 = vmatpush.bf16.msrb.mxu0 %v10455_v49  ;;  %v1868_v49 = vpack.c.b16 %v1777_v27, %v1867_v40 }
  0x82   : > { %1583 = vmatpush.bf16.msrb.mxu2 %v10463_v50  ;;  %v2002_v50 = vunpack.c.l.b16 %v7773_v46 }
  0x83   : > { %1667 = vmatpush.bf16.msrb.mxu3 %v10471_v52  ;;  %v10485_v52 = vld [vmem:[%s13192_s1 + $0x1c0] sm:$0xff]  ;;  %v1869_v60 = vrot.slane %v1868_v49, 1 }
  0x84   : > { %1746 = vmatpush.bf16.msra.mxu1 %v10480_v51  ;;  %v2003_v51 = vunpack.c.l.b16 %v11570_v47 }
  0x85   : > { %1491 = vmatpush.bf16.msrb.mxu0 %v10454_v55  ;;  %v10532_v55 = vld [vmem:[%s13192_s1 + $0xf8] sm:$0xff] }
  0x86   : > { %1584 = vmatpush.bf16.msrb.mxu2 %v10462_v56  ;;  %v2004_v56 = vpack.c.b16 %v2003_v51, %v2002_v50 }
  0x87   : > { %1668 = vmatpush.bf16.msrb.mxu3 %v10470_v59  ;;  %v1785_v59 = vor.u32 %v1784_v48, %v1780_v44  ;;  %v10556_v44 = vld [vmem:[%s13192_s1 + $0x1b8] sm:$0xff]  ;;  %v10542_v48 = vld [vmem:[%s13192_s1 + $0x148] sm:$0xff] }
  0x88   : > { %1747 = vmatpush.bf16.msra.mxu1 %v10479_v57  ;;  %v10510_v57 = vld [vmem:[%s13192_s1 + $0x48] sm:$0xff]  ;;  %v2008_v61 = vshll.u32 %v2004_v56, 16 }
  0x89   : > { %1492 = vmatpush.bf16.msrb.mxu0 %v10453_v62  ;;  %v10523_v62 = vld [vmem:[%s13192_s1 + $0xb0] sm:$0xff] }
  0x8a   : > { %1585 = vmatpush.bf16.msrb.mxu2 %v10461_v63  ;;  %v10531_v63 = vld [vmem:[%s13192_s1 + $0xf0] sm:$0xff]  ;;  %v2010_v4 = vrot.slane %v2008_v61, 1 }
  0x8b   : > { %1669 = vmatpush.bf16.msrb.mxu3 %v10469_v6  ;;  %v10548_v6 = vld [vmem:[%s13192_s1 + $0x178] sm:$0xff] }
  0x8c   : > { %1748 = vmatpush.bf16.msra.mxu1 %v10478_v2  ;;  %1493 = vmatmul.bf16.vlgmr.msrb.gmra.mxu0 %v7474_v11  ;;  %v2006_v2 = vshrl.u32 %v2004_v56, 16  ;;  %v10539_v11 = vld [vmem:[%s13192_s1 + $0x130] sm:$0xff]  ;;  %v2735_v56 = vld [vmem:[%s13195_s4] sm:$0x3] }
  0x8d   : > { %1835 = vmatpush.bf16.msra.mxu0 %v10492_v0  ;;  %1586 = vmatmul.bf16.vlgmr.msrb.gmra.mxu2 %v1528_v7  ;;  %v10509_v0 = vld [vmem:[%s13192_s1 + $0x40] sm:$0xff]  ;;  %v10522_v7 = vld [vmem:[%s13192_s1 + $0xa8] sm:$0xff] }
  0x8e   : > { %1919 = vmatpush.bf16.msra.mxu2 %v10500_v1  ;;  %1670 = vmatmul.bf16.vlgmr.msrb.gmra.mxu3 %v1612_v14  ;;  %v10501_v1 = vld [vmem:[%s13192_s1] sm:$0xff] }
  0x8f   : > { %1950 = vmatpush.bf16.msra.mxu3 %v1941_v12  ;;  %v10547_v12 = vld [vmem:[%s13192_s1 + $0x170] sm:$0xff]  ;;  %v10529_v14 = vld [vmem:[%s13192_s1 + $0xe0] sm:$0xff] }
  0x90   : > { %1749 = vmatpush.bf16.msra.mxu1 %v10477_v13  ;;  %v10521_v13 = vld [vmem:[%s13192_s1 + $0xa0] sm:$0xff] }
  0x91   : > { %1836 = vmatpush.bf16.msra.mxu0 %v10491_v8  ;;  %v10530_v8 = vld [vmem:[%s13192_s1 + $0xe8] sm:$0xff] }
  0x92   : > { %1920 = vmatpush.bf16.msra.mxu2 %v10499_v10  ;;  %v2011_v10 = vor.u32 %v2010_v4, %v2006_v2 }
  0x93   : > { %2122 = vmatpush.bf16.msrb.mxu3 %v10508_v16  ;;  %1750 = vmatmul.bf16.vlgmr.msra.gmra.mxu1 %v7622_v19  ;;  %v10546_v16 = vld [vmem:[%s13192_s1 + $0x168] sm:$0xff]  ;;  %v10545_v19 = vld [vmem:[%s13192_s1 + $0x160] sm:$0xff] }
  0x94   : > { %2061 = vmatpush.bf16.msrb.mxu1 %v10516_v15  ;;  %v10538_v15 = vld [vmem:[%s13192_s1 + $0x128] sm:$0xff] }
  0x95   : > { %1837 = vmatpush.bf16.msra.mxu0 %v10490_v17  ;;  %v10520_v17 = vld [vmem:[%s13192_s1 + $0x98] sm:$0xff] }
  0x96   : > { %1921 = vmatpush.bf16.msra.mxu2 %v10498_v3  ;;  %v10528_v3 = vld [vmem:[%s13192_s1 + $0xd8] sm:$0xff] }
  0x97   : > { %2123 = vmatpush.bf16.msrb.mxu3 %v10507_v18  ;;  %v10537_v18 = vld [vmem:[%s13192_s1 + $0x120] sm:$0xff] }
  0x98   : > { %2062 = vmatpush.bf16.msrb.mxu1 %v10515_v9 }
  0x99   : > { %1838 = vmatpush.bf16.msra.mxu0 %v10489_v20 }
  0x9a   : > { %1922 = vmatpush.bf16.msra.mxu2 %v10497_v21  ;;  %v7954_v21 = vld [vmem:[%s11099_s16 + $0x1c] sm:$0x1] }
  0x9b   : > { %2124 = vmatpush.bf16.msrb.mxu3 %v10506_v25  ;;  %v7855_v25 = vld [vmem:[%s11099_s16 + $0x10] sm:$0xe] }
  0x9c   : > { %2063 = vmatpush.bf16.msrb.mxu1 %v10514_v24  ;;  %v10527_v24 = vld [vmem:[%s13192_s1 + $0xd0] sm:$0xff] }
  0x9d   : > { %1839 = vmatpush.bf16.msra.mxu0 %v10488_v28  ;;  %v10544_v28 = vld [vmem:[%s13192_s1 + $0x158] sm:$0xff] }
  0x9e   : > { %1923 = vmatpush.bf16.msra.mxu2 %v10496_v29  ;;  %7771 = vmatmul.msk.bf16.vlgmr.msra.gmra.mxu3 %vm1137_vm1, %v7770_v38  ;;  %v2319_v29 = vunpack.c.l.b16 %v7954_v21  ;;  %v10594_v21 = vld [vmem:[%s13192_s1 + $0xa8] sm:$0xff] }
  0x9f   : > { %2125 = vmatpush.bf16.msrb.mxu3 %v10505_v31  ;;  %v2153_v31 = vunpack.c.l.b16 %v7855_v25  ;;  %v10559_v25 = vld [vmem:[%s13192_s1 + $0x1d0] sm:$0xff] }
  0xa0   : > { %2064 = vmatpush.bf16.msrb.mxu1 %v10513_v30  ;;  %v2318_v30 = vunpack.c.l.b16 %v7953_v22 }
  0xa1   : > { %1840 = vmatpush.bf16.msra.mxu0 %v10487_v33  ;;  %v10526_v33 = vld [vmem:[%s13192_s1 + $0xc8] sm:$0xff]  ;;  %v2154_v40 = vpack.c.b16 %v2003_v51, %v2153_v31 }
  0xa2   : > { %1924 = vmatpush.bf16.msra.mxu2 %v10495_v34  ;;  %v2320_v39 = vpack.c.b16 %v2319_v29, %v2318_v30 }
  0xa3   : > { %2126 = vmatpush.bf16.msrb.mxu3 %v10504_v37  ;;  %v10543_v37 = vld [vmem:[%s13192_s1 + $0x150] sm:$0xff]  ;;  %v2155_v51 = vrot.slane %v2154_v40, 1 }
  0xa4   : > { %2065 = vmatpush.bf16.msrb.mxu1 %v10512_v36  ;;  %v10535_v36 = vld [vmem:[%s13192_s1 + $0x110] sm:$0xff]  ;;  %v2324_v50 = vshll.u32 %v2320_v39, 16 }
  0xa5   : > { %1841 = vmatpush.bf16.msra.mxu0 %v10486_v41  ;;  %v8003_v41 = vld [vmem:[%s11099_s16 + $0x18] sm:$0xe] }
  0xa6   : > { %1925 = vmatpush.bf16.msra.mxu2 %v10494_v42  ;;  %v10517_v42 = vld [vmem:[%s13192_s1 + $0x80] sm:$0xff]  ;;  %v2409_v49 = vunpack.c.l.b16 %v8003_v41  ;;  %v2326_v61 = vrot.slane %v2324_v50, 1 }
  0xa7   : > { %2127 = vmatpush.bf16.msrb.mxu3 %v10503_v45  ;;  %v10564_v45 = vld [vmem:[%s13192_s1 + $0x1f8] sm:$0xff]  ;;  %v8151_v41 = vld [vmem:[%s11099_s16 + $0x20] sm:$0xe] }
  0xa8   : > { %2066 = vmatpush.bf16.msrb.mxu1 %v10511_v43  ;;  %v10525_v43 = vld [vmem:[%s13192_s1 + $0xc0] sm:$0xff] }
  0xa9   : > { %1842 = vmatpush.bf16.msra.mxu0 %v10485_v52  ;;  %v11641_v9 = vpop.f32.mrf.mxu0 }
  0xaa   : > { %1926 = vmatpush.bf16.msra.mxu2 %v10493_v53  ;;  %v7904_v53 = vld [vmem:[%s11099_s16 + $0x18] sm:$0xf] }
  0xab   : > { %2128 = vmatpush.bf16.msrb.mxu3 %v10502_v58  ;;  %v10541_v58 = vld [vmem:[%s13192_s1 + $0x140] sm:$0xff] }
  0xac   : > { %2067 = vmatpush.bf16.msrb.mxu1 %v10510_v57  ;;  %1843 = vmatmul.bf16.vlgmr.msra.gmra.mxu0 %v1785_v59  ;;  %v11649_v20 = vpop.f32.mrf.mxu1  ;;  %v10533_v57 = vld [vmem:[%s13192_s1 + $0x100] sm:$0xff]  ;;  %v2410_v59 = vpack.c.b16 %v2319_v29, %v2409_v49 }
  0xad   : > { %2205 = vmatpush.bf16.msrb.mxu0 %v10524_v54  ;;  %1927 = vmatmul.bf16.vlgmr.msra.gmra.mxu2 %v1869_v60  ;;  %v10555_v54 = vld [vmem:[%s13192_s1 + $0x1b0] sm:$0xff]  ;;  %v2322_v60 = vshrl.u32 %v2320_v39, 16  ;;  %v523_v22 = vadd.f32 %v11649_v20, %v11641_v9  ;;  %v10568_v9 = vld [vmem:[%s13192_s1 + $0x218] sm:$0xff]  ;;  %v10593_v20 = vld [vmem:[%s13192_s1 + $0xa0] sm:$0xff] }
  0xae   : > { %2284 = vmatpush.bf16.msrb.mxu2 %v10532_v55  ;;  %v10563_v55 = vld [vmem:[%s13192_s1 + $0x1f0] sm:$0xff]  ;;  %v2411_v2 = vrot.slane %v2410_v59, 1 }
  0xaf   : > { %2129 = vmatpush.bf16.msrb.mxu3 %v10501_v1  ;;  %v10562_v1 = vld [vmem:[%s13192_s1 + $0x1e8] sm:$0xff]  ;;  %v2327_v4 = vor.u32 %v2326_v61, %v2322_v60  ;;  %v10604_v60 = vld [vmem:[%s13192_s1 + $0xf8] sm:$0xff] }
  0xb0   : > { %2068 = vmatpush.bf16.msrb.mxu1 %v10509_v0  ;;  %v11663_v27 = vpop.f32.mrf.mxu2  ;;  %v10554_v0 = vld [vmem:[%s13192_s1 + $0x1a8] sm:$0xff] }
  0xb1   : > { %2206 = vmatpush.bf16.msrb.mxu0 %v10523_v62  ;;  %v11674_v34 = vpop.f32.mrf.mxu3  ;;  %v463_v35 = vpop.f32.mrf.mxu0  ;;  %v10572_v62 = vld [vmem:[%s13192_s1 + $0x238] sm:$0xff]  ;;  %v10586_v61 = vld [vmem:[%s13192_s1 + $0x68] sm:$0xff] }
  0xb2   : > { %2285 = vmatpush.bf16.msrb.mxu2 %v10531_v63  ;;  %2130 = vmatmul.bf16.vlgmr.msrb.gmra.mxu3 %v7773_v46  ;;  %v10534_v46 = vld [vmem:[%s13192_s1 + $0x108] sm:$0xff]  ;;  %v2740_v63 = vsel %vm1141_vm0, %v2735_v56, 0 }
  0xb3   : > { %2461 = vmatpush.bf16.msra.mxu3 %v10548_v6  ;;  %2069 = vmatmul.bf16.vlgmr.msrb.gmra.mxu1 %v2011_v10  ;;  %v10596_v6 = vld [vmem:[%s13192_s1 + $0xb8] sm:$0xff]  ;;  %v8101_v10 = vld [vmem:[%s11099_s16 + $0x20] sm:$0xf] }
  0xb4   : > { %2377 = vmatpush.bf16.msra.mxu1 %v10540_v5  ;;  %v524_v38 = vpop.f32.mrf.mxu1  ;;  %v10571_v5 = vld [vmem:[%s13192_s1 + $0x230] sm:$0xff] }
  0xb5   : > { %2207 = vmatpush.bf16.msrb.mxu0 %v10522_v7  ;;  %v10553_v7 = vld [vmem:[%s13192_s1 + $0x1a0] sm:$0xff] }
  0xb6   : > { %2286 = vmatpush.bf16.msrb.mxu2 %v10530_v8  ;;  %v10561_v8 = vld [vmem:[%s13192_s1 + $0x1e0] sm:$0xff] }
  0xb7   : > { %2462 = vmatpush.bf16.msra.mxu3 %v10547_v12  ;;  %v10570_v12 = vld [vmem:[%s13192_s1 + $0x228] sm:$0xff] }
  0xb8   : > { %2378 = vmatpush.bf16.msra.mxu1 %v10539_v11  ;;  %v608_v47 = vpop.f32.mrf.mxu2  ;;  %v11743_v11 = vld [vmem:[%s11099_s16 + $0x24] sm:$0x1] }
  0xb9   : > { %2208 = vmatpush.bf16.msrb.mxu0 %v10521_v13  ;;  %v689_v52 = vpop.f32.mrf.mxu3  ;;  %v10595_v13 = vld [vmem:[%s13192_s1 + $0xb0] sm:$0xff]  ;;  %v2666_v47 = vunpack.c.l.b16 %v8151_v41  ;;  %v10574_v41 = vld [vmem:[%s13192_s1 + $0x8] sm:$0xff] }
  0xba   : > { %2287 = vmatpush.bf16.msrb.mxu2 %v10529_v14 }
  0xbb   : > { %2463 = vmatpush.bf16.msra.mxu3 %v10546_v16  ;;  %v2576_v16 = vunpack.c.l.b16 %v11743_v11 }
  0xbc   : > { %2379 = vmatpush.bf16.msra.mxu1 %v10538_v15  ;;  %v2575_v15 = vunpack.c.l.b16 %v8101_v10  ;;  %v11862_v10 = vld [vmem:[%s11099_s16 + $0x18] sm:$0xf] }
  0xbd   : > { %2209 = vmatpush.bf16.msrb.mxu0 %v10520_v17  ;;  %v10552_v17 = vld [vmem:[%s13192_s1 + $0x198] sm:$0xff]  ;;  %v2667_v56 = vpack.c.b16 %v2576_v16, %v2666_v47  ;;  %v10581_v47 = vld [vmem:[%s13192_s1 + $0x40] sm:$0xff] }
  0xbe   : > { %2288 = vmatpush.bf16.msrb.mxu2 %v10528_v3  ;;  %v10560_v3 = vld [vmem:[%s13192_s1 + $0x1d8] sm:$0xff] }
  0xbf   : > { %2464 = vmatpush.bf16.msra.mxu3 %v10545_v19  ;;  %v10569_v19 = vld [vmem:[%s13192_s1 + $0x220] sm:$0xff] }
  0xc0   : > { %2380 = vmatpush.bf16.msra.mxu1 %v10537_v18 }
  0xc1   : > { %2210 = vmatpush.bf16.msrb.mxu0 %v10519_v23  ;;  %v2577_v23 = vpack.c.b16 %v2576_v16, %v2575_v15  ;;  %v11868_v15 = vld [vmem:[%s13193_s2] ss:$0 sm:$0xff]  ;;  %v10602_v16 = vld [vmem:[%s13192_s1 + $0xe8] sm:$0xff] }
  0xc2   : > { %2289 = vmatpush.bf16.msrb.mxu2 %v10527_v24  ;;  %v10551_v24 = vld [vmem:[%s13192_s1 + $0x190] sm:$0xff] }
  0xc3   : > { %2465 = vmatpush.bf16.msra.mxu3 %v10544_v28  ;;  %v610_v28 = vadd.f32 %v11663_v27, %v523_v22  ;;  %v2581_v29 = vshll.u32 %v2577_v23, 16  ;;  %v10567_v27 = vld [vmem:[%s13192_s1 + $0x210] sm:$0xff]  ;;  %v2579_v39 = vshrl.u32 %v2577_v23, 16  ;;  %v10584_v22 = vld [vmem:[%s13192_s1 + $0x58] sm:$0xff] }
  0xc4   : > { %2381 = vmatpush.bf16.msra.mxu1 %v10536_v26  ;;  %v10576_v23 = vld [vmem:[%s13192_s1 + $0x18] sm:$0xff] }
  0xc5   : > { %2211 = vmatpush.bf16.msrb.mxu0 %v10518_v32  ;;  %v10550_v32 = vld [vmem:[%s13192_s1 + $0x188] sm:$0xff]  ;;  %v691_v38 = vadd.f32 %v11674_v34, %v610_v28  ;;  %v2583_v40 = vrot.slane %v2581_v29, 1  ;;  %v10580_v34 = vld [vmem:[%s13192_s1 + $0x38] sm:$0xff] }
  0xc6   : > { %2290 = vmatpush.bf16.msrb.mxu2 %v10526_v33  ;;  %v10558_v33 = vld [vmem:[%s13192_s1 + $0x1c8] sm:$0xff] }
  0xc7   : > { %2466 = vmatpush.bf16.msra.mxu3 %v10543_v37  ;;  %v8200_v37 = vld [vmem:[%s11332_s27 + $0x8] sm:$0xf]  ;;  %v2584_v50 = vor.u32 %v2583_v40, %v2579_v39 }
  0xc8   : > { %2382 = vmatpush.bf16.msra.mxu1 %v10535_v36  ;;  %v10592_v36 = vld [vmem:[%s13192_s1 + $0x98] sm:$0xff]  ;;  %v10582_v40 = vld [vmem:[%s13192_s1 + $0x48] sm:$0xff] }
  0xc9   : > { %2212 = vmatpush.bf16.msrb.mxu0 %v10517_v42  ;;  %v781_v14 = vpop.f32.mrf.mxu0  ;;  %v10549_v42 = vld [vmem:[%s13192_s1 + $0x180] sm:$0xff] }
  0xca   : > { %2291 = vmatpush.bf16.msrb.mxu2 %v10525_v43  ;;  %v10557_v43 = vld [vmem:[%s13192_s1 + $0x1c0] sm:$0xff]  ;;  %v785_v49 = vadd.f32 %v781_v14, %v691_v38 }
  0xcb   : > { %2467 = vmatpush.bf16.msra.mxu3 %v10542_v48  ;;  %v10591_v48 = vld [vmem:[%s13192_s1 + $0x90] sm:$0xff] }
  0xcc   : > { %2383 = vmatpush.bf16.msra.mxu1 %v10534_v46  ;;  %2213 = vmatmul.bf16.vlgmr.msrb.gmra.mxu0 %v2155_v51  ;;  %v866_v18 = vpop.f32.mrf.mxu1  ;;  %v10566_v46 = vld [vmem:[%s13192_s1 + $0x208] sm:$0xff]  ;;  %v8052_v51 = vld [vmem:[%s11099_s16 + $0x20] sm:$0xf] }
  0xcd   : > { %2541 = vmatpush.bf16.msra.mxu0 %v10556_v44  ;;  %2292 = vmatmul.bf16.vlgmr.msrb.gmra.mxu2 %v7904_v53  ;;  %v10588_v44 = vld [vmem:[%s13192_s1 + $0x78] sm:$0xff]  ;;  %v10587_v53 = vld [vmem:[%s13192_s1 + $0x70] sm:$0xff]  ;;  %v870_v59 = vadd.f32 %v866_v18, %v785_v49 }
  0xce   : > { %2634 = vmatpush.bf16.msra.mxu2 %v10564_v45  ;;  %v10612_v49 = vld [vmem:[%s13192_s1 + $0x138] sm:$0xff] }
  0xcf   : > { %2468 = vmatpush.bf16.msra.mxu3 %v10541_v58 }
  0xd0   : > { %2384 = vmatpush.bf16.msra.mxu1 %v10533_v57  ;;  %v11774_v26 = vpop.f32.mrf.mxu2  ;;  %v10590_v57 = vld [vmem:[%s13192_s1 + $0x88] sm:$0xff] }
  0xd1   : > { %2542 = vmatpush.bf16.msra.mxu0 %v10555_v54  ;;  %v783_v30 = vpop.f32.mrf.mxu0  ;;  %v11783_v31 = vpop.f32.mrf.mxu3  ;;  %v10579_v54 = vld [vmem:[%s13192_s1 + $0x30] sm:$0xff] }
  0xd2   : > { %2635 = vmatpush.bf16.msra.mxu2 %v10563_v55  ;;  %2469 = vmatmul.bf16.vlgmr.msra.gmra.mxu3 %v2411_v2  ;;  %v10565_v55 = vld [vmem:[%s13192_s1 + $0x200] sm:$0xff]  ;;  %v10603_v2 = vld [vmem:[%s13192_s1 + $0xf0] sm:$0xff] }
  0xd3   : > { %2749 = vmatpush.bf16.msrb.mxu3 %v2740_v63  ;;  %2385 = vmatmul.bf16.vlgmr.msra.gmra.mxu1 %v2327_v4  ;;  %v2668_v63 = vrot.slane %v2667_v56, 1  ;;  %v10628_v4 = vld [vmem:[%s13192_s1 + $0x1b8] sm:$0xff]  ;;  %v10583_v30 = vld [vmem:[%s13192_s1 + $0x50] sm:$0xff] }
  0xd4   : > { %2718 = vmatpush.bf16.msrb.mxu1 %v10572_v62  ;;  %v868_v35 = vpop.f32.mrf.mxu1  ;;  %v10578_v62 = vld [vmem:[%s13192_s1 + $0x28] sm:$0xff] }
  0xd5   : > { %2543 = vmatpush.bf16.msra.mxu0 %v10554_v0  ;;  %v10589_v0 = vld [vmem:[%s13192_s1 + $0x80] sm:$0xff] }
  0xd6   : > { %2636 = vmatpush.bf16.msra.mxu2 %v10562_v1  ;;  %v951_v1 = vadd.f32 %v11774_v26, %v870_v59  ;;  %v10959_v26 = vld [vmem:[%s13196_s5] ss:$0 sm:$0xff] }
  0xd7   : > { %3004 = vmatpush.bf16.msra.mxu3 %v10596_v6  ;;  %v8285_v6 = vld [vmem:[%s11099_s16 + $0x18] sm:$0xe]  ;;  %v10597_v59 = vld [vmem:[%s13192_s1 + $0xc0] sm:$0xff] }
  0xd8   : > { %2719 = vmatpush.bf16.msrb.mxu1 %v10571_v5  ;;  %v949_v45 = vpop.f32.mrf.mxu2  ;;  %v8204_v5 = vld [vmem:[%s11099_s16 + $0x1c] sm:$0x1]  ;;  %v1045_v14 = vadd.f32 %v11783_v31, %v951_v1  ;;  %v10575_v31 = vld [vmem:[%s13192_s1 + $0x10] sm:$0xff] }
  0xd9   : > { %2544 = vmatpush.bf16.msra.mxu0 %v10553_v7  ;;  %v1043_v52 = vpop.f32.mrf.mxu3  ;;  %v10585_v7 = vld [vmem:[%s13192_s1 + $0x60] sm:$0xff]  ;;  %v2802_v11 = vunpack.c.l.b16 %v8204_v5  ;;  %v10635_v1 = vld [vmem:[%s13192_s1 + $0x1f0] sm:$0xff] }
  0xda   : > { %2637 = vmatpush.bf16.msra.mxu2 %v10561_v8  ;;  %v10577_v8 = vld [vmem:[%s13192_s1 + $0x20] sm:$0xff]  ;;  %v10623_v52 = vld [vmem:[%s13192_s1 + $0x190] sm:$0xff] }
  0xdb   : > { %3005 = vmatpush.bf16.msra.mxu3 %v10595_v13  ;;  %v10609_v5 = vld [vmem:[%s13192_s1 + $0x120] sm:$0xff] }
  0xdc   : > { %2720 = vmatpush.bf16.msrb.mxu1 %v10570_v12  ;;  %v1154_v58 = vpop.f32.mrf.mxu1  ;;  %v2952_v12 = vunpack.c.l.b16 %v8285_v6  ;;  %v10617_v6 = vld [vmem:[%s13192_s1 + $0x160] sm:$0xff] }
  0xdd   : > { %2545 = vmatpush.bf16.msra.mxu0 %v10552_v17  ;;  %v10627_v17 = vld [vmem:[%s13192_s1 + $0x1b0] sm:$0xff] }
  0xde   : > { %2638 = vmatpush.bf16.msra.mxu2 %v10560_v3  ;;  %v2953_v3 = vpack.c.b16 %v2802_v11, %v2952_v12  ;;  %v8482_v12 = vld [vmem:[%s11099_s16 + $0x28] sm:$0xf] }
  0xdf   : > { %3006 = vmatpush.bf16.msra.mxu3 %v10594_v21 }
  0xe0   : > { %2721 = vmatpush.bf16.msrb.mxu1 %v10569_v19  ;;  %v2801_v19 = vunpack.c.l.b16 %v11862_v10 }
  0xe1   : > { %2546 = vmatpush.bf16.msra.mxu0 %v10551_v24  ;;  %v2954_v24 = vrot.slane %v2953_v3, 1 }
  0xe2   : > { %2639 = vmatpush.bf16.msra.mxu2 %v10559_v25  ;;  %8201 = vmatmul.msk.bf16.vlgmr.msrb.gmra.mxu3 %vm1137_vm1, %v8200_v37  ;;  %v2803_v28 = vpack.c.b16 %v2802_v11, %v2801_v19  ;;  %v10659_v11 = vld [vmem:[%s13192_s1 + $0x70] sm:$0xff]  ;;  %v10658_v19 = vld [vmem:[%s13192_s1 + $0x68] sm:$0xff] }
  0xe3   : > { %3007 = vmatpush.bf16.msra.mxu3 %v10593_v20  ;;  %v10626_v20 = vld [vmem:[%s13192_s1 + $0x1a8] sm:$0xff] }
  0xe4   : > { %2722 = vmatpush.bf16.msrb.mxu1 %v10568_v9  ;;  %v1156_v13 = vpop.f32.mrf.mxu1  ;;  %v10601_v9 = vld [vmem:[%s13192_s1 + $0xe0] sm:$0xff]  ;;  %v2807_v38 = vshll.u32 %v2803_v28, 16  ;;  %v2805_v45 = vshrl.u32 %v2803_v28, 16 }
  0xe5   : > { %2547 = vmatpush.bf16.msra.mxu0 %v10550_v32 }
  0xe6   : > { %2640 = vmatpush.bf16.msra.mxu2 %v10558_v33  ;;  %v10600_v33 = vld [vmem:[%s13192_s1 + $0xd8] sm:$0xff] }
  0xe7   : > { %3008 = vmatpush.bf16.msra.mxu3 %v10592_v36 }
  0xe8   : > { %2723 = vmatpush.bf16.msrb.mxu1 %v10567_v27  ;;  %v10625_v27 = vld [vmem:[%s13192_s1 + $0x1a0] sm:$0xff] }
  0xe9   : > { %2548 = vmatpush.bf16.msra.mxu0 %v10549_v42  ;;  %v1126_v18 = vpop.f32.mrf.mxu0 }
  0xea   : > { %2641 = vmatpush.bf16.msra.mxu2 %v10557_v43  ;;  %v1130_v21 = vadd.f32 %v1126_v18, %v1045_v14  ;;  %v10633_v18 = vld [vmem:[%s13192_s1 + $0x1e0] sm:$0xff] }
  0xeb   : > { %3009 = vmatpush.bf16.msra.mxu3 %v10591_v48  ;;  %v10573_v48 = vld [vmem:[%s13192_s1] sm:$0xff] }
  0xec   : > { %2724 = vmatpush.bf16.msrb.mxu1 %v10566_v46  ;;  %2549 = vmatmul.bf16.vlgmr.msra.gmra.mxu0 %v8052_v51  ;;  %v1134_v25 = vadd.f32 %v11868_v15, %v1130_v21  ;;  %v2809_v46 = vrot.slane %v2807_v38, 1  ;;  %v10598_v51 = vld [vmem:[%s13192_s1 + $0xc8] sm:$0xff] }
  0xed   : > { %2860 = vmatpush.bf16.msrb.mxu0 %v10588_v44  ;;  %2642 = vmatmul.bf16.vlgmr.msra.gmra.mxu2 %v2584_v50  ;;  %v10599_v44 = vld [vmem:[%s13192_s1 + $0xd0] sm:$0xff]  ;;  %v10620_v50 = vld [vmem:[%s13192_s1 + $0x178] sm:$0xff]  ;;  %v8531_v21 = vld [vmem:[%s11099_s16 + $0x28] sm:$0xf] }
  0xee   : > { %2921 = vmatpush.bf16.msrb.mxu2 %v10580_v34  ;;  %v1158_v29 = vadd.f32 %v1154_v58, %v1134_v25  ;;  %v10624_v34 = vld [vmem:[%s13192_s1 + $0x198] sm:$0xff]  ;;  %v10619_v58 = vld [vmem:[%s13192_s1 + $0x170] sm:$0xff] }
  0xef   : > { %3010 = vmatpush.bf16.msra.mxu3 %v10590_v57  ;;  %v10611_v57 = vld [vmem:[%s13192_s1 + $0x130] sm:$0xff] }
  0xf0   : > { %2725 = vmatpush.bf16.msrb.mxu1 %v10565_v55  ;;  %v1163_v32 = vadd.f32 %v10959_v26, %v1158_v29  ;;  %v11905_v35 = vpop.f32.mrf.mxu2  ;;  %v11907_v36 = vpop.f32.mrf.mxu1  ;;  %v2810_v55 = vor.u32 %v2809_v46, %v2805_v45  ;;  %v10615_v25 = vld [vmem:[%s13192_s1 + $0x150] sm:$0xff]  ;;  %v8433_v26 = vld [vmem:[%s11099_s16 + $0x20] sm:$0xe]  ;;  %v10632_v29 = vld [vmem:[%s13192_s1 + $0x1d8] sm:$0xff] }
  0xf1   : > { %2861 = vmatpush.bf16.msrb.mxu0 %v10587_v53  ;;  %v1128_v37 = vpop.f32.mrf.mxu0  ;;  %v11915_v42 = vpop.f32.mrf.mxu3  ;;  %v3534_v45 = vld [vmem:[%s13195_s4] sm:$0x3] }
  0xf2   : > { %2922 = vmatpush.bf16.msrb.mxu2 %v10579_v54  ;;  %v1164_v39 = vmax.f32 %v1163_v32, 0.0  ;;  %v3208_v32 = vunpack.c.l.b16 %v8433_v26  ;;  %v10614_v37 = vld [vmem:[%s13192_s1 + $0x148] sm:$0xff] }
  0xf3   : > { %2726 = vmatmul.bf16.vlgmr.msrb.gmra.mxu1 %v2668_v63  ;;  %3011 = vmatpush.bf16.msra.mxu3 %v10589_v0  ;;  %v10618_v63 = vld [vmem:[%s13192_s1 + $0x168] sm:$0xff]  ;;  %v10621_v0 = vld [vmem:[%s13192_s1 + $0x180] sm:$0xff] }
  0xf4   : > { %3083 = vmatpush.bf16.msra.mxu1 %v10604_v60  ;;  %v1165_v43 = vpack.c.bf16 %v1164_v39, %v1164_v39  ;;  %v10622_v60 = vld [vmem:[%s13192_s1 + $0x188] sm:$0xff] }
  0xf5   : > { %2862 = vmatpush.bf16.msrb.mxu0 %v10586_v61  ;;  %v10636_v61 = vld [vmem:[%s13192_s1 + $0x1f8] sm:$0xff] }
  0xf6   : > { %2923 = vmatpush.bf16.msrb.mxu2 %v10578_v62  ;;  %3012 = vmatmul.bf16.vlgmr.msra.gmra.mxu3 %v2954_v24  ;;  %1166 = vst [vmem:[%s11922_s25] sm:$0xf] %v1165_v43  ;;  %v10610_v62 = vld [vmem:[%s13192_s1 + $0x128] sm:$0xff]  ;;  %v10607_v24 = vld [vmem:[%s13192_s1 + $0x110] sm:$0xff]  ;;  %v10656_v43 = vld [vmem:[%s13192_s1 + $0x58] sm:$0xff] }
  0xf7   : > { %3340 = vmatpush.bf16.msrb.mxu3 %v10628_v4  ;;  %v8334_v4 = vld [vmem:[%s11099_s16 + $0x20] sm:$0xf] }
  0xf8   : > { %3084 = vmatpush.bf16.msra.mxu1 %v10603_v2  ;;  %v1273_v53 = vpop.f32.mrf.mxu2  ;;  %v1417_v54 = vpop.f32.mrf.mxu1  ;;  %v10660_v2 = vld [vmem:[%s13192_s1 + $0x78] sm:$0xff] }
  0xf9   : > { %2863 = vmatpush.bf16.msrb.mxu0 %v10585_v7  ;;  %v1334_v56 = vpop.f32.mrf.mxu3  ;;  %v8384_v7 = vld [vmem:[%s11099_s16 + $0x24] sm:$0x1]  ;;  %v10655_v53 = vld [vmem:[%s13192_s1 + $0x50] sm:$0xff] }
  0xfa   : > { %2924 = vmatpush.bf16.msrb.mxu2 %v10577_v8  ;;  %v8383_v8 = vld [vmem:[%s11099_s16 + $0x20] sm:$0xf]  ;;  %v3118_v13 = vunpack.c.l.b16 %v8384_v7 }
  0xfb   : > { %3341 = vmatpush.bf16.msrb.mxu3 %v10627_v17  ;;  %v3117_v14 = vunpack.c.l.b16 %v8383_v8  ;;  %v10616_v17 = vld [vmem:[%s13192_s1 + $0x158] sm:$0xff]  ;;  %v12096_v7 = vld [vmem:[%s11099_s16 + $0x20] sm:$0xf] }
  0xfc   : > { %3085 = vmatpush.bf16.msra.mxu1 %v10602_v16  ;;  %v10608_v16 = vld [vmem:[%s13192_s1 + $0x118] sm:$0xff] }
  0xfd   : > { %2864 = vmatpush.bf16.msrb.mxu0 %v10584_v22  ;;  %v12012_v22 = vld [vmem:[%s11099_s16 + $0x2c] sm:$0x1] }
  0xfe   : > { %2925 = vmatpush.bf16.msrb.mxu2 %v10576_v23  ;;  %v3119_v23 = vpack.c.b16 %v3118_v13, %v3117_v14  ;;  %v3375_v28 = vunpack.c.l.b16 %v12012_v22  ;;  %v10666_v14 = vld [vmem:[%s13192_s1 + $0xa8] sm:$0xff] }
  0xff   : > { %3342 = vmatpush.bf16.msrb.mxu3 %v10626_v20  ;;  %v3374_v20 = vunpack.c.l.b16 %v8531_v21  ;;  %v10650_v21 = vld [vmem:[%s13192_s1 + $0x28] sm:$0xff] }
 0x100   : > { %3086 = vmatpush.bf16.msra.mxu1 %v10601_v9  ;;  %v3121_v46 = vshrl.u32 %v3119_v23, 16  ;;  %v10646_v22 = vld [vmem:[%s13192_s1 + $0x8] sm:$0xff] }
 0x101   : > { %2865 = vmatpush.bf16.msrb.mxu0 %v10583_v30  ;;  %v10657_v30 = vld [vmem:[%s13192_s1 + $0x60] sm:$0xff] }
 0x102   : > { %2926 = vmatpush.bf16.msrb.mxu2 %v10575_v31 }
 0x103   : > { %3343 = vmatpush.bf16.msrb.mxu3 %v10625_v27  ;;  %v10606_v27 = vld [vmem:[%s13192_s1 + $0x108] sm:$0xff] }
 0x104   : > { %3087 = vmatpush.bf16.msra.mxu1 %v10600_v33  ;;  %v3123_v33 = vshll.u32 %v3119_v23, 16  ;;  %v10683_v23 = vld [vmem:[%s13192_s1 + $0x130] sm:$0xff] }
 0x105   : > { %2866 = vmatpush.bf16.msrb.mxu0 %v10582_v40  ;;  %v3376_v40 = vpack.c.b16 %v3375_v28, %v3374_v20 }
 0x106   : > { %2927 = vmatpush.bf16.msrb.mxu2 %v10574_v41  ;;  %v10631_v41 = vld [vmem:[%s13192_s1 + $0x1d0] sm:$0xff] }
 0x107   : > { %3344 = vmatpush.bf16.msrb.mxu3 %v10624_v34  ;;  %v3209_v34 = vpack.c.b16 %v3118_v13, %v3208_v32  ;;  %v3600_v13 = vunpack.c.l.b16 %v12096_v7  ;;  %v10649_v32 = vld [vmem:[%s13192_s1 + $0x20] sm:$0xff] }
 0x108   : > { %3088 = vmatpush.bf16.msra.mxu1 %v10599_v44  ;;  %v1333_v44 = vadd.f32 %v11915_v42, %v11905_v35  ;;  %v10644_v35 = vld [vmem:[%s13192_s1 + $0x238] sm:$0xff] }
 0x109   : > { %2867 = vmatpush.bf16.msrb.mxu0 %v10581_v47  ;;  %v12002_v3 = vpop.f32.mrf.mxu0  ;;  %v3125_v47 = vrot.slane %v3123_v33, 1  ;;  %v3210_v56 = vrot.slane %v3209_v34, 1  ;;  %v10682_v33 = vld [vmem:[%s13192_s1 + $0x128] sm:$0xff]  ;;  %v10648_v34 = vld [vmem:[%s13192_s1 + $0x18] sm:$0xff] }
 0x10a   : > { %2928 = vmatpush.bf16.msrb.mxu2 %v10573_v48  ;;  %v10605_v48 = vld [vmem:[%s13192_s1 + $0x100] sm:$0xff] }
 0x10b   : > { %3345 = vmatpush.bf16.msrb.mxu3 %v10623_v52  ;;  %v10630_v52 = vld [vmem:[%s13192_s1 + $0x1c8] sm:$0xff] }
 0x10c   : > { %3089 = vmatpush.bf16.msra.mxu1 %v10598_v51  ;;  %2868 = vmatmul.bf16.vlgmr.msrb.gmra.mxu0 %v2810_v55  ;;  %v3539_v51 = vsel %vm1141_vm0, %v3534_v45, 0  ;;  %v1419_v55 = vadd.f32 %v11907_v36, %v1333_v44  ;;  %v10629_v36 = vld [vmem:[%s13192_s1 + $0x1c0] sm:$0xff] }
 0x10d   : > { %3176 = vmatpush.bf16.msra.mxu0 %v10612_v49  ;;  %2929 = vmatmul.bf16.vlgmr.msrb.gmra.mxu2 %v11862_v10  ;;  %v10634_v10 = vld [vmem:[%s13192_s1 + $0x1e8] sm:$0xff]  ;;  %v10613_v49 = vld [vmem:[%s13192_s1 + $0x140] sm:$0xff] }
 0x10e   : > { %3260 = vmatpush.bf16.msra.mxu2 %v10620_v50  ;;  %v3380_v50 = vshll.u32 %v3376_v40, 16  ;;  %v10681_v45 = vld [vmem:[%s13192_s1 + $0x120] sm:$0xff] }
 0x10f   : > { %3346 = vmatpush.bf16.msrb.mxu3 %v10622_v60  ;;  %v10643_v60 = vld [vmem:[%s13192_s1 + $0x230] sm:$0xff] }
 0x110   : > { %3090 = vmatpush.bf16.msra.mxu1 %v10597_v59  ;;  %v12021_v9 = vpop.f32.mrf.mxu2  ;;  %v12030_v31 = vpop.f32.mrf.mxu1 }
 0x111   : > { %3177 = vmatpush.bf16.msra.mxu0 %v10611_v57  ;;  %v12038_v38 = vpop.f32.mrf.mxu3  ;;  %v1496_v39 = vpop.f32.mrf.mxu0  ;;  %v3126_v57 = vor.u32 %v3125_v47, %v3121_v46  ;;  %v10663_v47 = vld [vmem:[%s13192_s1 + $0x90] sm:$0xff] }
 0x112   : > { %3261 = vmatpush.bf16.msra.mxu2 %v10619_v58  ;;  %v10668_v58 = vld [vmem:[%s13192_s1 + $0xb8] sm:$0xff] }
 0x113   : > { %3347 = vmatpush.bf16.msrb.mxu3 %v10621_v0  ;;  %3091 = vmatmul.bf16.vlgmr.msra.gmra.mxu1 %v8334_v4  ;;  %v1498_v0 = vadd.f32 %v12002_v3, %v1419_v55  ;;  %v10642_v4 = vld [vmem:[%s13192_s1 + $0x228] sm:$0xff]  ;;  %v10641_v3 = vld [vmem:[%s13192_s1 + $0x220] sm:$0xff] }
 0x114   : > { %3433 = vmatpush.bf16.msrb.mxu1 %v10636_v61  ;;  %v3378_v61 = vshrl.u32 %v3376_v40, 16  ;;  %v8581_v40 = vld [vmem:[%s11099_s16 + $0x28] sm:$0xe] }
 0x115   : > { %3178 = vmatpush.bf16.msra.mxu0 %v10610_v62  ;;  %v3382_v62 = vrot.slane %v3380_v50, 1  ;;  %v1591_v8 = vadd.f32 %v12021_v9, %v1498_v0  ;;  %v10640_v9 = vld [vmem:[%s13192_s1 + $0x218] sm:$0xff]  ;;  %v10638_v50 = vld [vmem:[%s13192_s1 + $0x208] sm:$0xff] }
 0x116   : > { %3262 = vmatpush.bf16.msra.mxu2 %v10618_v63  ;;  %3348 = vmatmul.bf16.vlgmr.msrb.gmra.mxu3 %v8482_v12  ;;  %v10654_v63 = vld [vmem:[%s13192_s1 + $0x48] sm:$0xff]  ;;  %v12106_v12 = vld [vmem:[%s11099_s16 + $0x24] sm:$0x1] }
 0x117   : > { %3659 = vmatpush.bf16.msra.mxu3 %v10660_v2  ;;  %v10667_v2 = vld [vmem:[%s13192_s1 + $0xb0] sm:$0xff]  ;;  %v8813_v0 = vld [vmem:[%s11099_s16 + $0x28] sm:$0xf] }
 0x118   : > { %3434 = vmatpush.bf16.msrb.mxu1 %v10635_v1  ;;  %v1589_v42 = vpop.f32.mrf.mxu2  ;;  %v1753_v54 = vpop.f32.mrf.mxu1  ;;  %v10652_v1 = vld [vmem:[%s13192_s1 + $0x38] sm:$0xff] }
 0x119   : > { %3179 = vmatpush.bf16.msra.mxu0 %v10609_v5  ;;  %v1673_v59 = vpop.f32.mrf.mxu3  ;;  %v3383_v5 = vor.u32 %v3382_v62, %v3378_v61  ;;  %v10960_v42 = vld [vmem:[%s13196_s5] ss:$0 sm:$0xff]  ;;  %v10662_v54 = vld [vmem:[%s13192_s1 + $0x88] sm:$0xff] }
 0x11a   : > { %3263 = vmatpush.bf16.msra.mxu2 %v10617_v6  ;;  %v10653_v6 = vld [vmem:[%s13192_s1 + $0x40] sm:$0xff] }
 0x11b   : > { %3660 = vmatpush.bf16.msra.mxu3 %v10659_v11  ;;  %v10684_v11 = vld [vmem:[%s13192_s1 + $0x138] sm:$0xff] }
 0x11c   : > { %3435 = vmatpush.bf16.msrb.mxu1 %v10634_v10  ;;  %v10651_v10 = vld [vmem:[%s13192_s1 + $0x30] sm:$0xff] }
 0x11d   : > { %3180 = vmatpush.bf16.msra.mxu0 %v10608_v16 }
 0x11e   : > { %3264 = vmatpush.bf16.msra.mxu2 %v10616_v17  ;;  %v3601_v17 = vunpack.c.l.b16 %v12106_v12  ;;  %v10674_v12 = vld [vmem:[%s13192_s1 + $0xe8] sm:$0xff] }
 0x11f   : > { %3661 = vmatpush.bf16.msra.mxu3 %v10658_v19  ;;  %v1675_v19 = vadd.f32 %v12038_v38, %v1591_v8  ;;  %v10700_v8 = vld [vmem:[%s13192_s1 + $0x1b8] sm:$0xff] }
 0x120   : > { %3436 = vmatpush.bf16.msrb.mxu1 %v10633_v18  ;;  %v3602_v18 = vpack.c.b16 %v3601_v17, %v3600_v13  ;;  %v10645_v13 = vld [vmem:[%s13192_s1] sm:$0xff] }
 0x121   : > { %3181 = vmatpush.bf16.msra.mxu0 %v10607_v24  ;;  %v1952_v16 = vpop.f32.mrf.mxu3 }
 0x122   : > { %3265 = vmatpush.bf16.msra.mxu2 %v10615_v25  ;;  %v10665_v25 = vld [vmem:[%s13192_s1 + $0xa0] sm:$0xff]  ;;  %v3606_v26 = vshll.u32 %v3602_v18, 16  ;;  %v3604_v20 = vshrl.u32 %v3602_v18, 16  ;;  %v10692_v18 = vld [vmem:[%s13192_s1 + $0x178] sm:$0xff] }
 0x123   : > { %3662 = vmatpush.bf16.msra.mxu3 %v10657_v30  ;;  %v1755_v30 = vadd.f32 %v12030_v31, %v1675_v19  ;;  %v10639_v31 = vld [vmem:[%s13192_s1 + $0x210] sm:$0xff] }
 0x124   : > { %3437 = vmatpush.bf16.msrb.mxu1 %v10632_v29  ;;  %v3608_v29 = vrot.slane %v3606_v26, 1  ;;  %v10699_v19 = vld [vmem:[%s13192_s1 + $0x1b0] sm:$0xff] }
 0x125   : > { %3182 = vmatpush.bf16.msra.mxu0 %v10606_v27  ;;  %v10664_v27 = vld [vmem:[%s13192_s1 + $0x98] sm:$0xff] }
 0x126   : > { %3266 = vmatpush.bf16.msra.mxu2 %v10614_v37  ;;  %v3609_v38 = vor.u32 %v3608_v29, %v3604_v20  ;;  %v10716_v20 = vld [vmem:[%s13192_s1 + $0x238] sm:$0xff]  ;;  %v10698_v29 = vld [vmem:[%s13192_s1 + $0x1a8] sm:$0xff] }
 0x127   : > { %3663 = vmatpush.bf16.msra.mxu3 %v10656_v43  ;;  %v8630_v43 = vld [vmem:[%s11332_s27 + $0xc] sm:$0xf] }
 0x128   : > { %3438 = vmatpush.bf16.msrb.mxu1 %v10631_v41 }
 0x129   : > { %3183 = vmatpush.bf16.msra.mxu0 %v10605_v48  ;;  %v1844_v24 = vpop.f32.mrf.mxu0  ;;  %v1954_v37 = vpop.f32.mrf.mxu3  ;;  %v3465_v48 = vunpack.c.l.b16 %v8581_v40  ;;  %v10696_v40 = vld [vmem:[%s13192_s1 + $0x198] sm:$0xff] }
 0x12a   : > { %3267 = vmatpush.bf16.msra.mxu2 %v10613_v49  ;;  %v1848_v39 = vadd.f32 %v1844_v24, %v1755_v30  ;;  %v10677_v24 = vld [vmem:[%s13192_s1 + $0x100] sm:$0xff] }
 0x12b   : > { %3664 = vmatpush.bf16.msra.mxu3 %v10655_v53  ;;  %v10680_v53 = vld [vmem:[%s13192_s1 + $0x118] sm:$0xff]  ;;  %v3466_v55 = vpack.c.b16 %v3375_v28, %v3465_v48  ;;  %v10679_v28 = vld [vmem:[%s13192_s1 + $0x110] sm:$0xff]  ;;  %v10673_v30 = vld [vmem:[%s13192_s1 + $0xe0] sm:$0xff] }
 0x12c   : > { %3439 = vmatpush.bf16.msrb.mxu1 %v10630_v52  ;;  %3184 = vmatmul.bf16.vlgmr.msra.gmra.mxu0 %v3126_v57  ;;  %v10647_v52 = vld [vmem:[%s13192_s1 + $0x10] sm:$0xff]  ;;  %v10697_v37 = vld [vmem:[%s13192_s1 + $0x1a0] sm:$0xff] }
 0x12d   : > { %3517 = vmatpush.bf16.msrb.mxu0 %v10644_v35  ;;  %3268 = vmatmul.bf16.vlgmr.msra.gmra.mxu2 %v3210_v56  ;;  %v8715_v56 = vld [vmem:[%s11099_s16 + $0x20] sm:$0xe] }
 0x12e   : > { %3548 = vmatpush.bf16.msrb.mxu2 %v3539_v51 }
 0x12f   : > { %3665 = vmatpush.bf16.msra.mxu3 %v10654_v63  ;;  %v3751_v63 = vunpack.c.l.b16 %v8715_v56 }
 0x130   : > { %3440 = vmatpush.bf16.msrb.mxu1 %v10629_v36  ;;  %v1928_v41 = vpop.f32.mrf.mxu2  ;;  %v12152_v46 = vpop.f32.mrf.mxu1 }
 0x131   : > { %3518 = vmatpush.bf16.msrb.mxu0 %v10643_v60  ;;  %v1932_v44 = vadd.f32 %v1928_v41, %v1848_v39  ;;  %v1846_v49 = vpop.f32.mrf.mxu0  ;;  %v10676_v60 = vld [vmem:[%s13192_s1 + $0xf8] sm:$0xff]  ;;  %v10689_v39 = vld [vmem:[%s13192_s1 + $0x160] sm:$0xff]  ;;  %v10671_v41 = vld [vmem:[%s13192_s1 + $0xd0] sm:$0xff] }
 0x132   : > { %3803 = vmatpush.bf16.msra.mxu2 %v10668_v58  ;;  %v10637_v58 = vld [vmem:[%s13192_s1 + $0x200] sm:$0xff]  ;;  %v10670_v49 = vld [vmem:[%s13192_s1 + $0xc8] sm:$0xff] }
 0x133   : > { %3441 = vmatmul.bf16.vlgmr.msrb.gmra.mxu1 %v3383_v5  ;;  %3666 = vmatpush.bf16.msra.mxu3 %v10653_v6  ;;  %v1933_v35 = vadd.f32 %v11868_v15, %v1932_v44  ;;  %v3916_v5 = vunpack.c.l.b16 %v8813_v0  ;;  %v10688_v44 = vld [vmem:[%s13192_s1 + $0x158] sm:$0xff]  ;;  %v4333_v0 = vld [vmem:[%s13195_s4] sm:$0x3] }
 0x134   : > { %3720 = vmatpush.bf16.msra.mxu1 %v10652_v1  ;;  %v3467_v1 = vrot.slane %v3466_v55, 1  ;;  %v10708_v55 = vld [vmem:[%s13192_s1 + $0x1f8] sm:$0xff] }
 0x135   : > { %3519 = vmatpush.bf16.msrb.mxu0 %v10642_v4  ;;  %v1956_v51 = vadd.f32 %v1952_v16, %v1933_v35  ;;  %v12180_v59 = vpop.f32.mrf.mxu3  ;;  %v12196_v4 = vld [vmem:[%s11099_s16 + $0x2c] sm:$0x1]  ;;  %v3752_v16 = vpack.c.b16 %v3601_v17, %v3751_v63  ;;  %v10687_v35 = vld [vmem:[%s13192_s1 + $0x150] sm:$0xff] }
 0x136   : > { %3804 = vmatpush.bf16.msra.mxu2 %v10667_v2  ;;  %3667 = vmatmul.bf16.vlgmr.msra.gmra.mxu3 %v3609_v38  ;;  %v10661_v2 = vld [vmem:[%s13192_s1 + $0x80] sm:$0xff]  ;;  %v10707_v63 = vld [vmem:[%s13192_s1 + $0x1f0] sm:$0xff] }
 0x137   : > { %3975 = vmatpush.bf16.msrb.mxu3 %v10684_v11  ;;  %v1961_v57 = vadd.f32 %v10960_v42, %v1956_v51  ;;  %v10675_v11 = vld [vmem:[%s13192_s1 + $0xf0] sm:$0xff]  ;;  %v10712_v42 = vld [vmem:[%s13192_s1 + $0x218] sm:$0xff]  ;;  %v2132_v51 = vadd.f32 %v12180_v59, %v12152_v46  ;;  %v10686_v46 = vld [vmem:[%s13192_s1 + $0x148] sm:$0xff] }
 0x138   : > { %3721 = vmatpush.bf16.msra.mxu1 %v10651_v10  ;;  %v1930_v61 = vpop.f32.mrf.mxu2  ;;  %v2072_v36 = vpop.f32.mrf.mxu1  ;;  %v3917_v10 = vunpack.c.l.b16 %v12196_v4  ;;  %v10731_v4 = vld [vmem:[%s13192_s1 + $0x70] sm:$0xff] }
 0x139   : > { %3520 = vmatpush.bf16.msrb.mxu0 %v10641_v3  ;;  %v1962_v62 = vmax.f32 %v1961_v57, 0.0  ;;  %v9011_v61 = vld [vmem:[%s11099_s16 + $0x30] sm:$0xe]  ;;  %v8764_v36 = vld [vmem:[%s11099_s16 + $0x28] sm:$0xf] }
 0x13a   : > { %3805 = vmatpush.bf16.msra.mxu2 %v10666_v14  ;;  %v10678_v14 = vld [vmem:[%s13192_s1 + $0x108] sm:$0xff]  ;;  %v3918_v3 = vpack.c.b16 %v3917_v10, %v3916_v5  ;;  %v4264_v5 = vunpack.c.l.b16 %v9011_v61 }
 0x13b   : > { %3976 = vmatpush.bf16.msrb.mxu3 %v10683_v23  ;;  %v1963_v6 = vpack.c.bf16 %v1962_v62, %v1962_v62 }
 0x13c   : > { %3722 = vmatpush.bf16.msra.mxu1 %v10650_v21  ;;  %v3922_v23 = vshll.u32 %v3918_v3, 16  ;;  %v3920_v17 = vshrl.u32 %v3918_v3, 16 }
 0x13d   : > { %3521 = vmatpush.bf16.msrb.mxu0 %v10640_v9  ;;  %8631 = vmatmul.msk.bf16.vlgmr.msrb.gmra.mxu2 %vm1137_vm1, %v8630_v43  ;;  %7772 = vst [vmem:[%s11922_s25 + $0x4] sm:$0xf] %v1963_v6  ;;  %v2133_v21 = vpop.f32.mrf.mxu3  ;;  %v10691_v9 = vld [vmem:[%s13192_s1 + $0x170] sm:$0xff]  ;;  %v10685_v6 = vld [vmem:[%s13192_s1 + $0x140] sm:$0xff] }
 0x13e   : > { %3806 = vmatpush.bf16.msra.mxu2 %v10665_v25  ;;  %v3753_v25 = vrot.slane %v3752_v16, 1  ;;  %v3924_v26 = vrot.slane %v3922_v23, 1  ;;  %v10706_v16 = vld [vmem:[%s13192_s1 + $0x1e8] sm:$0xff]  ;;  %v10709_v21 = vld [vmem:[%s13192_s1 + $0x200] sm:$0xff] }
 0x13f   : > { %3977 = vmatpush.bf16.msrb.mxu3 %v10682_v33  ;;  %v10690_v33 = vld [vmem:[%s13192_s1 + $0x168] sm:$0xff] }
 0x140   : > { %3723 = vmatpush.bf16.msra.mxu1 %v10649_v32  ;;  %v3925_v32 = vor.u32 %v3924_v26, %v3920_v17  ;;  %v10730_v17 = vld [vmem:[%s13192_s1 + $0x68] sm:$0xff]  ;;  %v8961_v26 = vld [vmem:[%s11099_s16 + $0x30] sm:$0xf] }
 0x141   : > { %3522 = vmatpush.bf16.msrb.mxu0 %v10639_v31  ;;  %v10714_v31 = vld [vmem:[%s13192_s1 + $0x228] sm:$0xff] }
 0x142   : > { %3807 = vmatpush.bf16.msra.mxu2 %v10664_v27  ;;  %v10715_v27 = vld [vmem:[%s13192_s1 + $0x230] sm:$0xff] }
 0x143   : > { %3978 = vmatpush.bf16.msrb.mxu3 %v10681_v45 }
 0x144   : > { %3724 = vmatpush.bf16.msra.mxu1 %v10648_v34  ;;  %v10713_v34 = vld [vmem:[%s13192_s1 + $0x220] sm:$0xff] }
 0x145   : > { %3523 = vmatpush.bf16.msrb.mxu0 %v10638_v50  ;;  %v8863_v50 = vld [vmem:[%s11099_s16 + $0x28] sm:$0xe] }
 0x146   : > { %3808 = vmatpush.bf16.msra.mxu2 %v10663_v47  ;;  %v10695_v47 = vld [vmem:[%s13192_s1 + $0x190] sm:$0xff]  ;;  %v4007_v57 = vunpack.c.l.b16 %v8863_v50 }
 0x147   : > { %3979 = vmatpush.bf16.msrb.mxu3 %v10680_v53  ;;  %v10669_v53 = vld [vmem:[%s13192_s1 + $0xc0] sm:$0xff]  ;;  %v10727_v50 = vld [vmem:[%s13192_s1 + $0x50] sm:$0xff] }
 0x148   : > { %3725 = vmatpush.bf16.msra.mxu1 %v10647_v52  ;;  %v10694_v52 = vld [vmem:[%s13192_s1 + $0x188] sm:$0xff] }
 0x149   : > { %3524 = vmatpush.bf16.msrb.mxu0 %v10637_v58  ;;  %v2214_v38 = vpop.f32.mrf.mxu0  ;;  %v10711_v58 = vld [vmem:[%s13192_s1 + $0x210] sm:$0xff] }
 0x14a   : > { %3809 = vmatpush.bf16.msra.mxu2 %v10662_v54  ;;  %v2218_v62 = vadd.f32 %v2214_v38, %v2132_v51  ;;  %v10738_v38 = vld [vmem:[%s13192_s1 + $0xa8] sm:$0xff] }
 0x14b   : > { %3980 = vmatpush.bf16.msrb.mxu3 %v10679_v28  ;;  %v10732_v28 = vld [vmem:[%s13192_s1 + $0x78] sm:$0xff] }
 0x14c   : > { %3726 = vmatpush.bf16.msra.mxu1 %v10646_v22  ;;  %3525 = vmatmul.bf16.vlgmr.msrb.gmra.mxu0 %v3467_v1  ;;  %v10693_v22 = vld [vmem:[%s13192_s1 + $0x180] sm:$0xff]  ;;  %v4008_v1 = vpack.c.b16 %v3917_v10, %v4007_v57  ;;  %v4338_v10 = vsel %vm1141_vm0, %v4333_v0, 0  ;;  %v9060_v57 = vld [vmem:[%s11332_s27 + $0x10] sm:$0xf] }
 0x14d   : > { %3882 = vmatpush.bf16.msra.mxu0 %v10676_v60  ;;  %v12302_v60 = vld [vmem:[%s11099_s16 + $0x34] sm:$0x1] }
 0x14e   : > { %3810 = vmatpush.bf16.msra.mxu2 %v10661_v2  ;;  %v4174_v2 = vunpack.c.l.b16 %v12302_v60  ;;  %v4009_v3 = vrot.slane %v4008_v1, 1  ;;  %v10744_v60 = vld [vmem:[%s13192_s1 + $0xd8] sm:$0xff]  ;;  %v10735_v0 = vld [vmem:[%s13192_s1 + $0x90] sm:$0xff] }
 0x14f   : > { %3981 = vmatpush.bf16.msrb.mxu3 %v10678_v14  ;;  %v8912_v14 = vld [vmem:[%s11099_s16 + $0x30] sm:$0xf] }
 0x150   : > { %3727 = vmatpush.bf16.msra.mxu1 %v10645_v13  ;;  %v2293_v43 = vpop.f32.mrf.mxu2  ;;  %v2386_v45 = vpop.f32.mrf.mxu1 }
 0x151   : > { %3883 = vmatpush.bf16.msra.mxu0 %v10675_v11  ;;  %3811 = vmatmul.bf16.vlgmr.msra.gmra.mxu2 %v3753_v25  ;;  %v2216_v48 = vpop.f32.mrf.mxu0  ;;  %v2297_v11 = vadd.f32 %v2293_v43, %v2218_v62  ;;  %v12376_v43 = vld [vmem:[%s11099_s16 + $0x28] sm:$0xf] }
 0x152   : > { %4139 = vmatpush.bf16.msrb.mxu2 %v10700_v8  ;;  %v10710_v8 = vld [vmem:[%s13192_s1 + $0x208] sm:$0xff] }
 0x153   : > { %3728 = vmatmul.bf16.vlgmr.msra.gmra.mxu1 %v12096_v7  ;;  %3982 = vmatpush.bf16.msrb.mxu3 %v10677_v24  ;;  %v10672_v7 = vld [vmem:[%s13192_s1 + $0xd8] sm:$0xff]  ;;  %v2390_v23 = vadd.f32 %v2386_v45, %v2297_v11  ;;  %v10705_v24 = vld [vmem:[%s13192_s1 + $0x1e0] sm:$0xff]  ;;  %v10726_v62 = vld [vmem:[%s13192_s1 + $0x48] sm:$0xff] }
 0x154   : > { %4059 = vmatpush.bf16.msrb.mxu1 %v10692_v18  ;;  %v4265_v18 = vpack.c.b16 %v4174_v2, %v4264_v5  ;;  %v10737_v45 = vld [vmem:[%s13192_s1 + $0xa0] sm:$0xff]  ;;  %v10743_v5 = vld [vmem:[%s13192_s1 + $0xd0] sm:$0xff] }
 0x155   : > { %3884 = vmatpush.bf16.msra.mxu0 %v10674_v12  ;;  %v2470_v54 = vpop.f32.mrf.mxu3  ;;  %v10748_v12 = vld [vmem:[%s13192_s1 + $0xf8] sm:$0xff] }
 0x156   : > { %4140 = vmatpush.bf16.msrb.mxu2 %v10699_v19  ;;  %3983 = vmatmul.bf16.vlgmr.msrb.gmra.mxu3 %v3925_v32  ;;  %v10740_v19 = vld [vmem:[%s13192_s1 + $0xb8] sm:$0xff]  ;;  %v4266_v25 = vrot.slane %v4265_v18, 1  ;;  %v10729_v32 = vld [vmem:[%s13192_s1 + $0x60] sm:$0xff] }
 0x157   : > { %4316 = vmatpush.bf16.msra.mxu3 %v10716_v20  ;;  %v2474_v20 = vadd.f32 %v2470_v54, %v2390_v23 }
 0x158   : > { %4060 = vmatpush.bf16.msrb.mxu1 %v10691_v9  ;;  %v2295_v56 = vpop.f32.mrf.mxu2  ;;  %v2388_v59 = vpop.f32.mrf.mxu1  ;;  %v10739_v9 = vld [vmem:[%s13192_s1 + $0xb0] sm:$0xff] }
 0x159   : > { %3885 = vmatpush.bf16.msra.mxu0 %v10673_v30  ;;  %v10736_v56 = vld [vmem:[%s13192_s1 + $0x98] sm:$0xff]  ;;  %v10961_v59 = vld [vmem:[%s13196_s5] ss:$0 sm:$0xff] }
 0x15a   : > { %4141 = vmatpush.bf16.msrb.mxu2 %v10698_v29  ;;  %v10747_v29 = vld [vmem:[%s13192_s1 + $0xf0] sm:$0xff] }
 0x15b   : > { %4317 = vmatpush.bf16.msra.mxu3 %v10715_v27  ;;  %v4173_v27 = vunpack.c.l.b16 %v8961_v26  ;;  %v10733_v26 = vld [vmem:[%s13192_s1 + $0x80] sm:$0xff] }
 0x15c   : > { %4061 = vmatpush.bf16.msrb.mxu1 %v10690_v33 }
 0x15d   : > { %3886 = vmatpush.bf16.msra.mxu0 %v10672_v7  ;;  %v2472_v13 = vpop.f32.mrf.mxu3 }
 0x15e   : > { %4142 = vmatpush.bf16.msrb.mxu2 %v10697_v37  ;;  %v10704_v37 = vld [vmem:[%s13192_s1 + $0x1d8] sm:$0xff] }
 0x15f   : > { %4318 = vmatpush.bf16.msra.mxu3 %v10714_v31  ;;  %v10728_v31 = vld [vmem:[%s13192_s1 + $0x58] sm:$0xff] }
 0x160   : > { %4062 = vmatpush.bf16.msrb.mxu1 %v10689_v39  ;;  %v10746_v39 = vld [vmem:[%s13192_s1 + $0xe8] sm:$0xff] }
 0x161   : > { %3887 = vmatpush.bf16.msra.mxu0 %v10671_v41  ;;  %v10703_v41 = vld [vmem:[%s13192_s1 + $0x1d0] sm:$0xff] }
 0x162   : > { %4143 = vmatpush.bf16.msrb.mxu2 %v10696_v40  ;;  %v4175_v40 = vpack.c.b16 %v4174_v2, %v4173_v27  ;;  %v10721_v27 = vld [vmem:[%s13192_s1 + $0x20] sm:$0xff] }
 0x163   : > { %4319 = vmatpush.bf16.msra.mxu3 %v10713_v34 }
 0x164   : > { %4063 = vmatpush.bf16.msrb.mxu1 %v10688_v44  ;;  %v12379_v44 = vld [vmem:[%s11099_s16 + $0x2c] sm:$0x1]  ;;  %v4179_v51 = vshll.u32 %v4175_v40, 16 }
 0x165   : > { %3888 = vmatpush.bf16.msra.mxu0 %v10670_v49  ;;  %v2751_v33 = vpop.f32.mrf.mxu3  ;;  %v4400_v48 = vunpack.c.l.b16 %v12379_v44  ;;  %v12483_v44 = vld [vmem:[%s11099_s16 + $0x34] sm:$0x1] }
 0x166   : > { %4144 = vmatpush.bf16.msrb.mxu2 %v10695_v47  ;;  %v4399_v47 = vunpack.c.l.b16 %v12376_v43 }
 0x167   : > { %4320 = vmatpush.bf16.msra.mxu3 %v10712_v42  ;;  %v10745_v42 = vld [vmem:[%s13192_s1 + $0xe0] sm:$0xff] }
 0x168   : > { %4064 = vmatpush.bf16.msrb.mxu1 %v10687_v35  ;;  %v4401_v54 = vpack.c.b16 %v4400_v48, %v4399_v47  ;;  %v10778_v47 = vld [vmem:[%s13192_s1 + $0x1e8] sm:$0xff] }
 0x169   : > { %3889 = vmatpush.bf16.msra.mxu0 %v10669_v53  ;;  %v2550_v30 = vpop.f32.mrf.mxu0 }
 0x16a   : > { %4145 = vmatpush.bf16.msrb.mxu2 %v10694_v52  ;;  %v2554_v7 = vadd.f32 %v2550_v30, %v2474_v20  ;;  %v4405_v61 = vshll.u32 %v4401_v54, 16  ;;  %v10741_v20 = vld [vmem:[%s13192_s1 + $0xc0] sm:$0xff]  ;;  %v10780_v30 = vld [vmem:[%s13192_s1 + $0x1f8] sm:$0xff] }
 0x16b   : > { %4321 = vmatpush.bf16.msra.mxu3 %v10711_v58 }
 0x16c   : > { %4065 = vmatpush.bf16.msrb.mxu1 %v10686_v46  ;;  %3890 = vmatmul.bf16.vlgmr.msra.gmra.mxu0 %v8764_v36  ;;  %v10702_v46 = vld [vmem:[%s13192_s1 + $0x1c8] sm:$0xff]  ;;  %v4407_v11 = vrot.slane %v4405_v61, 1 }
 0x16d   : > { %4232 = vmatpush.bf16.msrb.mxu0 %v10708_v55  ;;  %v2753_v53 = vpop.f32.mrf.mxu3 }
 0x16e   : > { %4146 = vmatpush.bf16.msrb.mxu2 %v10693_v22  ;;  %v4177_v22 = vshrl.u32 %v4175_v40, 16 }
 0x16f   : > { %4322 = vmatpush.bf16.msra.mxu3 %v10710_v8  ;;  %v4403_v8 = vshrl.u32 %v4401_v54, 16 }
 0x170   : > { %4066 = vmatpush.bf16.msrb.mxu1 %v10685_v6  ;;  %v2643_v34 = vpop.f32.mrf.mxu2  ;;  %v2727_v35 = vpop.f32.mrf.mxu1 }
 0x171   : > { %4233 = vmatpush.bf16.msrb.mxu0 %v10707_v63  ;;  %4147 = vmatmul.bf16.vlgmr.msrb.gmra.mxu2 %v8912_v14  ;;  %v2647_v49 = vadd.f32 %v2643_v34, %v2554_v7  ;;  %v2552_v52 = vpop.f32.mrf.mxu0  ;;  %v10724_v63 = vld [vmem:[%s13192_s1 + $0x38] sm:$0xff] }
 0x172   : > { %4458 = vmatpush.bf16.msra.mxu2 %v10732_v28  ;;  %v4181_v28 = vrot.slane %v4179_v51, 1  ;;  %v10756_v14 = vld [vmem:[%s13192_s1 + $0x138] sm:$0xff]  ;;  %v10777_v52 = vld [vmem:[%s13192_s1 + $0x1e0] sm:$0xff] }
 0x173   : > { %4067 = vmatmul.bf16.vlgmr.msrb.gmra.mxu1 %v4009_v3  ;;  %4323 = vmatpush.bf16.msra.mxu3 %v10709_v21  ;;  %v2731_v55 = vadd.f32 %v2727_v35, %v2647_v49  ;;  %v10734_v3 = vld [vmem:[%s13192_s1 + $0x88] sm:$0xff]  ;;  %v4408_v21 = vor.u32 %v4407_v11, %v4403_v8  ;;  %v10720_v34 = vld [vmem:[%s13192_s1 + $0x18] sm:$0xff]  ;;  %v4716_v49 = vunpack.c.l.b16 %v12483_v44  ;;  %v10749_v11 = vld [vmem:[%s13192_s1 + $0x100] sm:$0xff] }
 0x174   : > { %4347 = vmatpush.bf16.msra.mxu1 %v4338_v10  ;;  %v10725_v10 = vld [vmem:[%s13192_s1 + $0x40] sm:$0xff]  ;;  %v10752_v35 = vld [vmem:[%s13192_s1 + $0x118] sm:$0xff]  ;;  %v12657_v44 = vld [vmem:[%s11099_s16 + $0x30] sm:$0xf] }
 0x175   : > { %4234 = vmatpush.bf16.msrb.mxu0 %v10706_v16  ;;  %v2732_v58 = vadd.f32 %v11868_v15, %v2731_v55  ;;  %v10701_v15 = vld [vmem:[%s13192_s1 + $0x1c0] sm:$0xff]  ;;  %v10723_v16 = vld [vmem:[%s13192_s1 + $0x30] sm:$0xff]  ;;  %v9391_v55 = vld [vmem:[%s11099_s16 + $0x38] sm:$0xf] }
 0x176   : > { %4459 = vmatpush.bf16.msra.mxu2 %v10731_v4  ;;  %4324 = vmatmul.bf16.vlgmr.msra.gmra.mxu3 %v4266_v25  ;;  %v4182_v4 = vor.u32 %v4181_v28, %v4177_v22  ;;  %v10722_v25 = vld [vmem:[%s13192_s1 + $0x28] sm:$0xff] }
 0x177   : > { %4681 = vmatpush.bf16.msrb.mxu3 %v10748_v12  ;;  %v2755_v36 = vadd.f32 %v2751_v33, %v2732_v58  ;;  %v9145_v12 = vld [vmem:[%s11099_s16 + $0x28] sm:$0xe] }
 0x178   : > { %4602 = vmatpush.bf16.msrb.mxu1 %v10740_v19  ;;  %v2645_v1 = vpop.f32.mrf.mxu2  ;;  %v2729_v6 = vpop.f32.mrf.mxu1  ;;  %v10742_v19 = vld [vmem:[%s13192_s1 + $0xc8] sm:$0xff] }
 0x179   : > { %4235 = vmatpush.bf16.msrb.mxu0 %v10705_v24  ;;  %v2760_v2 = vadd.f32 %v10961_v59, %v2755_v36  ;;  %v12439_v23 = vpop.f32.mrf.mxu3  ;;  %v4550_v24 = vunpack.c.l.b16 %v9145_v12  ;;  %v10718_v58 = vld [vmem:[%s13192_s1 + $0x8] sm:$0xff]  ;;  %v10768_v59 = vld [vmem:[%s13192_s1 + $0x198] sm:$0xff]  ;;  %v10717_v36 = vld [vmem:[%s13192_s1] sm:$0xff] }
 0x17a   : > { %4460 = vmatpush.bf16.msra.mxu2 %v10730_v17  ;;  %v10755_v17 = vld [vmem:[%s13192_s1 + $0x130] sm:$0xff]  ;;  %v10750_v28 = vld [vmem:[%s13192_s1 + $0x108] sm:$0xff]  ;;  %v10765_v12 = vld [vmem:[%s13192_s1 + $0x180] sm:$0xff] }
 0x17b   : > { %4682 = vmatpush.bf16.msrb.mxu3 %v10747_v29  ;;  %v2761_v13 = vmax.f32 %v2760_v2, 0.0  ;;  %v4551_v29 = vpack.c.b16 %v4400_v48, %v4550_v24  ;;  %v10775_v2 = vld [vmem:[%s13192_s1 + $0x1d0] sm:$0xff] }
 0x17c   : > { %4603 = vmatpush.bf16.msrb.mxu1 %v10739_v9  ;;  %v10772_v9 = vld [vmem:[%s13192_s1 + $0x1b8] sm:$0xff] }
 0x17d   : > { %4236 = vmatpush.bf16.msrb.mxu0 %v10704_v37  ;;  %v2762_v18 = vpack.c.bf16 %v2761_v13, %v2761_v13  ;;  %v4552_v33 = vrot.slane %v4551_v29, 1  ;;  %v10771_v37 = vld [vmem:[%s13192_s1 + $0x1b0] sm:$0xff] }
 0x17e   : > { %4461 = vmatpush.bf16.msra.mxu2 %v10729_v32  ;;  %v10754_v32 = vld [vmem:[%s13192_s1 + $0x128] sm:$0xff]  ;;  %v10763_v13 = vld [vmem:[%s13192_s1 + $0x170] sm:$0xff] }
 0x17f   : > { %4683 = vmatpush.bf16.msrb.mxu3 %v10746_v39  ;;  %8202 = vst [vmem:[%s11922_s25 + $0x8] sm:$0xf] %v2762_v18  ;;  %v10779_v39 = vld [vmem:[%s13192_s1 + $0x1f0] sm:$0xff] }
 0x180   : > { %4604 = vmatpush.bf16.msrb.mxu1 %v10738_v38  ;;  %v9194_v38 = vld [vmem:[%s11099_s16 + $0x30] sm:$0xf] }
 0x181   : > { %4237 = vmatpush.bf16.msrb.mxu0 %v10703_v41  ;;  %v3015_v7 = vpop.f32.mrf.mxu3  ;;  %v9243_v41 = vld [vmem:[%s11099_s16 + $0x30] sm:$0xf] }
 0x182   : > { %4462 = vmatpush.bf16.msra.mxu2 %v10728_v31  ;;  %v10753_v31 = vld [vmem:[%s13192_s1 + $0x120] sm:$0xff]  ;;  %v4715_v48 = vunpack.c.l.b16 %v9243_v41  ;;  %v10795_v41 = vld [vmem:[%s13192_s1 + $0x30] sm:$0xff] }
 0x183   : > { %4684 = vmatpush.bf16.msrb.mxu3 %v10745_v42  ;;  %9061 = vmatmul.msk.bf16.vlgmr.msra.gmra.mxu1 %vm1137_vm1, %v9060_v57  ;;  %v10719_v42 = vld [vmem:[%s13192_s1 + $0x10] sm:$0xff]  ;;  %v10785_v7 = vld [vmem:[%s13192_s1 + $0x220] sm:$0xff] }
 0x184   : > { %4605 = vmatpush.bf16.msrb.mxu1 %v10737_v45  ;;  %v10770_v45 = vld [vmem:[%s13192_s1 + $0x1a8] sm:$0xff]  ;;  %v4717_v54 = vpack.c.b16 %v4716_v49, %v4715_v48  ;;  %v9293_v48 = vld [vmem:[%s11099_s16 + $0x30] sm:$0xe] }
 0x185   : > { %4238 = vmatpush.bf16.msrb.mxu0 %v10702_v46  ;;  %v12515_v46 = vld [vmem:[%s11099_s16 + $0x3c] sm:$0x1] }
 0x186   : > { %4463 = vmatpush.bf16.msra.mxu2 %v10727_v50  ;;  %v10769_v50 = vld [vmem:[%s13192_s1 + $0x1a0] sm:$0xff]  ;;  %v4973_v61 = vunpack.c.l.b16 %v12515_v46  ;;  %v4721_v22 = vshll.u32 %v4717_v54, 16  ;;  %v4719_v6 = vshrl.u32 %v4717_v54, 16  ;;  %v4806_v54 = vunpack.c.l.b16 %v9293_v48  ;;  %v10820_v46 = vld [vmem:[%s13192_s1 + $0xf8] sm:$0xff] }
 0x187   : > { %4685 = vmatpush.bf16.msrb.mxu3 %v10744_v60  ;;  %v4972_v60 = vunpack.c.l.b16 %v9391_v55 }
 0x188   : > { %4606 = vmatpush.bf16.msrb.mxu1 %v10736_v56  ;;  %v10751_v56 = vld [vmem:[%s13192_s1 + $0x110] sm:$0xff]  ;;  %v4723_v8 = vrot.slane %v4721_v22, 1  ;;  %v4807_v22 = vpack.c.b16 %v4716_v49, %v4806_v54 }
 0x189   : > { %4239 = vmatpush.bf16.msrb.mxu0 %v10701_v15  ;;  %v12479_v40 = vpop.f32.mrf.mxu0  ;;  %v10764_v15 = vld [vmem:[%s13192_s1 + $0x178] sm:$0xff]  ;;  %v4974_v1 = vpack.c.b16 %v4973_v61, %v4972_v60  ;;  %v12660_v49 = vld [vmem:[%s11099_s16 + $0x34] sm:$0x1]  ;;  %v9575_v54 = vld [vmem:[%s11099_s16 + $0x30] sm:$0xe] }
 0x18a   : > { %4464 = vmatpush.bf16.msra.mxu2 %v10726_v62  ;;  %v10776_v62 = vld [vmem:[%s13192_s1 + $0x1d8] sm:$0xff]  ;;  %v4724_v18 = vor.u32 %v4723_v8, %v4719_v6  ;;  %v5199_v6 = vunpack.c.l.b16 %v12660_v49 }
 0x18b   : > { %4686 = vmatpush.bf16.msrb.mxu3 %v10743_v5 }
 0x18c   : > { %4607 = vmatpush.bf16.msrb.mxu1 %v10735_v0  ;;  %4240 = vmatmul.bf16.vlgmr.msrb.gmra.mxu0 %v4182_v4  ;;  %v10788_v4 = vld [vmem:[%s13192_s1 + $0x238] sm:$0xff] }
 0x18d   : > { %4519 = vmatpush.bf16.msra.mxu0 %v10724_v63  ;;  %v10767_v63 = vld [vmem:[%s13192_s1 + $0x190] sm:$0xff] }
 0x18e   : > { %4465 = vmatpush.bf16.msra.mxu2 %v10725_v10 }
 0x18f   : > { %4687 = vmatpush.bf16.msrb.mxu3 %v10742_v19  ;;  %v10787_v19 = vld [vmem:[%s13192_s1 + $0x230] sm:$0xff] }
 0x190   : > { %4608 = vmatpush.bf16.msrb.mxu1 %v10734_v3  ;;  %v12504_v51 = vpop.f32.mrf.mxu2  ;;  %v12509_v53 = vpop.f32.mrf.mxu1  ;;  %v10774_v3 = vld [vmem:[%s13192_s1 + $0x1c8] sm:$0xff] }
 0x191   : > { %4520 = vmatpush.bf16.msra.mxu0 %v10723_v16  ;;  %4466 = vmatmul.bf16.vlgmr.msra.gmra.mxu2 %v4408_v21  ;;  %v2871_v57 = vpop.f32.mrf.mxu0  ;;  %v4978_v16 = vshll.u32 %v4974_v1, 16  ;;  %v10762_v21 = vld [vmem:[%s13192_s1 + $0x168] sm:$0xff] }
 0x192   : > { %4774 = vmatpush.bf16.msrb.mxu2 %v10756_v14  ;;  %v10766_v14 = vld [vmem:[%s13192_s1 + $0x188] sm:$0xff] }
 0x193   : > { %4688 = vmatpush.bf16.msrb.mxu3 %v10741_v20  ;;  %v4980_v24 = vrot.slane %v4978_v16, 1  ;;  %v10758_v57 = vld [vmem:[%s13192_s1 + $0x148] sm:$0xff] }
 0x194   : > { %4609 = vmatpush.bf16.msrb.mxu1 %v10733_v26  ;;  %v10773_v26 = vld [vmem:[%s13192_s1 + $0x1c0] sm:$0xff] }
 0x195   : > { %4521 = vmatpush.bf16.msra.mxu0 %v10722_v25  ;;  %v10804_v25 = vld [vmem:[%s13192_s1 + $0x78] sm:$0xff] }
 0x196   : > { %4775 = vmatpush.bf16.msrb.mxu2 %v10755_v17  ;;  %4689 = vmatmul.bf16.vlgmr.msrb.gmra.mxu3 %v9194_v38  ;;  %v4976_v17 = vshrl.u32 %v4974_v1, 16 }
 0x197   : > { %5031 = vmatpush.bf16.msra.mxu3 %v10780_v30  ;;  %4610 = vmatmul.bf16.vlgmr.msrb.gmra.mxu1 %v4552_v33  ;;  %v10761_v30 = vld [vmem:[%s13192_s1 + $0x160] sm:$0xff]  ;;  %v9342_v33 = vld [vmem:[%s11099_s16 + $0x38] sm:$0xf] }
 0x198   : > { %4938 = vmatpush.bf16.msra.mxu1 %v10772_v9  ;;  %v2932_v0 = vpop.f32.mrf.mxu2  ;;  %v3094_v5 = vpop.f32.mrf.mxu1  ;;  %v10786_v9 = vld [vmem:[%s13192_s1 + $0x228] sm:$0xff] }
 0x199   : > { %4522 = vmatpush.bf16.msra.mxu0 %v10721_v27  ;;  %v12553_v10 = vpop.f32.mrf.mxu3  ;;  %v10803_v27 = vld [vmem:[%s13192_s1 + $0x70] sm:$0xff]  ;;  %v5198_v5 = vunpack.c.l.b16 %v12657_v44 }
 0x19a   : > { %4776 = vmatpush.bf16.msrb.mxu2 %v10754_v32  ;;  %v4981_v32 = vor.u32 %v4980_v24, %v4976_v17  ;;  %v10810_v17 = vld [vmem:[%s13192_s1 + $0xa8] sm:$0xff]  ;;  %v10797_v24 = vld [vmem:[%s13192_s1 + $0x40] sm:$0xff] }
 0x19b   : > { %5032 = vmatpush.bf16.msra.mxu3 %v10779_v39  ;;  %v10760_v39 = vld [vmem:[%s13192_s1 + $0x158] sm:$0xff] }
 0x19c   : > { %4939 = vmatpush.bf16.msra.mxu1 %v10771_v37  ;;  %v10796_v37 = vld [vmem:[%s13192_s1 + $0x38] sm:$0xff] }
 0x19d   : > { %4523 = vmatpush.bf16.msra.mxu0 %v10720_v34  ;;  %v2931_v34 = vadd.f32 %v12504_v51, %v12479_v40  ;;  %v10801_v40 = vld [vmem:[%s13192_s1 + $0x60] sm:$0xff] }
 0x19e   : > { %4777 = vmatpush.bf16.msrb.mxu2 %v10753_v31  ;;  %v10802_v31 = vld [vmem:[%s13192_s1 + $0x68] sm:$0xff] }
 0x19f   : > { %5033 = vmatpush.bf16.msra.mxu3 %v10778_v47  ;;  %v10759_v47 = vld [vmem:[%s13192_s1 + $0x150] sm:$0xff]  ;;  %v3017_v51 = vadd.f32 %v12439_v23, %v2931_v34  ;;  %v10793_v23 = vld [vmem:[%s13192_s1 + $0x20] sm:$0xff]  ;;  %v10826_v34 = vld [vmem:[%s13192_s1 + $0x128] sm:$0xff] }
 0x1a0   : > { %4940 = vmatpush.bf16.msra.mxu1 %v10770_v45  ;;  %v10784_v45 = vld [vmem:[%s13192_s1 + $0x218] sm:$0xff] }
 0x1a1   : > { %4524 = vmatpush.bf16.msra.mxu0 %v10719_v42  ;;  %v3351_v29 = vpop.f32.mrf.mxu3  ;;  %v3096_v60 = vadd.f32 %v12509_v53, %v3017_v51  ;;  %v10799_v53 = vld [vmem:[%s13192_s1 + $0x50] sm:$0xff] }
 0x1a2   : > { %4778 = vmatpush.bf16.msrb.mxu2 %v10752_v35 }
 0x1a3   : > { %5034 = vmatpush.bf16.msra.mxu3 %v10777_v52  ;;  %v10783_v52 = vld [vmem:[%s13192_s1 + $0x210] sm:$0xff] }
 0x1a4   : > { %4941 = vmatpush.bf16.msra.mxu1 %v10769_v50  ;;  %v10794_v50 = vld [vmem:[%s13192_s1 + $0x28] sm:$0xff] }
 0x1a5   : > { %4525 = vmatpush.bf16.msra.mxu0 %v10718_v58  ;;  %v10800_v58 = vld [vmem:[%s13192_s1 + $0x58] sm:$0xff] }
 0x1a6   : > { %4779 = vmatpush.bf16.msrb.mxu2 %v10751_v56  ;;  %v9441_v56 = vld [vmem:[%s11099_s16 + $0x38] sm:$0xe] }
 0x1a7   : > { %5035 = vmatpush.bf16.msra.mxu3 %v10776_v62  ;;  %v10782_v62 = vld [vmem:[%s13192_s1 + $0x208] sm:$0xff] }
 0x1a8   : > { %4942 = vmatpush.bf16.msra.mxu1 %v10768_v59  ;;  %v5063_v59 = vunpack.c.l.b16 %v9441_v56 }
 0x1a9   : > { %4526 = vmatpush.bf16.msra.mxu0 %v10717_v36  ;;  %v3185_v38 = vpop.f32.mrf.mxu0  ;;  %v10812_v36 = vld [vmem:[%s13192_s1 + $0xb8] sm:$0xff] }
 0x1aa   : > { %4780 = vmatpush.bf16.msrb.mxu2 %v10750_v28  ;;  %v10757_v28 = vld [vmem:[%s13192_s1 + $0x140] sm:$0xff]  ;;  %v5064_v1 = vpack.c.b16 %v4973_v61, %v5063_v59  ;;  %v3189_v8 = vadd.f32 %v3185_v38, %v3096_v60  ;;  %v5200_v61 = vpack.c.b16 %v5199_v6, %v5198_v5  ;;  %v10836_v38 = vld [vmem:[%s13192_s1 + $0x178] sm:$0xff]  ;;  %v10834_v59 = vld [vmem:[%s13192_s1 + $0x168] sm:$0xff] }
 0x1ab   : > { %5036 = vmatpush.bf16.msra.mxu3 %v10775_v2  ;;  %v10792_v2 = vld [vmem:[%s13192_s1 + $0x18] sm:$0xff]  ;;  %v10815_v60 = vld [vmem:[%s13192_s1 + $0xd0] sm:$0xff]  ;;  %v10805_v5 = vld [vmem:[%s13192_s1 + $0x80] sm:$0xff] }
 0x1ac   : > { %4943 = vmatpush.bf16.msra.mxu1 %v10767_v63  ;;  %4527 = vmatmul.bf16.vlgmr.msra.gmra.mxu0 %v12376_v43  ;;  %v5132_v43 = vld [vmem:[%s13195_s4] sm:$0x3]  ;;  %v9490_v63 = vld [vmem:[%s11332_s27 + $0x14] sm:$0xf]  ;;  %v5065_v16 = vrot.slane %v5064_v1, 1  ;;  %v10814_v1 = vld [vmem:[%s13192_s1 + $0xc8] sm:$0xff] }
 0x1ad   : > { %4858 = vmatpush.bf16.msrb.mxu0 %v10764_v15  ;;  %v5137_v20 = vsel %vm1141_vm0, %v5132_v43, 0 }
 0x1ae   : > { %4781 = vmatpush.bf16.msrb.mxu2 %v10749_v11  ;;  %v4808_v11 = vrot.slane %v4807_v22, 1  ;;  %v5349_v22 = vunpack.c.l.b16 %v9575_v54 }
 0x1af   : > { %5037 = vmatpush.bf16.msra.mxu3 %v10774_v3  ;;  %v10791_v3 = vld [vmem:[%s13192_s1 + $0x10] sm:$0xff] }
 0x1b0   : > { %4944 = vmatpush.bf16.msra.mxu1 %v10766_v14  ;;  %v3269_v35 = vpop.f32.mrf.mxu2  ;;  %v12618_v42 = vpop.f32.mrf.mxu1  ;;  %v10798_v14 = vld [vmem:[%s13192_s1 + $0x48] sm:$0xff] }
 0x1b1   : > { %4859 = vmatpush.bf16.msrb.mxu0 %v10763_v13  ;;  %4782 = vmatmul.bf16.vlgmr.msrb.gmra.mxu2 %v4724_v18  ;;  %v3187_v55 = vpop.f32.mrf.mxu0  ;;  %v10811_v13 = vld [vmem:[%s13192_s1 + $0xb0] sm:$0xff]  ;;  %v5204_v18 = vshll.u32 %v5200_v61, 16 }
 0x1b2   : > { %5115 = vmatpush.bf16.msra.mxu2 %v10788_v4  ;;  %v10781_v4 = vld [vmem:[%s13192_s1 + $0x200] sm:$0xff] }
 0x1b3   : > { %5038 = vmatpush.bf16.msra.mxu3 %v10773_v26  ;;  %v5206_v43 = vrot.slane %v5204_v18, 1  ;;  %v10790_v26 = vld [vmem:[%s13192_s1 + $0x8] sm:$0xff]  ;;  %v10825_v55 = vld [vmem:[%s13192_s1 + $0x120] sm:$0xff]  ;;  %v10843_v18 = vld [vmem:[%s13192_s1 + $0x1b0] sm:$0xff] }
 0x1b4   : > { %4945 = vmatpush.bf16.msra.mxu1 %v10765_v12  ;;  %v5202_v12 = vshrl.u32 %v5200_v61, 16  ;;  %v10813_v61 = vld [vmem:[%s13192_s1 + $0xc0] sm:$0xff] }
 0x1b5   : > { %4860 = vmatpush.bf16.msrb.mxu0 %v10762_v21  ;;  %v10819_v21 = vld [vmem:[%s13192_s1 + $0xf0] sm:$0xff] }
 0x1b6   : > { %5116 = vmatpush.bf16.msra.mxu2 %v10787_v19  ;;  %5039 = vmatmul.bf16.vlgmr.msra.gmra.mxu3 %v4981_v32  ;;  %v3273_v19 = vadd.f32 %v3269_v35, %v3189_v8  ;;  %v5207_v32 = vor.u32 %v5206_v43, %v5202_v12  ;;  %v10962_v35 = vld [vmem:[%s13196_s5] ss:$0 sm:$0xff]  ;;  %v9723_v12 = vld [vmem:[%s11099_s16 + $0x38] sm:$0xe] }
 0x1b7   : > { %5146 = vmatpush.bf16.msrb.mxu3 %v5137_v20  ;;  %4946 = vmatmul.bf16.vlgmr.msra.gmra.mxu1 %v9342_v33  ;;  %v10809_v33 = vld [vmem:[%s13192_s1 + $0xa0] sm:$0xff]  ;;  %v9624_v43 = vld [vmem:[%s11099_s16 + $0x38] sm:$0xf] }
 0x1b8   : > { %5257 = vmatpush.bf16.msrb.mxu1 %v10804_v25  ;;  %v3271_v15 = vpop.f32.mrf.mxu2  ;;  %v3444_v0 = vpop.f32.mrf.mxu1  ;;  %v10828_v25 = vld [vmem:[%s13192_s1 + $0x138] sm:$0xff]  ;;  %v3353_v20 = vadd.f32 %v12553_v10, %v3273_v19  ;;  %v10789_v10 = vld [vmem:[%s13192_s1] sm:$0xff]  ;;  %v10822_v19 = vld [vmem:[%s13192_s1 + $0x108] sm:$0xff] }
 0x1b9   : > { %4861 = vmatpush.bf16.msrb.mxu0 %v10761_v30  ;;  %v10818_v30 = vld [vmem:[%s13192_s1 + $0xe8] sm:$0xff] }
 0x1ba   : > { %5117 = vmatpush.bf16.msra.mxu2 %v10786_v9  ;;  %v12702_v9 = vpop.f32.mrf.mxu3 }
 0x1bb   : > { %5318 = vmatpush.bf16.msra.mxu3 %v10796_v37  ;;  %v3446_v37 = vadd.f32 %v12618_v42, %v3353_v20  ;;  %v10842_v20 = vld [vmem:[%s13192_s1 + $0x1a8] sm:$0xff] }
 0x1bc   : > { %5258 = vmatpush.bf16.msrb.mxu1 %v10803_v27  ;;  %v10827_v27 = vld [vmem:[%s13192_s1 + $0x130] sm:$0xff] }
 0x1bd   : > { %4862 = vmatpush.bf16.msrb.mxu0 %v10760_v39  ;;  %v10817_v39 = vld [vmem:[%s13192_s1 + $0xe0] sm:$0xff] }
 0x1be   : > { %5118 = vmatpush.bf16.msra.mxu2 %v10785_v7 }
 0x1bf   : > { %5319 = vmatpush.bf16.msra.mxu3 %v10795_v41  ;;  %v10808_v41 = vld [vmem:[%s13192_s1 + $0x98] sm:$0xff] }
 0x1c0   : > { %5259 = vmatpush.bf16.msrb.mxu1 %v10802_v31  ;;  %v3550_v29 = vpop.f32.mrf.mxu2 }
 0x1c1   : > { %4863 = vmatpush.bf16.msrb.mxu0 %v10759_v47  ;;  %v12733_v47 = vld [vmem:[%s13193_s2] ss:$0 sm:$0xff] }
 0x1c2   : > { %5119 = vmatpush.bf16.msra.mxu2 %v10784_v45  ;;  %v3670_v45 = vpop.f32.mrf.mxu3 }
 0x1c3   : > { %5320 = vmatpush.bf16.msra.mxu3 %v10794_v50  ;;  %v10816_v50 = vld [vmem:[%s13192_s1 + $0xd8] sm:$0xff] }
 0x1c4   : > { %5260 = vmatpush.bf16.msrb.mxu1 %v10801_v40  ;;  %v10835_v40 = vld [vmem:[%s13192_s1 + $0x170] sm:$0xff] }
 0x1c5   : > { %4864 = vmatpush.bf16.msrb.mxu0 %v10758_v57  ;;  %v12756_v57 = vld [vmem:[%s11099_s16 + $0x3c] sm:$0x1] }
 0x1c6   : > { %5120 = vmatpush.bf16.msra.mxu2 %v10783_v52  ;;  %9491 = vmatmul.msk.bf16.vlgmr.msrb.gmra.mxu3 %vm1137_vm1, %v9490_v63  ;;  %v10807_v52 = vld [vmem:[%s13192_s1 + $0x90] sm:$0xff]  ;;  %v10824_v63 = vld [vmem:[%s13192_s1 + $0x118] sm:$0xff] }
 0x1c7   : > { %5321 = vmatpush.bf16.msra.mxu3 %v10793_v23 }
 0x1c8   : > { %5261 = vmatpush.bf16.msrb.mxu1 %v10800_v58  ;;  %v3552_v42 = vpop.f32.mrf.mxu2  ;;  %v9673_v58 = vld [vmem:[%s11099_s16 + $0x38] sm:$0xf] }
 0x1c9   : > { %4865 = vmatpush.bf16.msrb.mxu0 %v10757_v28  ;;  %v3526_v7 = vpop.f32.mrf.mxu0  ;;  %v5514_v15 = vunpack.c.l.b16 %v9673_v58  ;;  %v12850_v42 = vld [vmem:[%s11099_s16 + $0x44] sm:$0x1]  ;;  %v10839_v58 = vld [vmem:[%s13192_s1 + $0x190] sm:$0xff] }
 0x1ca   : > { %5121 = vmatpush.bf16.msra.mxu2 %v10782_v62  ;;  %v3530_v31 = vadd.f32 %v3526_v7, %v3446_v37 }
 0x1cb   : > { %5322 = vmatpush.bf16.msra.mxu3 %v10792_v2  ;;  %v5350_v2 = vpack.c.b16 %v5199_v6, %v5349_v22  ;;  %v10832_v6 = vld [vmem:[%s13192_s1 + $0x158] sm:$0xff] }
 0x1cc   : > { %5262 = vmatpush.bf16.msrb.mxu1 %v10799_v53  ;;  %4866 = vmatmul.bf16.vlgmr.msrb.gmra.mxu0 %v4808_v11  ;;  %v3531_v48 = vadd.f32 %v12733_v47, %v3530_v31  ;;  %v5515_v53 = vunpack.c.l.b16 %v12756_v57  ;;  %v10859_v31 = vld [vmem:[%s13192_s1 + $0x230] sm:$0xff]  ;;  %v10848_v57 = vld [vmem:[%s13192_s1 + $0x1d8] sm:$0xff] }
 0x1cd   : > { %5401 = vmatpush.bf16.msra.mxu0 %v10812_v36  ;;  %v10806_v36 = vld [vmem:[%s13192_s1 + $0x88] sm:$0xff] }
 0x1ce   : > { %5122 = vmatpush.bf16.msra.mxu2 %v10781_v4  ;;  %v3554_v51 = vadd.f32 %v3550_v29, %v3531_v48  ;;  %v5516_v11 = vpack.c.b16 %v5515_v53, %v5514_v15  ;;  %v10844_v4 = vld [vmem:[%s13192_s1 + $0x1b8] sm:$0xff]  ;;  %v10821_v29 = vld [vmem:[%s13192_s1 + $0x100] sm:$0xff] }
 0x1cf   : > { %5323 = vmatpush.bf16.msra.mxu3 %v10791_v3  ;;  %v10856_v15 = vld [vmem:[%s13192_s1 + $0x218] sm:$0xff] }
 0x1d0   : > { %5263 = vmatpush.bf16.msrb.mxu1 %v10798_v14  ;;  %v12753_v56 = vpop.f32.mrf.mxu1  ;;  %v3559_v23 = vadd.f32 %v10962_v35, %v3554_v51  ;;  %v5520_v3 = vshll.u32 %v5516_v11, 16  ;;  %v9821_v35 = vld [vmem:[%s11099_s16 + $0x40] sm:$0xf]  ;;  %v10858_v51 = vld [vmem:[%s13192_s1 + $0x228] sm:$0xff] }
 0x1d1   : > { %5402 = vmatpush.bf16.msra.mxu0 %v10811_v13  ;;  %5123 = vmatmul.bf16.vlgmr.msra.gmra.mxu2 %v5065_v16  ;;  %v3528_v62 = vpop.f32.mrf.mxu0  ;;  %v5351_v13 = vrot.slane %v5350_v2, 1  ;;  %v10852_v16 = vld [vmem:[%s13192_s1 + $0x1f8] sm:$0xff]  ;;  %v5771_v54 = vunpack.c.l.b16 %v9821_v35  ;;  %v3730_v22 = vadd.f32 %v12753_v56, %v12702_v9  ;;  %v10882_v9 = vld [vmem:[%s13192_s1 + $0xa8] sm:$0xff] }
 0x1d2   : > { %5480 = vmatpush.bf16.msrb.mxu2 %v10820_v46  ;;  %v3560_v28 = vmax.f32 %v3559_v23, 0.0  ;;  %v10823_v46 = vld [vmem:[%s13192_s1 + $0x110] sm:$0xff]  ;;  %v10857_v23 = vld [vmem:[%s13192_s1 + $0x220] sm:$0xff]  ;;  %v10876_v2 = vld [vmem:[%s13192_s1 + $0x78] sm:$0xff] }
 0x1d3   : > { %5324 = vmatpush.bf16.msra.mxu3 %v10790_v26  ;;  %v5522_v26 = vrot.slane %v5520_v3, 1  ;;  %v9772_v3 = vld [vmem:[%s11099_s16 + $0x40] sm:$0xf] }
 0x1d4   : > { %5264 = vmatpush.bf16.msrb.mxu1 %v10797_v24  ;;  %v3561_v0 = vpack.c.bf16 %v3560_v28, %v3560_v28  ;;  %v12784_v8 = vpop.f32.mrf.mxu2  ;;  %v10847_v28 = vld [vmem:[%s13192_s1 + $0x1d0] sm:$0xff] }
 0x1d5   : > { %5403 = vmatpush.bf16.msra.mxu0 %v10810_v17  ;;  %v10851_v17 = vld [vmem:[%s13192_s1 + $0x1f0] sm:$0xff] }
 0x1d6   : > { %5481 = vmatpush.bf16.msrb.mxu2 %v10819_v21  ;;  %8632 = vst [vmem:[%s11922_s25 + $0xc] sm:$0xf] %v3561_v0  ;;  %v10831_v21 = vld [vmem:[%s13192_s1 + $0x150] sm:$0xff]  ;;  %v3816_v0 = vadd.f32 %v12784_v8, %v3730_v22 }
 0x1d7   : > { %5265 = vmatmul.bf16.vlgmr.msrb.gmra.mxu1 %v5207_v32  ;;  %5325 = vmatpush.bf16.msra.mxu3 %v10789_v10  ;;  %v10860_v32 = vld [vmem:[%s13192_s1 + $0x238] sm:$0xff]  ;;  %v10850_v10 = vld [vmem:[%s13192_s1 + $0x1e8] sm:$0xff] }
 0x1d8   : > { %5573 = vmatpush.bf16.msra.mxu1 %v10828_v25  ;;  %v3731_v49 = vpop.f32.mrf.mxu1  ;;  %v5518_v25 = vshrl.u32 %v5516_v11, 16  ;;  %v9871_v11 = vld [vmem:[%s11099_s16 + $0x40] sm:$0xe] }
 0x1d9   : > { %5404 = vmatpush.bf16.msra.mxu0 %v10809_v33  ;;  %v12798_v14 = vpop.f32.mrf.mxu3  ;;  %v10830_v33 = vld [vmem:[%s13192_s1 + $0x148] sm:$0xff]  ;;  %v10881_v49 = vld [vmem:[%s13192_s1 + $0xa0] sm:$0xff] }
 0x1da   : > { %5482 = vmatpush.bf16.msrb.mxu2 %v10818_v30  ;;  %5326 = vmatmul.bf16.vlgmr.msra.gmra.mxu3 %v12657_v44  ;;  %v10833_v44 = vld [vmem:[%s13192_s1 + $0x160] sm:$0xff]  ;;  %v5605_v30 = vunpack.c.l.b16 %v9723_v12  ;;  %v5523_v37 = vor.u32 %v5522_v26, %v5518_v25  ;;  %v9920_v12 = vld [vmem:[%s11332_s27 + $0x18] sm:$0xf]  ;;  %v10867_v26 = vld [vmem:[%s13192_s1 + $0x30] sm:$0xff] }
 0x1db   : > { %5657 = vmatpush.bf16.msrb.mxu3 %v10836_v38  ;;  %v10841_v38 = vld [vmem:[%s13192_s1 + $0x1a0] sm:$0xff] }
 0x1dc   : > { %5574 = vmatpush.bf16.msra.mxu1 %v10827_v27  ;;  %v3814_v24 = vpop.f32.mrf.mxu2  ;;  %v5606_v7 = vpack.c.b16 %v5515_v53, %v5605_v30  ;;  %v10838_v53 = vld [vmem:[%s13192_s1 + $0x188] sm:$0xff] }
 0x1dd   : > { %5405 = vmatpush.bf16.msra.mxu0 %v10808_v41  ;;  %v10829_v41 = vld [vmem:[%s13192_s1 + $0x140] sm:$0xff]  ;;  %v10880_v24 = vld [vmem:[%s13192_s1 + $0x98] sm:$0xff] }
 0x1de   : > { %5483 = vmatpush.bf16.msrb.mxu2 %v10817_v39  ;;  %v5931_v39 = vld [vmem:[%s13195_s4] sm:$0x3] }
 0x1df   : > { %5658 = vmatpush.bf16.msrb.mxu3 %v10835_v40  ;;  %v5936_v48 = vsel %vm1141_vm0, %v5931_v39, 0  ;;  %v10840_v40 = vld [vmem:[%s13192_s1 + $0x198] sm:$0xff] }
 0x1e0   : > { %5575 = vmatpush.bf16.msra.mxu1 %v10826_v34  ;;  %v10849_v34 = vld [vmem:[%s13192_s1 + $0x1e0] sm:$0xff]  ;;  %v12951_v39 = vld [vmem:[%s11099_s16 + $0x38] sm:$0xf] }
 0x1e1   : > { %5406 = vmatpush.bf16.msra.mxu0 %v10807_v52  ;;  %v3986_v27 = vpop.f32.mrf.mxu3  ;;  %v10884_v52 = vld [vmem:[%s13192_s1 + $0xb8] sm:$0xff] }
 0x1e2   : > { %5484 = vmatpush.bf16.msrb.mxu2 %v10816_v50  ;;  %v5607_v50 = vrot.slane %v5606_v7, 1  ;;  %v10873_v7 = vld [vmem:[%s13192_s1 + $0x60] sm:$0xff] }
 0x1e3   : > { %5659 = vmatpush.bf16.msrb.mxu3 %v10834_v59 }
 0x1e4   : > { %5576 = vmatpush.bf16.msra.mxu1 %v10825_v55  ;;  %v5772_v55 = vunpack.c.l.b16 %v12850_v42  ;;  %v10865_v42 = vld [vmem:[%s13192_s1 + $0x20] sm:$0xff] }
 0x1e5   : > { %5407 = vmatpush.bf16.msra.mxu0 %v10806_v36 }
 0x1e6   : > { %5485 = vmatpush.bf16.msrb.mxu2 %v10815_v60  ;;  %v10883_v60 = vld [vmem:[%s13192_s1 + $0xb0] sm:$0xff]  ;;  %v5773_v62 = vpack.c.b16 %v5772_v55, %v5771_v54  ;;  %v10872_v54 = vld [vmem:[%s13192_s1 + $0x58] sm:$0xff] }
 0x1e7   : > { %5660 = vmatpush.bf16.msrb.mxu3 %v10833_v44  ;;  %v10846_v44 = vld [vmem:[%s13192_s1 + $0x1c8] sm:$0xff] }
 0x1e8   : > { %5577 = vmatpush.bf16.msra.mxu1 %v10824_v63  ;;  %v5777_v56 = vshll.u32 %v5773_v62, 16 }
 0x1e9   : > { %5408 = vmatpush.bf16.msra.mxu0 %v10805_v5  ;;  %v3891_v45 = vpop.f32.mrf.mxu0  ;;  %v10855_v5 = vld [vmem:[%s13192_s1 + $0x210] sm:$0xff] }
 0x1ea   : > { %5486 = vmatpush.bf16.msrb.mxu2 %v10814_v1  ;;  %v10837_v1 = vld [vmem:[%s13192_s1 + $0x180] sm:$0xff] }
 0x1eb   : > { %5661 = vmatpush.bf16.msrb.mxu3 %v10832_v6  ;;  %v3895_v6 = vadd.f32 %v3891_v45, %v3816_v0  ;;  %v10863_v0 = vld [vmem:[%s13192_s1 + $0x10] sm:$0xff] }
 0x1ec   : > { %5578 = vmatpush.bf16.msra.mxu1 %v10823_v46  ;;  %5409 = vmatmul.bf16.vlgmr.msra.gmra.mxu0 %v5351_v13  ;;  %v5779_v46 = vrot.slane %v5777_v56, 1  ;;  %v10915_v56 = vld [vmem:[%s13192_s1 + $0x1b0] sm:$0xff] }
 0x1ed   : > { %5737 = vmatpush.bf16.msrb.mxu0 %v10844_v4  ;;  %v5775_v4 = vshrl.u32 %v5773_v62, 16  ;;  %v3988_v25 = vadd.f32 %v12798_v14, %v3895_v6  ;;  %v10853_v14 = vld [vmem:[%s13192_s1 + $0x200] sm:$0xff]  ;;  %v10864_v62 = vld [vmem:[%s13192_s1 + $0x18] sm:$0xff]  ;;  %v10862_v6 = vld [vmem:[%s13192_s1 + $0x8] sm:$0xff] }
 0x1ee   : > { %5487 = vmatpush.bf16.msrb.mxu2 %v10813_v61  ;;  %v10845_v61 = vld [vmem:[%s13192_s1 + $0x1c0] sm:$0xff] }
 0x1ef   : > { %5662 = vmatpush.bf16.msrb.mxu3 %v10831_v21  ;;  %v10854_v21 = vld [vmem:[%s13192_s1 + $0x208] sm:$0xff] }
 0x1f0   : > { %5579 = vmatpush.bf16.msra.mxu1 %v10822_v19  ;;  %v12871_v59 = vpop.f32.mrf.mxu1  ;;  %v10875_v19 = vld [vmem:[%s13192_s1 + $0x70] sm:$0xff] }
 0x1f1   : > { %5738 = vmatpush.bf16.msrb.mxu0 %v10843_v18  ;;  %5488 = vmatmul.bf16.vlgmr.msrb.gmra.mxu2 %v9624_v43  ;;  %v3893_v36 = vpop.f32.mrf.mxu0  ;;  %v5862_v18 = vunpack.c.l.b16 %v9871_v11  ;;  %v4072_v27 = vadd.f32 %v12871_v59, %v3988_v25  ;;  %v10888_v11 = vld [vmem:[%s13192_s1 + $0xd8] sm:$0xff] }
 0x1f2   : > { %5830 = vmatpush.bf16.msra.mxu2 %v10852_v16  ;;  %v10868_v16 = vld [vmem:[%s13192_s1 + $0x38] sm:$0xff]  ;;  %v10963_v36 = vld [vmem:[%s13196_s5] ss:$0 sm:$0xff] }
 0x1f3   : > { %5663 = vmatpush.bf16.msrb.mxu3 %v10830_v33  ;;  %v10879_v33 = vld [vmem:[%s13192_s1 + $0x90] sm:$0xff] }
 0x1f4   : > { %5580 = vmatpush.bf16.msra.mxu1 %v10821_v29  ;;  %v12887_v63 = vpop.f32.mrf.mxu2  ;;  %v10874_v29 = vld [vmem:[%s13192_s1 + $0x68] sm:$0xff] }
 0x1f5   : > { %5739 = vmatpush.bf16.msrb.mxu0 %v10842_v20  ;;  %v5863_v20 = vpack.c.b16 %v5772_v55, %v5862_v18  ;;  %v4152_v45 = vadd.f32 %v12887_v63, %v4072_v27  ;;  %v10889_v63 = vld [vmem:[%s13192_s1 + $0xe0] sm:$0xff]  ;;  %v10900_v18 = vld [vmem:[%s13192_s1 + $0x138] sm:$0xff] }
 0x1f6   : > { %5831 = vmatpush.bf16.msra.mxu2 %v10851_v17  ;;  %v5780_v17 = vor.u32 %v5779_v46, %v5775_v4  ;;  %v10924_v27 = vld [vmem:[%s13192_s1 + $0x1f8] sm:$0xff] }
 0x1f7   : > { %5581 = vmatmul.bf16.vlgmr.msra.gmra.mxu1 %v5523_v37  ;;  %5664 = vmatpush.bf16.msrb.mxu3 %v10829_v41  ;;  %v10866_v37 = vld [vmem:[%s13192_s1 + $0x28] sm:$0xff]  ;;  %v10891_v41 = vld [vmem:[%s13192_s1 + $0xf0] sm:$0xff] }
 0x1f8   : > { %5914 = vmatpush.bf16.msrb.mxu1 %v10860_v32  ;;  %v4070_v8 = vpop.f32.mrf.mxu1  ;;  %v10892_v32 = vld [vmem:[%s13192_s1 + $0xf8] sm:$0xff] }
 0x1f9   : > { %5740 = vmatpush.bf16.msrb.mxu0 %v10841_v38  ;;  %v4325_v13 = vpop.f32.mrf.mxu3  ;;  %v5864_v38 = vrot.slane %v5863_v20, 1  ;;  %v10886_v20 = vld [vmem:[%s13192_s1 + $0xc8] sm:$0xff] }
 0x1fa   : > { %5832 = vmatpush.bf16.msra.mxu2 %v10850_v10  ;;  %5665 = vmatmul.bf16.vlgmr.msrb.gmra.mxu3 %v5607_v50 }
 0x1fb   : > { %5945 = vmatpush.bf16.msra.mxu3 %v5936_v48  ;;  %v10005_v48 = vld [vmem:[%s11099_s16 + $0x38] sm:$0xe] }
 0x1fc   : > { %5915 = vmatpush.bf16.msrb.mxu1 %v10859_v31  ;;  %v4150_v43 = vpop.f32.mrf.mxu2  ;;  %v9924_v31 = vld [vmem:[%s11099_s16 + $0x3c] sm:$0x1] }
 0x1fd   : > { %5741 = vmatpush.bf16.msrb.mxu0 %v10840_v40  ;;  %v5997_v40 = vunpack.c.l.b16 %v12951_v39  ;;  %v5998_v50 = vunpack.c.l.b16 %v9924_v31  ;;  %v10054_v31 = vld [vmem:[%s11099_s16 + $0x40] sm:$0xf] }
 0x1fe   : > { %5833 = vmatpush.bf16.msra.mxu2 %v10849_v34  ;;  %v10878_v34 = vld [vmem:[%s13192_s1 + $0x88] sm:$0xff] }
 0x1ff   : > { %6200 = vmatpush.bf16.msrb.mxu3 %v10884_v52  ;;  %v5999_v22 = vpack.c.b16 %v5998_v50, %v5997_v40 }
 0x200   : > { %5916 = vmatpush.bf16.msrb.mxu1 %v10858_v51  ;;  %v4349_v30 = vpop.f32.mrf.mxu1  ;;  %v6148_v51 = vunpack.c.l.b16 %v10005_v48  ;;  %v10905_v48 = vld [vmem:[%s13192_s1 + $0x160] sm:$0xff] }
 0x201   : > { %5742 = vmatpush.bf16.msrb.mxu0 %v10839_v58  ;;  %v4327_v10 = vpop.f32.mrf.mxu3  ;;  %v10877_v58 = vld [vmem:[%s13192_s1 + $0x80] sm:$0xff] }
 0x202   : > { %5834 = vmatpush.bf16.msra.mxu2 %v10848_v57  ;;  %v10890_v57 = vld [vmem:[%s13192_s1 + $0xe8] sm:$0xff]  ;;  %v10911_v10 = vld [vmem:[%s13192_s1 + $0x190] sm:$0xff] }
 0x203   : > { %6201 = vmatpush.bf16.msrb.mxu3 %v10883_v60  ;;  %v10916_v60 = vld [vmem:[%s13192_s1 + $0x1b8] sm:$0xff] }
 0x204   : > { %5917 = vmatpush.bf16.msrb.mxu1 %v10857_v23  ;;  %v6149_v23 = vpack.c.b16 %v5998_v50, %v6148_v51  ;;  %v10896_v50 = vld [vmem:[%s13192_s1 + $0x118] sm:$0xff]  ;;  %v10922_v51 = vld [vmem:[%s13192_s1 + $0x1e8] sm:$0xff] }
 0x205   : > { %5743 = vmatpush.bf16.msrb.mxu0 %v10838_v53  ;;  %v10871_v53 = vld [vmem:[%s13192_s1 + $0x50] sm:$0xff] }
 0x206   : > { %5835 = vmatpush.bf16.msra.mxu2 %v10847_v28 }
 0x207   : > { %6202 = vmatpush.bf16.msrb.mxu3 %v10882_v9 }
 0x208   : > { %5918 = vmatpush.bf16.msrb.mxu1 %v10856_v15  ;;  %v4351_v55 = vpop.f32.mrf.mxu1  ;;  %v6150_v15 = vrot.slane %v6149_v23, 1  ;;  %v10202_v23 = vld [vmem:[%s11099_s16 + $0x48] sm:$0xf] }
 0x209   : > { %5744 = vmatpush.bf16.msrb.mxu0 %v10837_v1  ;;  %v4241_v35 = vpop.f32.mrf.mxu0  ;;  %v6003_v1 = vshll.u32 %v5999_v22, 16 }
 0x20a   : > { %5836 = vmatpush.bf16.msra.mxu2 %v10846_v44  ;;  %9921 = vmatmul.msk.bf16.vlgmr.msra.gmra.mxu3 %vm1137_vm1, %v9920_v12  ;;  %v4245_v52 = vadd.f32 %v4241_v35, %v4152_v45  ;;  %v10861_v12 = vld [vmem:[%s13192_s1] sm:$0xff]  ;;  %v10910_v45 = vld [vmem:[%s13192_s1 + $0x188] sm:$0xff] }
 0x20b   : > { %6203 = vmatpush.bf16.msrb.mxu3 %v10881_v49  ;;  %v10914_v49 = vld [vmem:[%s13192_s1 + $0x1a8] sm:$0xff] }
 0x20c   : > { %5919 = vmatpush.bf16.msrb.mxu1 %v10855_v5  ;;  %5745 = vmatmul.bf16.vlgmr.msrb.gmra.mxu0 %v9772_v3  ;;  %v4329_v59 = vadd.f32 %v4325_v13, %v4245_v52  ;;  %v10870_v5 = vld [vmem:[%s13192_s1 + $0x48] sm:$0xff]  ;;  %v6005_v13 = vrot.slane %v6003_v1, 1  ;;  %v10869_v3 = vld [vmem:[%s13192_s1 + $0x40] sm:$0xff] }
 0x20d   : > { %6056 = vmatpush.bf16.msra.mxu0 %v10876_v2  ;;  %v10909_v52 = vld [vmem:[%s13192_s1 + $0x180] sm:$0xff]  ;;  %v10902_v1 = vld [vmem:[%s13192_s1 + $0x148] sm:$0xff] }
 0x20e   : > { %5837 = vmatpush.bf16.msra.mxu2 %v10845_v61  ;;  %v4330_v28 = vadd.f32 %v12733_v47, %v4329_v59  ;;  %v6001_v61 = vshrl.u32 %v5999_v22, 16  ;;  %v10251_v59 = vld [vmem:[%s11099_s16 + $0x48] sm:$0xf] }
 0x20f   : > { %6204 = vmatpush.bf16.msrb.mxu3 %v10880_v24  ;;  %v10908_v24 = vld [vmem:[%s13192_s1 + $0x178] sm:$0xff] }
 0x210   : > { %5920 = vmatpush.bf16.msrb.mxu1 %v10854_v21  ;;  %v4353_v9 = vadd.f32 %v4349_v30, %v4330_v28  ;;  %v10913_v21 = vld [vmem:[%s13192_s1 + $0x1a0] sm:$0xff]  ;;  %v6006_v43 = vor.u32 %v6005_v13, %v6001_v61  ;;  %v10907_v30 = vld [vmem:[%s13192_s1 + $0x170] sm:$0xff] }
 0x211   : > { %6057 = vmatpush.bf16.msra.mxu0 %v10875_v19  ;;  %5838 = vmatmul.bf16.vlgmr.msra.gmra.mxu2 %v5780_v17  ;;  %v4243_v44 = vpop.f32.mrf.mxu0  ;;  %v10887_v19 = vld [vmem:[%s13192_s1 + $0xd0] sm:$0xff]  ;;  %v6730_v13 = vld [vmem:[%s13195_s4] sm:$0x3] }
 0x212   : > { %6117 = vmatpush.bf16.msrb.mxu2 %v10868_v16  ;;  %v4358_v2 = vadd.f32 %v10963_v36, %v4353_v9  ;;  %v10153_v36 = vld [vmem:[%s11099_s16 + $0x40] sm:$0xe]  ;;  %v6570_v9 = vunpack.c.l.b16 %v10251_v59 }
 0x213   : > { %6205 = vmatpush.bf16.msrb.mxu3 %v10879_v33  ;;  %v10885_v33 = vld [vmem:[%s13192_s1 + $0xc0] sm:$0xff]  ;;  %v6404_v44 = vunpack.c.l.b16 %v10153_v36 }
 0x214   : > { %5921 = vmatpush.bf16.msrb.mxu1 %v10853_v14  ;;  %v13000_v8 = vpop.f32.mrf.mxu2  ;;  %v13005_v4 = vpop.f32.mrf.mxu1  ;;  %v4359_v46 = vmax.f32 %v4358_v2, 0.0  ;;  %v10912_v14 = vld [vmem:[%s13192_s1 + $0x198] sm:$0xff] }
 0x215   : > { %6058 = vmatpush.bf16.msra.mxu0 %v10874_v29 }
 0x216   : > { %6118 = vmatpush.bf16.msrb.mxu2 %v10867_v26  ;;  %v4360_v16 = vpack.c.bf16 %v4359_v46, %v4359_v46  ;;  %v10899_v26 = vld [vmem:[%s13192_s1 + $0x130] sm:$0xff] }
 0x217   : > { %5922 = vmatmul.bf16.vlgmr.msrb.gmra.mxu1 %v5864_v38  ;;  %6206 = vmatpush.bf16.msrb.mxu3 %v10878_v34  ;;  %v10906_v38 = vld [vmem:[%s13192_s1 + $0x168] sm:$0xff]  ;;  %v10923_v34 = vld [vmem:[%s13192_s1 + $0x1f0] sm:$0xff] }
 0x218   : > { %6279 = vmatpush.bf16.msra.mxu1 %v10892_v32  ;;  %9062 = vst [vmem:[%s11922_s25 + $0x10] sm:$0xf] %v4360_v16  ;;  %v10898_v32 = vld [vmem:[%s13192_s1 + $0x128] sm:$0xff] }
 0x219   : > { %6059 = vmatpush.bf16.msra.mxu0 %v10873_v7  ;;  %v13029_v17 = vpop.f32.mrf.mxu3  ;;  %v10897_v7 = vld [vmem:[%s13192_s1 + $0x120] sm:$0xff] }
 0x21a   : > { %6119 = vmatpush.bf16.msrb.mxu2 %v10866_v37 }
 0x21b   : > { %6207 = vmatpush.bf16.msrb.mxu3 %v10877_v58  ;;  %v10921_v58 = vld [vmem:[%s13192_s1 + $0x1e0] sm:$0xff] }
 0x21c   : > { %6280 = vmatpush.bf16.msra.mxu1 %v10891_v41  ;;  %v4469_v25 = vpop.f32.mrf.mxu2  ;;  %v4613_v29 = vpop.f32.mrf.mxu1  ;;  %v10103_v41 = vld [vmem:[%s11099_s16 + $0x40] sm:$0xf] }
 0x21d   : > { %6060 = vmatpush.bf16.msra.mxu0 %v10872_v54  ;;  %v10904_v54 = vld [vmem:[%s13192_s1 + $0x158] sm:$0xff]  ;;  %v6735_v25 = vsel %vm1141_vm0, %v6730_v13, 0 }
 0x21e   : > { %6120 = vmatpush.bf16.msrb.mxu2 %v10865_v42  ;;  %6208 = vmatmul.bf16.vlgmr.msrb.gmra.mxu3 %v6150_v15  ;;  %v6313_v42 = vunpack.c.l.b16 %v10103_v41 }
 0x21f   : > { %6536 = vmatpush.bf16.msra.mxu3 %v10916_v60  ;;  %v13098_v60 = vld [vmem:[%s11099_s16 + $0x4c] sm:$0x1] }
 0x220   : > { %6281 = vmatpush.bf16.msra.mxu1 %v10890_v57  ;;  %v10895_v57 = vld [vmem:[%s13192_s1 + $0x110] sm:$0xff] }
 0x221   : > { %6061 = vmatpush.bf16.msra.mxu0 %v10871_v53  ;;  %v4692_v37 = vpop.f32.mrf.mxu3  ;;  %v10894_v53 = vld [vmem:[%s13192_s1 + $0x108] sm:$0xff] }
 0x222   : > { %6121 = vmatpush.bf16.msrb.mxu2 %v10864_v62  ;;  %v10903_v62 = vld [vmem:[%s13192_s1 + $0x150] sm:$0xff] }
 0x223   : > { %6537 = vmatpush.bf16.msra.mxu3 %v10915_v56  ;;  %v6571_v56 = vunpack.c.l.b16 %v13098_v60 }
 0x224   : > { %6282 = vmatpush.bf16.msra.mxu1 %v10889_v63 }
 0x225   : > { %6062 = vmatpush.bf16.msra.mxu0 %v10870_v5  ;;  %v6572_v46 = vpack.c.b16 %v6571_v56, %v6570_v9 }
 0x226   : > { %6122 = vmatpush.bf16.msrb.mxu2 %v10863_v0  ;;  %v10920_v0 = vld [vmem:[%s13192_s1 + $0x1d8] sm:$0xff] }
 0x227   : > { %6538 = vmatpush.bf16.msra.mxu3 %v10914_v49  ;;  %v10932_v49 = vld [vmem:[%s13192_s1 + $0x238] sm:$0xff]  ;;  %v6574_v29 = vshrl.u32 %v6572_v46, 16 }
 0x228   : > { %6283 = vmatpush.bf16.msra.mxu1 %v10888_v11  ;;  %v10893_v11 = vld [vmem:[%s13192_s1 + $0x100] sm:$0xff] }
 0x229   : > { %6063 = vmatpush.bf16.msra.mxu0 %v10869_v3  ;;  %v4528_v35 = vpop.f32.mrf.mxu0  ;;  %v10901_v3 = vld [vmem:[%s13192_s1 + $0x140] sm:$0xff] }
 0x22a   : > { %6123 = vmatpush.bf16.msrb.mxu2 %v10862_v6  ;;  %v10919_v6 = vld [vmem:[%s13192_s1 + $0x1d0] sm:$0xff]  ;;  %v4529_v16 = vadd.f32 %v4528_v35, %v13000_v8  ;;  %v10918_v8 = vld [vmem:[%s13192_s1 + $0x1c8] sm:$0xff] }
 0x22b   : > { %6539 = vmatpush.bf16.msra.mxu3 %v10913_v21 }
 0x22c   : > { %6284 = vmatpush.bf16.msra.mxu1 %v10887_v19  ;;  %6064 = vmatmul.bf16.vlgmr.msra.gmra.mxu0 %v6006_v43 }
 0x22d   : > { %6372 = vmatpush.bf16.msrb.mxu0 %v10900_v18 }
 0x22e   : > { %6124 = vmatpush.bf16.msrb.mxu2 %v10861_v12  ;;  %v6576_v12 = vshll.u32 %v6572_v46, 16 }
 0x22f   : > { %6540 = vmatpush.bf16.msra.mxu3 %v10912_v14 }
 0x230   : > { %6285 = vmatpush.bf16.msra.mxu1 %v10886_v20  ;;  %v4615_v20 = vadd.f32 %v13005_v4, %v4529_v16  ;;  %v6578_v14 = vrot.slane %v6576_v12, 1 }
 0x231   : > { %6373 = vmatpush.bf16.msrb.mxu0 %v10899_v26  ;;  %6125 = vmatmul.bf16.vlgmr.msrb.gmra.mxu2 %v12951_v39  ;;  %v10104_v39 = vld [vmem:[%s11099_s16 + $0x44] sm:$0x1]  ;;  %v4530_v22 = vpop.f32.mrf.mxu0 }
 0x232   : > { %6456 = vmatpush.bf16.msra.mxu2 %v10908_v24  ;;  %v6314_v40 = vunpack.c.l.b16 %v10104_v39  ;;  %v10931_v24 = vld [vmem:[%s13192_s1 + $0x230] sm:$0xff] }
 0x233   : > { %6541 = vmatpush.bf16.msra.mxu3 %v10911_v10  ;;  %v10929_v10 = vld [vmem:[%s13192_s1 + $0x220] sm:$0xff]  ;;  %v10927_v39 = vld [vmem:[%s13192_s1 + $0x210] sm:$0xff] }
 0x234   : > { %6286 = vmatpush.bf16.msra.mxu1 %v10885_v33  ;;  %v6315_v55 = vpack.c.b16 %v6314_v40, %v6313_v42  ;;  %v4783_v15 = vpop.f32.mrf.mxu2  ;;  %v4947_v63 = vpop.f32.mrf.mxu1  ;;  %v6405_v61 = vpack.c.b16 %v6314_v40, %v6404_v44  ;;  %v4694_v33 = vadd.f32 %v13029_v17, %v4615_v20 }
 0x235   : > { %6374 = vmatpush.bf16.msrb.mxu0 %v10898_v32  ;;  %v10917_v32 = vld [vmem:[%s13192_s1 + $0x1c0] sm:$0xff] }
 0x236   : > { %6457 = vmatpush.bf16.msra.mxu2 %v10907_v30  ;;  %v6319_v28 = vshll.u32 %v6315_v55, 16  ;;  %v6317_v2 = vshrl.u32 %v6315_v55, 16  ;;  %v6406_v26 = vrot.slane %v6405_v61, 1  ;;  %v10930_v30 = vld [vmem:[%s13192_s1 + $0x228] sm:$0xff]  ;;  %v4787_v37 = vadd.f32 %v4783_v15, %v4694_v33 }
 0x237   : > { %6287 = vmatmul.bf16.vlgmr.msra.gmra.mxu1 %v10054_v31  ;;  %6542 = vmatpush.bf16.msra.mxu3 %v10910_v45  ;;  %v10928_v31 = vld [vmem:[%s13192_s1 + $0x218] sm:$0xff] }
 0x238   : > { %6629 = vmatpush.bf16.msrb.mxu1 %v10924_v27  ;;  %v6321_v5 = vrot.slane %v6319_v28, 1  ;;  %v6579_v27 = vor.u32 %v6578_v14, %v6574_v29  ;;  %v10350_v45 = vld [vmem:[%s11332_s27 + $0x1c] sm:$0xf] }
 0x239   : > { %6375 = vmatpush.bf16.msrb.mxu0 %v10897_v7  ;;  %v5040_v19 = vpop.f32.mrf.mxu3 }
 0x23a   : > { %6458 = vmatpush.bf16.msra.mxu2 %v10906_v38  ;;  %v6322_v18 = vor.u32 %v6321_v5, %v6317_v2 }
 0x23b   : > { %6543 = vmatpush.bf16.msra.mxu3 %v10909_v52 }
 0x23c   : > { %6630 = vmatpush.bf16.msrb.mxu1 %v10923_v34  ;;  %v4785_v21 = vpop.f32.mrf.mxu2  ;;  %v4949_v43 = vpop.f32.mrf.mxu1  ;;  %v10301_v34 = vld [vmem:[%s11099_s16 + $0x48] sm:$0xe] }
 0x23d   : > { %6376 = vmatpush.bf16.msrb.mxu0 %v10896_v50  ;;  %v6661_v35 = vunpack.c.l.b16 %v10301_v34  ;;  %v10926_v50 = vld [vmem:[%s13192_s1 + $0x208] sm:$0xff] }
 0x23e   : > { %6459 = vmatpush.bf16.msra.mxu2 %v10905_v48  ;;  %6544 = vmatmul.bf16.vlgmr.msra.gmra.mxu3 %v10202_v23  ;;  %v10925_v23 = vld [vmem:[%s13192_s1 + $0x200] sm:$0xff] }
 0x240   : > { %6631 = vmatpush.bf16.msrb.mxu1 %v10922_v51 }
 0x241   : > { %6377 = vmatpush.bf16.msrb.mxu0 %v10895_v57  ;;  %v5042_v4 = vpop.f32.mrf.mxu3  ;;  %v10964_v57 = vld [vmem:[%s13196_s5] ss:$0 sm:$0xff] }
 0x242   : > { %6460 = vmatpush.bf16.msra.mxu2 %v10904_v54 }
 0x244   : > { %6632 = vmatpush.bf16.msrb.mxu1 %v10921_v58  ;;  %v6662_v58 = vpack.c.b16 %v6571_v56, %v6661_v35 }
 0x245   : > { %6378 = vmatpush.bf16.msrb.mxu0 %v10894_v53 }
 0x246   : > { %6461 = vmatpush.bf16.msra.mxu2 %v10903_v62  ;;  %v6663_v22 = vrot.slane %v6662_v58, 1 }
 0x248   : > { %6633 = vmatpush.bf16.msrb.mxu1 %v10920_v0 }
 0x249   : > { %6379 = vmatpush.bf16.msrb.mxu0 %v10893_v11  ;;  %v4867_v38 = vpop.f32.mrf.mxu0  ;;  %v5148_v17 = vpop.f32.mrf.mxu3 }
 0x24a   : > { %6462 = vmatpush.bf16.msra.mxu2 %v10902_v1  ;;  %v4871_v7 = vadd.f32 %v4867_v38, %v4787_v37 }
 0x24c   : > { %6634 = vmatpush.bf16.msrb.mxu1 %v10919_v6  ;;  %6380 = vmatmul.bf16.vlgmr.msrb.gmra.mxu0 %v6322_v18  ;;  %v4951_v41 = vadd.f32 %v4947_v63, %v4871_v7 }
 0x24d   : > { %6713 = vmatpush.bf16.msra.mxu0 %v10932_v49 }
 0x24e   : > { %6463 = vmatpush.bf16.msra.mxu2 %v10901_v3  ;;  %v5044_v48 = vadd.f32 %v5040_v19, %v4951_v41 }
 0x250   : > { %6635 = vmatpush.bf16.msrb.mxu1 %v10918_v8 }
 0x251   : > { %6714 = vmatpush.bf16.msra.mxu0 %v10931_v24  ;;  %6464 = vmatmul.bf16.vlgmr.msra.gmra.mxu2 %v6406_v26  ;;  %v4869_v42 = vpop.f32.mrf.mxu0  ;;  %v5150_v54 = vpop.f32.mrf.mxu3 }
 0x252   : > { %6744 = vmatpush.bf16.msrb.mxu2 %v6735_v25  ;;  %v10965_v25 = vld [vmem:[%s13196_s5] ss:$0 sm:$0xff] }
 0x254   : > { %6636 = vmatpush.bf16.msrb.mxu1 %v10917_v32  ;;  %v5124_v40 = vpop.f32.mrf.mxu2  ;;  %v5266_v51 = vpop.f32.mrf.mxu1 }
 0x255   : > { %6715 = vmatpush.bf16.msra.mxu0 %v10930_v30  ;;  %v5128_v52 = vadd.f32 %v5124_v40, %v5044_v48 }
 0x257   : > { %6637 = vmatmul.bf16.vlgmr.msrb.gmra.mxu1 %v6579_v27  ;;  %v5129_v55 = vadd.f32 %v12733_v47, %v5128_v52 }
 0x259   : > { %6716 = vmatpush.bf16.msra.mxu0 %v10929_v10  ;;  %v5152_v59 = vadd.f32 %v5148_v17, %v5129_v55 }
 0x25b   : > { %v5157_v62 = vadd.f32 %v10964_v57, %v5152_v59 }
 0x25c   : > { %v5126_v28 = vpop.f32.mrf.mxu2  ;;  %v5268_v36 = vpop.f32.mrf.mxu1 }
 0x25d   : > { %6717 = vmatpush.bf16.msra.mxu0 %v10928_v31  ;;  %v5158_v53 = vmax.f32 %v5157_v62, 0.0  ;;  %v5327_v63 = vpop.f32.mrf.mxu3  ;;  %v10966_v28 = vld [vmem:[%s13196_s5] ss:$0 sm:$0xff] }
 0x25e   : > { %v5328_v1 = vadd.f32 %v5327_v63, %v5266_v51 }
 0x25f   : > { %v5159_v15 = vpack.c.bf16 %v5158_v53, %v5158_v53 }
 0x261   : > { %6718 = vmatpush.bf16.msra.mxu0 %v10927_v39  ;;  %10351 = vmatmul.msk.bf16.vlgmr.msrb.gmra.mxu2 %vm1137_vm1, %v10350_v45  ;;  %9492 = vst [vmem:[%s11922_s25 + $0x14] sm:$0xf] %v5159_v15 }
 0x265   : > { %6719 = vmatpush.bf16.msra.mxu0 %v10926_v50  ;;  %v5329_v9 = vpop.f32.mrf.mxu3 }
 0x269   : > { %6720 = vmatpush.bf16.msra.mxu0 %v10925_v23  ;;  %v5410_v0 = vpop.f32.mrf.mxu0 }
 0x26a   : > { %v5414_v11 = vadd.f32 %v5410_v0, %v5328_v1 }
 0x26c   : > { %6721 = vmatmul.bf16.vlgmr.msra.gmra.mxu0 %v6663_v22 }
 0x271   : > { %v5412_v60 = vpop.f32.mrf.mxu0 }
 0x274   : > { %v5489_v56 = vpop.f32.mrf.mxu2  ;;  %v5582_v44 = vpop.f32.mrf.mxu1 }
 0x275   : > { %v5493_v49 = vadd.f32 %v5489_v56, %v5414_v11 }
 0x277   : > { %v5586_v6 = vadd.f32 %v5582_v44, %v5493_v49 }
 0x27c   : > { %v5491_v2 = vpop.f32.mrf.mxu2  ;;  %v5584_v5 = vpop.f32.mrf.mxu1 }
 0x27d   : > { %v5666_v46 = vpop.f32.mrf.mxu3 }
 0x27e   : > { %v5670_v16 = vadd.f32 %v5666_v46, %v5586_v6 }
 0x285   : > { %v5668_v61 = vpop.f32.mrf.mxu3 }
 0x289   : > { %v5746_v13 = vpop.f32.mrf.mxu0 }
 0x28a   : > { %v5750_v3 = vadd.f32 %v5746_v13, %v5670_v16 }
 0x28d   : > { %v5947_v18 = vpop.f32.mrf.mxu3 }
 0x291   : > { %v5748_v19 = vpop.f32.mrf.mxu0 }
 0x294   : > { %v5839_v21 = vpop.f32.mrf.mxu2  ;;  %v5923_v12 = vpop.f32.mrf.mxu1 }
 0x295   : > { %v5843_v43 = vadd.f32 %v5839_v21, %v5750_v3  ;;  %v5949_v26 = vpop.f32.mrf.mxu3 }
 0x297   : > { %v5927_v24 = vadd.f32 %v5923_v12, %v5843_v43 }
 0x299   : > { %v5928_v8 = vadd.f32 %v12733_v47, %v5927_v24 }
 0x29b   : > { %v5951_v20 = vadd.f32 %v5947_v18, %v5928_v8 }
 0x29c   : > { %v5841_v29 = vpop.f32.mrf.mxu2  ;;  %v5925_v14 = vpop.f32.mrf.mxu1 }
 0x29d   : > { %v5956_v30 = vadd.f32 %v10965_v25, %v5951_v20 }
 0x29f   : > { %v5957_v32 = vmax.f32 %v5956_v30, 0.0 }
 0x2a1   : > { %v5958_v33 = vpack.c.bf16 %v5957_v32, %v5957_v32  ;;  %v6209_v4 = vpop.f32.mrf.mxu3 }
 0x2a3   : > { %9922 = vst [vmem:[%s11922_s25 + $0x18] sm:$0xf] %v5958_v33 }
 0x2a9   : > { %v6065_v27 = vpop.f32.mrf.mxu0  ;;  %v6211_v10 = vpop.f32.mrf.mxu3 }
 0x2b1   : > { %v6067_v37 = vpop.f32.mrf.mxu0 }
 0x2b4   : > { %v6126_v38 = vpop.f32.mrf.mxu2  ;;  %v6288_v7 = vpop.f32.mrf.mxu1 }
 0x2b5   : > { %v6127_v45 = vadd.f32 %v6126_v38, %v6065_v27 }
 0x2b7   : > { %v6213_v40 = vadd.f32 %v6209_v4, %v6127_v45 }
 0x2b9   : > { %v6292_v50 = vadd.f32 %v6288_v7, %v6213_v40 }
 0x2bc   : > { %v6128_v31 = vpop.f32.mrf.mxu2  ;;  %v6290_v17 = vpop.f32.mrf.mxu1 }
 0x2c1   : > { %v6545_v41 = vpop.f32.mrf.mxu3 }
 0x2c9   : > { %v6381_v39 = vpop.f32.mrf.mxu0  ;;  %v6547_v34 = vpop.f32.mrf.mxu3 }
 0x2ca   : > { %v6385_v54 = vadd.f32 %v6381_v39, %v6292_v50 }
 0x2d1   : > { %v6383_v48 = vpop.f32.mrf.mxu0 }
 0x2d4   : > { %v6465_v35 = vpop.f32.mrf.mxu2  ;;  %v6638_v42 = vpop.f32.mrf.mxu1 }
 0x2d5   : > { %v6469_v55 = vadd.f32 %v6465_v35, %v6385_v54 }
 0x2d7   : > { %v6549_v57 = vadd.f32 %v6545_v41, %v6469_v55 }
 0x2d9   : > { %v6642_v23 = vadd.f32 %v6638_v42, %v6549_v57 }
 0x2dc   : > { %v6467_v51 = vpop.f32.mrf.mxu2  ;;  %v6640_v52 = vpop.f32.mrf.mxu1 }
 0x2e4   : > { %v6746_v58 = vpop.f32.mrf.mxu2 }
 0x2e9   : > { %v6722_v59 = vpop.f32.mrf.mxu0 }
 0x2ea   : > { %v6726_v62 = vadd.f32 %v6722_v59, %v6642_v23 }
 0x2ec   : > { %v6727_v22 = vadd.f32 %v12733_v47, %v6726_v62  ;;  %v6748_v36 = vpop.f32.mrf.mxu2 }
 0x2ee   : > { %v6750_v53 = vadd.f32 %v6746_v58, %v6727_v22 }
 0x2f0   : > { %v6755_v15 = vadd.f32 %v10966_v28, %v6750_v53 }
 0x2f1   : > { %v6724_v63 = vpop.f32.mrf.mxu0 }
 0x2f2   : > { %v6756_v9 = vmax.f32 %v6755_v15, 0.0 }
 0x2f4   : > { %v6757_v0 = vpack.c.bf16 %v6756_v9, %v6756_v9 }
 0x2f6   : > { %10352 = vst [vmem:[%s11922_s25 + $0x1c] sm:$0xf] %v6757_v0 }
 0x2f7 PF: > { %s16_s23 = sadd.s32 1, %s10990_s23   ;;  %s13198_s21 = smov %s10986_s22 }
 0x2f8   : > { %p13_p5 = scmp.ge.s32.totalorder %s16_s23, 4   ;;  %s13199_s22 = smov %s13201_s24 }
 0x2fa   :  { %15 = sbr.rel (!%p13_p5) target bundleno = 2 (0x2), region = 120 }

</bundles_post_ra>
